<compile_context>
chip_gen: v7x
topology: tpu7x:2x2x1
jax: 0.10.0
libtpu: 0.0.40
codegen_flags: <defaults>
</compile_context>

<pallas_src>
import jax
import jax.numpy as jnp
from jax.experimental import pallas as pl
from jax.experimental.pallas import tpu as pltpu

SEQ = 37           # obs rows 1..37
OBS_FEAT = 17      # features per obs row
OWN_FEAT = 9       # own-state features from row 0
NUM_LOGITS = 7 + 16
HEAD_OUT = NUM_LOGITS + 1   # fused [logits | value] output width = 24


def _round_up(x, m):
    return (x + m - 1) // m * m


# ----------------------------------------------------------------------------
# Kernel
# ----------------------------------------------------------------------------
def _comm_net_kernel(seq_ref, sown_ref,
                     sw1, sb1, sw2, sb2, sw3, sb3,          # shared MLP
                     hw1e, hw1o, hb1, hw2, hb2, hw3, hb3,   # fused action+value head
                     out_ref):
    seq = seq_ref[...]                        # [TB*37, 17]  f32
    s_own = sown_ref[...]                     # [TB, 9]      f32
    tb = s_own.shape[0]

    # non-padded (not-all-zero) rows -> 1.0 ; padded rows -> 0.0
    mask = (jnp.sum(jnp.abs(seq), axis=-1, keepdims=True) != 0.0).astype(jnp.float32)

    def dense(x, w_ref, b_ref, relu=True):
        # matmul inputs in the weight dtype (bf16 path on v6e/v7x),
        # accumulation + elementwise in f32 (v5e-friendly).
        y = jnp.dot(x.astype(w_ref.dtype), w_ref[...],
                    preferred_element_type=jnp.float32)
        y = y + b_ref[...].astype(jnp.float32)
        return jnp.maximum(y, 0.0) if relu else y

    # shared MLP on every row; padded rows zeroed afterwards (mathematically
    # identical to PyTorch's filter -> MLP -> scatter-into-zeros).
    h = dense(seq, sw1, sb1)
    h = dense(h, sw2, sb2)
    emb = dense(h, sw3, sb3)                  # [TB*37, E]
    emb = emb * mask

    # per-batch sum over the 37 sequence slots
    summed = jnp.sum(emb.reshape(tb, SEQ, emb.shape[-1]), axis=1)   # [TB, E]

    # fused action+value head; concat([summed, s_own]) replaced by a split
    # first matmul: y1 = summed @ W1[:E] + s_own @ W1[E:]
    y = (jnp.dot(summed.astype(hw1e.dtype), hw1e[...],
                 preferred_element_type=jnp.float32)
         + jnp.dot(s_own.astype(hw1o.dtype), hw1o[...],
                   preferred_element_type=jnp.float32)
         + hb1[...].astype(jnp.float32))
    y = jnp.maximum(y, 0.0)
    y = dense(y, hw2, hb2)
    out_ref[...] = dense(y, hw3, hb3, relu=False)     # [TB, 24] = [logits | value]


# ----------------------------------------------------------------------------
# Parameter packing (wrapper side)
# ----------------------------------------------------------------------------
def pack_params(p, weight_dtype=jnp.float32):
    """Fuse action_mlp + value_mlp weights into a single 3-matmul head."""
    E = p["sw3"].shape[1]
    H = p["aw2"].shape[0]

    w1 = jnp.concatenate([p["aw1"], p["vw1"]], axis=1)       # [E+9, 2H]
    hw1e, hw1o = w1[:E, :], w1[E:, :]                        # [E,2H], [9,2H]
    hb1 = jnp.concatenate([p["ab1"], p["vb1"]], axis=1)      # [1, 2H]

    zH = jnp.zeros((H, H), jnp.float32)
    hw2 = jnp.concatenate(
        [jnp.concatenate([p["aw2"], zH], axis=1),
         jnp.concatenate([zH, p["vw2"]], axis=1)], axis=0)   # [2H, 2H] block-diag
    hb2 = jnp.concatenate([p["ab2"], p["vb2"]], axis=1)      # [1, 2H]

    hw3 = jnp.concatenate(
        [jnp.concatenate([p["aw3"], jnp.zeros((H, 1), jnp.float32)], axis=1),
         jnp.concatenate([jnp.zeros((H, NUM_LOGITS), jnp.float32), p["vw3"]], axis=1)],
        axis=0)                                              # [2H, 24]
    hb3 = jnp.concatenate([p["ab3"], p["vb3"]], axis=1)      # [1, 24]

    packed = (p["sw1"], p["sb1"], p["sw2"], p["sb2"], p["sw3"], p["sb3"],
              hw1e, hw1o, hb1, hw2, hb2, hw3, hb3)
    return tuple(w.astype(weight_dtype) for w in packed)


# ----------------------------------------------------------------------------
# Forward wrapper
# ----------------------------------------------------------------------------
def comm_net_forward(obs, params, *, block_batch=128, weight_dtype=jnp.float32):
    """obs: [B, 38, 17].  Returns (logits [B,23], value [B,1]) in f32."""
    obs = obs.astype(jnp.float32)
    B = obs.shape[0]

    # Wrapper-side layout plumbing (free): split + flatten outside the kernel.
    s_own = obs[:, 0, :OWN_FEAT]                              # [B, 9]
    seq = obs[:, 1:, :].reshape(B * SEQ, OBS_FEAT)            # [B*37, 17]

    # Batch tile: multiple of 8 sublanes; pad B so the grid divides evenly.
    tb = min(_round_up(max(int(block_batch), 8), 8), _round_up(B, 8))
    b_pad = _round_up(B, tb)
    if b_pad != B:
        s_own = jnp.pad(s_own, ((0, b_pad - B), (0, 0)))
        seq = jnp.pad(seq, ((0, (b_pad - B) * SEQ), (0, 0)))   # zero rows -> masked out

    weights = pack_params(params, weight_dtype)

    grid = (b_pad // tb,)

    def _resident(shape):
        nz = len(shape)
        return pl.BlockSpec(shape, lambda i, _n=nz: (0,) * _n)

    in_specs = [pl.BlockSpec((tb * SEQ, OBS_FEAT), lambda i: (i, 0)),
                pl.BlockSpec((tb, OWN_FEAT), lambda i: (i, 0))]
    in_specs += [_resident(w.shape) for w in weights]
    out_spec = pl.BlockSpec((tb, HEAD_OUT), lambda i: (i, 0))

    # Rough VMEM budget: lane-padded f32 intermediates + double-buffered seq
    # tiles + weights; clamped well under the 64 MiB v7x part.
    lane = 128
    est = (4 * tb * SEQ * lane * 4            # intermediates (lane padded)
           + 4 * tb * SEQ * OBS_FEAT * 4      # double-buffered seq tile
           + 4 * tb * lane * 4                # head activations / output
           + 2 * 1024 * 1024)                 # weights + slack
    vmem_limit = int(min(48 * 2**20, max(16 * 2**20, 2 * est)))

    out = pl.pallas_call(
        _comm_net_kernel,
        out_shape=jax.ShapeDtypeStruct((b_pad, HEAD_OUT), jnp.float32),
        grid=grid,
        in_specs=in_specs,
        out_specs=out_spec,
        compiler_params=pltpu.CompilerParams(
            dimension_semantics=("parallel",),
            vmem_limit_bytes=vmem_limit),
    )(seq, s_own, *weights)

    out = out[:B]
    return out[:, :NUM_LOGITS], out[:, NUM_LOGITS:]


# ----------------------------------------------------------------------------
# Synthetic init + plain-JAX reference (matches the PyTorch module)
# ----------------------------------------------------------------------------
def init_params(key, hidden_size, embedding_size):
    dims = {
        "s1": (OBS_FEAT, hidden_size),
        "s2": (hidden_size, hidden_size),
        "s3": (hidden_size, embedding_size),
        "a1": (embedding_size + OWN_FEAT, hidden_size),
        "a2": (hidden_size, hidden_size),
        "a3": (hidden_size, NUM_LOGITS),
        "v1": (embedding_size + OWN_FEAT, hidden_size),
        "v2": (hidden_size, hidden_size),
        "v3": (hidden_size, 1),
    }
    params = {}
    keys = jax.random.split(key, 2 * len(dims))
    for i, (name, (fan_in, fan_out)) in enumerate(dims.items()):
        scale = 1.0 / jnp.sqrt(jnp.float32(fan_in))
        w = jax.random.uniform(keys[2 * i], (fan_in, fan_out),
                               minval=-scale, maxval=scale, dtype=jnp.float32)
        b = jax.random.uniform(keys[2 * i + 1], (1, fan_out),
                               minval=-scale, maxval=scale, dtype=jnp.float32)
        params[f"{name[0]}w{name[1]}"] = w
        params[f"{name[0]}b{name[1]}"] = b
    return params


def reference_forward(obs, p):
    s_own = obs[:, 0, :OWN_FEAT]
    seq = obs[:, 1:, :]
    mask = (jnp.abs(seq).sum(-1) != 0.0).astype(jnp.float32)

    def mlp3(x, w1, b1, w2, b2, w3, b3, last_relu):
        x = jax.nn.relu(x @ w1 + b1)
        x = jax.nn.relu(x @ w2 + b2)
        x = x @ w3 + b3
        return jax.nn.relu(x) if last_relu else x

    flat = seq.reshape(-1, OBS_FEAT)
    emb = mlp3(flat, p["sw1"], p["sb1"], p["sw2"], p["sb2"], p["sw3"], p["sb3"],
               last_relu=True)
    emb = emb * mask.reshape(-1, 1)
    summed = emb.reshape(obs.shape[0], SEQ, -1).sum(axis=1)
    concat = jnp.concatenate([summed, s_own], axis=1)
    logits = mlp3(concat, p["aw1"], p["ab1"], p["aw2"], p["ab2"], p["aw3"], p["ab3"],
                  last_relu=False)
    value = mlp3(concat, p["vw1"], p["vb1"], p["vw2"], p["vb2"], p["vw3"], p["vb3"],
                 last_relu=False)
    return logits, value


# ----------------------------------------------------------------------------
if __name__ == "__main__":
    key = jax.random.PRNGKey(0)
    k_obs, k_params = jax.random.split(key)

    hidden_size = 32
    embedding_size = 32
    params = init_params(k_params, hidden_size, embedding_size)

    # batch not a multiple of the tile -> exercises padding + multi-step grid
    batch = 20
    obs = jax.random.normal(k_obs, (batch, 1 + SEQ, OBS_FEAT), dtype=jnp.float32)
    obs = obs.at[:, 20:, :].set(0.0)       # padded neighbor slots (all zeros)
    obs = obs.at[0, 5:, :].set(0.0)

    # f32 path (strict check)
    logits, value = comm_net_forward(obs, params, block_batch=8)
    logits, value = jax.block_until_ready((logits, value))
    ref_logits, ref_value = reference_forward(obs, params)
    assert logits.shape == (batch, NUM_LOGITS)
    assert value.shape == (batch, 1)
    assert jnp.allclose(logits, ref_logits, atol=1e-4, rtol=1e-4)
    assert jnp.allclose(value, ref_value, atol=1e-4, rtol=1e-4)

    # bf16 weight path (v6e/v7x perf mode) — f32 accumulation, loose tolerance
    l16, v16 = comm_net_forward(obs, params, block_batch=8,
                                weight_dtype=jnp.bfloat16)
    l16, v16 = jax.block_until_ready((l16, v16))
    lerr = jnp.max(jnp.abs(l16 - ref_logits)) / (jnp.max(jnp.abs(ref_logits)) + 1e-6)
    verr = jnp.max(jnp.abs(v16 - ref_value)) / (jnp.max(jnp.abs(ref_value)) + 1e-6)
    assert bool(lerr < 0.1) and bool(verr < 0.1)

    print("KERNEL_OK")
</pallas_src>

<mosaic_0001>
module attributes {stable_mosaic.version = 11 : i64} {
  func.func @_comm_net_kernel(%arg0: i32, %arg1: memref<296x17xf32, #tpu.memory_space<vmem>>, %arg2: memref<8x9xf32, #tpu.memory_space<vmem>>, %arg3: memref<17x32xf32, #tpu.memory_space<vmem>>, %arg4: memref<1x32xf32, #tpu.memory_space<vmem>>, %arg5: memref<32x32xf32, #tpu.memory_space<vmem>>, %arg6: memref<1x32xf32, #tpu.memory_space<vmem>>, %arg7: memref<32x32xf32, #tpu.memory_space<vmem>>, %arg8: memref<1x32xf32, #tpu.memory_space<vmem>>, %arg9: memref<32x64xf32, #tpu.memory_space<vmem>>, %arg10: memref<9x64xf32, #tpu.memory_space<vmem>>, %arg11: memref<1x64xf32, #tpu.memory_space<vmem>>, %arg12: memref<64x64xf32, #tpu.memory_space<vmem>>, %arg13: memref<1x64xf32, #tpu.memory_space<vmem>>, %arg14: memref<64x24xf32, #tpu.memory_space<vmem>>, %arg15: memref<1x24xf32, #tpu.memory_space<vmem>>, %arg16: memref<8x24xf32, #tpu.memory_space<vmem>>) attributes {dimension_semantics = [#tpu.dimension_semantics<parallel>], iteration_bounds = array<i64: 3>, scalar_prefetch = 0 : i64, scratch_operands = 0 : i64, tpu.core_type = #tpu.core_type<tc>, window_params = [{transform_indices = @transform_0, window_bounds = array<i64: 296, 17>}, {transform_indices = @transform_1, window_bounds = array<i64: 8, 9>}, {pipeline_mode = #tpu.pipeline_mode<synchronous>, transform_indices = @transform_2, window_bounds = array<i64: 17, 32>}, {pipeline_mode = #tpu.pipeline_mode<synchronous>, transform_indices = @transform_3, window_bounds = array<i64: 1, 32>}, {pipeline_mode = #tpu.pipeline_mode<synchronous>, transform_indices = @transform_4, window_bounds = array<i64: 32, 32>}, {pipeline_mode = #tpu.pipeline_mode<synchronous>, transform_indices = @transform_5, window_bounds = array<i64: 1, 32>}, {pipeline_mode = #tpu.pipeline_mode<synchronous>, transform_indices = @transform_6, window_bounds = array<i64: 32, 32>}, {pipeline_mode = #tpu.pipeline_mode<synchronous>, transform_indices = @transform_7, window_bounds = array<i64: 1, 32>}, {pipeline_mode = #tpu.pipeline_mode<synchronous>, transform_indices = @transform_8, window_bounds = array<i64: 32, 64>}, {pipeline_mode = #tpu.pipeline_mode<synchronous>, transform_indices = @transform_9, window_bounds = array<i64: 9, 64>}, {pipeline_mode = #tpu.pipeline_mode<synchronous>, transform_indices = @transform_10, window_bounds = array<i64: 1, 64>}, {pipeline_mode = #tpu.pipeline_mode<synchronous>, transform_indices = @transform_11, window_bounds = array<i64: 64, 64>}, {pipeline_mode = #tpu.pipeline_mode<synchronous>, transform_indices = @transform_12, window_bounds = array<i64: 1, 64>}, {pipeline_mode = #tpu.pipeline_mode<synchronous>, transform_indices = @transform_13, window_bounds = array<i64: 64, 24>}, {pipeline_mode = #tpu.pipeline_mode<synchronous>, transform_indices = @transform_14, window_bounds = array<i64: 1, 24>}, {transform_indices = @transform_15, window_bounds = array<i64: 8, 24>}]} {
    %c0 = arith.constant 0 : index
    %c0_0 = arith.constant 0 : index
    %0 = vector.load %arg1[%c0, %c0_0] : memref<296x17xf32, #tpu.memory_space<vmem>>, vector<296x17xf32>
    %c0_1 = arith.constant 0 : index
    %c0_2 = arith.constant 0 : index
    %1 = vector.load %arg2[%c0_1, %c0_2] : memref<8x9xf32, #tpu.memory_space<vmem>>, vector<8x9xf32>
    %2 = math.absf %0 : vector<296x17xf32>
    %cst = arith.constant dense<0.000000e+00> : vector<296xf32>
    %3 = vector.multi_reduction <add>, %2, %cst [1] : vector<296x17xf32> to vector<296xf32>
    %4 = vector.shape_cast %3 : vector<296xf32> to vector<296x1xf32>
    %cst_3 = arith.constant 0.000000e+00 : f32
    %5 = vector.broadcast %cst_3 : f32 to vector<296x1xf32>
    %6 = arith.cmpf one, %4, %5 : vector<296x1xf32>
    %7 = arith.extui %6 : vector<296x1xi1> to vector<296x1xi32>
    %8 = arith.sitofp %7 : vector<296x1xi32> to vector<296x1xf32>
    %c0_4 = arith.constant 0 : index
    %c0_5 = arith.constant 0 : index
    %9 = vector.load %arg3[%c0_4, %c0_5] : memref<17x32xf32, #tpu.memory_space<vmem>>, vector<17x32xf32>
    %cst_6 = arith.constant dense<0.000000e+00> : vector<296x32xf32>
    %10 = tpu.matmul %0, %9, %cst_6 {dimension_numbers = #tpu.dot_dimension_numbers<[1], [0], [0], [1], [0, 0, 1, 1], [], []>} : vector<296x17xf32>, vector<17x32xf32>, vector<296x32xf32> -> vector<296x32xf32>
    %c0_7 = arith.constant 0 : index
    %c0_8 = arith.constant 0 : index
    %11 = vector.load %arg4[%c0_7, %c0_8] : memref<1x32xf32, #tpu.memory_space<vmem>>, vector<1x32xf32>
    %12 = vector.broadcast %11 : vector<1x32xf32> to vector<296x32xf32>
    %13 = arith.addf %10, %12 : vector<296x32xf32>
    %cst_9 = arith.constant 0.000000e+00 : f32
    %14 = vector.broadcast %cst_9 : f32 to vector<296x32xf32>
    %15 = arith.maximumf %13, %14 : vector<296x32xf32>
    %c0_10 = arith.constant 0 : index
    %c0_11 = arith.constant 0 : index
    %16 = vector.load %arg5[%c0_10, %c0_11] : memref<32x32xf32, #tpu.memory_space<vmem>>, vector<32x32xf32>
    %cst_12 = arith.constant dense<0.000000e+00> : vector<296x32xf32>
    %17 = tpu.matmul %15, %16, %cst_12 {dimension_numbers = #tpu.dot_dimension_numbers<[1], [0], [0], [1], [0, 0, 1, 1], [], []>} : vector<296x32xf32>, vector<32x32xf32>, vector<296x32xf32> -> vector<296x32xf32>
    %c0_13 = arith.constant 0 : index
    %c0_14 = arith.constant 0 : index
    %18 = vector.load %arg6[%c0_13, %c0_14] : memref<1x32xf32, #tpu.memory_space<vmem>>, vector<1x32xf32>
    %19 = vector.broadcast %18 : vector<1x32xf32> to vector<296x32xf32>
    %20 = arith.addf %17, %19 : vector<296x32xf32>
    %cst_15 = arith.constant 0.000000e+00 : f32
    %21 = vector.broadcast %cst_15 : f32 to vector<296x32xf32>
    %22 = arith.maximumf %20, %21 : vector<296x32xf32>
    %c0_16 = arith.constant 0 : index
    %c0_17 = arith.constant 0 : index
    %23 = vector.load %arg7[%c0_16, %c0_17] : memref<32x32xf32, #tpu.memory_space<vmem>>, vector<32x32xf32>
    %cst_18 = arith.constant dense<0.000000e+00> : vector<296x32xf32>
    %24 = tpu.matmul %22, %23, %cst_18 {dimension_numbers = #tpu.dot_dimension_numbers<[1], [0], [0], [1], [0, 0, 1, 1], [], []>} : vector<296x32xf32>, vector<32x32xf32>, vector<296x32xf32> -> vector<296x32xf32>
    %c0_19 = arith.constant 0 : index
    %c0_20 = arith.constant 0 : index
    %25 = vector.load %arg8[%c0_19, %c0_20] : memref<1x32xf32, #tpu.memory_space<vmem>>, vector<1x32xf32>
    %26 = vector.broadcast %25 : vector<1x32xf32> to vector<296x32xf32>
    %27 = arith.addf %24, %26 : vector<296x32xf32>
    %cst_21 = arith.constant 0.000000e+00 : f32
    %28 = vector.broadcast %cst_21 : f32 to vector<296x32xf32>
    %29 = arith.maximumf %27, %28 : vector<296x32xf32>
    %30 = vector.broadcast %8 : vector<296x1xf32> to vector<296x32xf32>
    %31 = arith.mulf %29, %30 : vector<296x32xf32>
    %32 = vector.shape_cast %31 : vector<296x32xf32> to vector<8x37x32xf32>
    %cst_22 = arith.constant dense<0.000000e+00> : vector<8x32xf32>
    %33 = vector.multi_reduction <add>, %32, %cst_22 [1] : vector<8x37x32xf32> to vector<8x32xf32>
    %c0_23 = arith.constant 0 : index
    %c0_24 = arith.constant 0 : index
    %34 = vector.load %arg9[%c0_23, %c0_24] : memref<32x64xf32, #tpu.memory_space<vmem>>, vector<32x64xf32>
    %cst_25 = arith.constant dense<0.000000e+00> : vector<8x64xf32>
    %35 = tpu.matmul %33, %34, %cst_25 {dimension_numbers = #tpu.dot_dimension_numbers<[1], [0], [0], [1], [0, 0, 1, 1], [], []>} : vector<8x32xf32>, vector<32x64xf32>, vector<8x64xf32> -> vector<8x64xf32>
    %c0_26 = arith.constant 0 : index
    %c0_27 = arith.constant 0 : index
    %36 = vector.load %arg10[%c0_26, %c0_27] : memref<9x64xf32, #tpu.memory_space<vmem>>, vector<9x64xf32>
    %cst_28 = arith.constant dense<0.000000e+00> : vector<8x64xf32>
    %37 = tpu.matmul %1, %36, %cst_28 {dimension_numbers = #tpu.dot_dimension_numbers<[1], [0], [0], [1], [0, 0, 1, 1], [], []>} : vector<8x9xf32>, vector<9x64xf32>, vector<8x64xf32> -> vector<8x64xf32>
    %38 = arith.addf %35, %37 : vector<8x64xf32>
    %c0_29 = arith.constant 0 : index
    %c0_30 = arith.constant 0 : index
    %39 = vector.load %arg11[%c0_29, %c0_30] : memref<1x64xf32, #tpu.memory_space<vmem>>, vector<1x64xf32>
    %40 = vector.broadcast %39 : vector<1x64xf32> to vector<8x64xf32>
    %41 = arith.addf %38, %40 : vector<8x64xf32>
    %cst_31 = arith.constant 0.000000e+00 : f32
    %42 = vector.broadcast %cst_31 : f32 to vector<8x64xf32>
    %43 = arith.maximumf %41, %42 : vector<8x64xf32>
    %c0_32 = arith.constant 0 : index
    %c0_33 = arith.constant 0 : index
    %44 = vector.load %arg12[%c0_32, %c0_33] : memref<64x64xf32, #tpu.memory_space<vmem>>, vector<64x64xf32>
    %cst_34 = arith.constant dense<0.000000e+00> : vector<8x64xf32>
    %45 = tpu.matmul %43, %44, %cst_34 {dimension_numbers = #tpu.dot_dimension_numbers<[1], [0], [0], [1], [0, 0, 1, 1], [], []>} : vector<8x64xf32>, vector<64x64xf32>, vector<8x64xf32> -> vector<8x64xf32>
    %c0_35 = arith.constant 0 : index
    %c0_36 = arith.constant 0 : index
    %46 = vector.load %arg13[%c0_35, %c0_36] : memref<1x64xf32, #tpu.memory_space<vmem>>, vector<1x64xf32>
    %47 = vector.broadcast %46 : vector<1x64xf32> to vector<8x64xf32>
    %48 = arith.addf %45, %47 : vector<8x64xf32>
    %cst_37 = arith.constant 0.000000e+00 : f32
    %49 = vector.broadcast %cst_37 : f32 to vector<8x64xf32>
    %50 = arith.maximumf %48, %49 : vector<8x64xf32>
    %c0_38 = arith.constant 0 : index
    %c0_39 = arith.constant 0 : index
    %51 = vector.load %arg14[%c0_38, %c0_39] : memref<64x24xf32, #tpu.memory_space<vmem>>, vector<64x24xf32>
    %cst_40 = arith.constant dense<0.000000e+00> : vector<8x24xf32>
    %52 = tpu.matmul %50, %51, %cst_40 {dimension_numbers = #tpu.dot_dimension_numbers<[1], [0], [0], [1], [0, 0, 1, 1], [], []>} : vector<8x64xf32>, vector<64x24xf32>, vector<8x24xf32> -> vector<8x24xf32>
    %c0_41 = arith.constant 0 : index
    %c0_42 = arith.constant 0 : index
    %53 = vector.load %arg15[%c0_41, %c0_42] : memref<1x24xf32, #tpu.memory_space<vmem>>, vector<1x24xf32>
    %54 = vector.broadcast %53 : vector<1x24xf32> to vector<8x24xf32>
    %55 = arith.addf %52, %54 : vector<8x24xf32>
    %c0_43 = arith.constant 0 : index
    %c0_44 = arith.constant 0 : index
    %56 = vector.load %arg16[%c0_43, %c0_44] : memref<8x24xf32, #tpu.memory_space<vmem>>, vector<8x24xf32>
    tpu.vector_store %arg16[%c0_43, %c0_44], %55 {strides = array<i32>} : memref<8x24xf32, #tpu.memory_space<vmem>>, vector<8x24xf32>,
    return
  }
  func.func @transform_0(%arg0: i32) -> (i32, i32) {
    %c0_i32 = arith.constant 0 : i32
    %c0_i32_0 = arith.constant 0 : i32
    return %arg0, %c0_i32 : i32, i32
  }
  func.func @transform_1(%arg0: i32) -> (i32, i32) {
    %c0_i32 = arith.constant 0 : i32
    %c0_i32_0 = arith.constant 0 : i32
    return %arg0, %c0_i32 : i32, i32
  }
  func.func @transform_2(%arg0: i32) -> (i32, i32) {
    %c0_i32 = arith.constant 0 : i32
    %c0_i32_0 = arith.constant 0 : i32
    %c0_i32_1 = arith.constant 0 : i32
    return %c0_i32, %c0_i32_0 : i32, i32
  }
  func.func @transform_3(%arg0: i32) -> (i32, i32) {
    %c0_i32 = arith.constant 0 : i32
    %c0_i32_0 = arith.constant 0 : i32
    %c0_i32_1 = arith.constant 0 : i32
    return %c0_i32, %c0_i32_0 : i32, i32
  }
  func.func @transform_4(%arg0: i32) -> (i32, i32) {
    %c0_i32 = arith.constant 0 : i32
    %c0_i32_0 = arith.constant 0 : i32
    %c0_i32_1 = arith.constant 0 : i32
    return %c0_i32, %c0_i32_0 : i32, i32
  }
  func.func @transform_5(%arg0: i32) -> (i32, i32) {
    %c0_i32 = arith.constant 0 : i32
    %c0_i32_0 = arith.constant 0 : i32
    %c0_i32_1 = arith.constant 0 : i32
    return %c0_i32, %c0_i32_0 : i32, i32
  }
  func.func @transform_6(%arg0: i32) -> (i32, i32) {
    %c0_i32 = arith.constant 0 : i32
    %c0_i32_0 = arith.constant 0 : i32
    %c0_i32_1 = arith.constant 0 : i32
    return %c0_i32, %c0_i32_0 : i32, i32
  }
  func.func @transform_7(%arg0: i32) -> (i32, i32) {
    %c0_i32 = arith.constant 0 : i32
    %c0_i32_0 = arith.constant 0 : i32
    %c0_i32_1 = arith.constant 0 : i32
    return %c0_i32, %c0_i32_0 : i32, i32
  }
  func.func @transform_8(%arg0: i32) -> (i32, i32) {
    %c0_i32 = arith.constant 0 : i32
    %c0_i32_0 = arith.constant 0 : i32
    %c0_i32_1 = arith.constant 0 : i32
    return %c0_i32, %c0_i32_0 : i32, i32
  }
  func.func @transform_9(%arg0: i32) -> (i32, i32) {
    %c0_i32 = arith.constant 0 : i32
    %c0_i32_0 = arith.constant 0 : i32
    %c0_i32_1 = arith.constant 0 : i32
    return %c0_i32, %c0_i32_0 : i32, i32
  }
  func.func @transform_10(%arg0: i32) -> (i32, i32) {
    %c0_i32 = arith.constant 0 : i32
    %c0_i32_0 = arith.constant 0 : i32
    %c0_i32_1 = arith.constant 0 : i32
    return %c0_i32, %c0_i32_0 : i32, i32
  }
  func.func @transform_11(%arg0: i32) -> (i32, i32) {
    %c0_i32 = arith.constant 0 : i32
    %c0_i32_0 = arith.constant 0 : i32
    %c0_i32_1 = arith.constant 0 : i32
    return %c0_i32, %c0_i32_0 : i32, i32
  }
  func.func @transform_12(%arg0: i32) -> (i32, i32) {
    %c0_i32 = arith.constant 0 : i32
    %c0_i32_0 = arith.constant 0 : i32
    %c0_i32_1 = arith.constant 0 : i32
    return %c0_i32, %c0_i32_0 : i32, i32
  }
  func.func @transform_13(%arg0: i32) -> (i32, i32) {
    %c0_i32 = arith.constant 0 : i32
    %c0_i32_0 = arith.constant 0 : i32
    %c0_i32_1 = arith.constant 0 : i32
    return %c0_i32, %c0_i32_0 : i32, i32
  }
  func.func @transform_14(%arg0: i32) -> (i32, i32) {
    %c0_i32 = arith.constant 0 : i32
    %c0_i32_0 = arith.constant 0 : i32
    %c0_i32_1 = arith.constant 0 : i32
    return %c0_i32, %c0_i32_0 : i32, i32
  }
  func.func @transform_15(%arg0: i32) -> (i32, i32) {
    %c0_i32 = arith.constant 0 : i32
    %c0_i32_0 = arith.constant 0 : i32
    return %arg0, %c0_i32 : i32, i32
  }
}

</mosaic_0001>

<bundles_post_ra>
// kernel: tpu_custom_call.1
= control target key start
LH: loop header
LB: loop body
LE: loop exit
PB: predicated region body
PF: predicated region fallthrough
CT: control target
= control target key end

     0   :  { %s9239_s0 = inlined_call_operand.vmem [shape: f32[888,17], index: 0, kind: input, shape index: {}]   ;;  %s9240_s1 = inlined_call_operand.vmem [shape: f32[24,9], index: 1, kind: input, shape index: {}]   ;;  %s9241_s2 = inlined_call_operand.vmem [shape: f32[17,32], index: 2, kind: input, shape index: {}]   ;;  %s9242_s3 = inlined_call_operand.vmem [shape: f32[1,32], index: 3, kind: input, shape index: {}]   ;;  %s9243_s4 = inlined_call_operand.vmem [shape: f32[32,32], index: 4, kind: input, shape index: {}]   ;;  %s9244_s5 = inlined_call_operand.vmem [shape: f32[1,32], index: 5, kind: input, shape index: {}]   ;;  %s9245_s6 = inlined_call_operand.vmem [shape: f32[32,32], index: 6, kind: input, shape index: {}]   ;;  %s9246_s7 = inlined_call_operand.vmem [shape: f32[1,32], index: 7, kind: input, shape index: {}]   ;;  %s9247_s8 = inlined_call_operand.vmem [shape: f32[32,64], index: 8, kind: input, shape index: {}]   ;;  %s9248_s9 = inlined_call_operand.vmem [shape: f32[9,64], index: 9, kind: input, shape index: {}]   ;;  %s9249_s10 = inlined_call_operand.vmem [shape: f32[1,64], index: 10, kind: input, shape index: {}]   ;;  %s9250_s11 = inlined_call_operand.vmem [shape: f32[64,64], index: 11, kind: input, shape index: {}]   ;;  %s9251_s12 = inlined_call_operand.vmem [shape: f32[1,64], index: 12, kind: input, shape index: {}]   ;;  %s9252_s13 = inlined_call_operand.vmem [shape: f32[64,24], index: 13, kind: input, shape index: {}]   ;;  %s9253_s14 = inlined_call_operand.vmem [shape: f32[1,24], index: 14, kind: input, shape index: {}]   ;;  %s9254_s15 = inlined_call_operand.hbm [shape: f32[24,24], index: 15, kind: output, shape index: {}]  }
   0x1   :  { %9255 = sst [smem:[#allocation6_spill]] %s9239_s0 }
   0x2   :  { %9256 = sst [smem:[#allocation7_spill]] %s9240_s1 }
   0x3   :  { %9257 = sst [smem:[#allocation8_spill]] %s9241_s2 }
   0x4   :  { %9258 = sst [smem:[#allocation9_spill]] %s9242_s3 }
   0x5   :  { %20 = vsyncpa [#allocation3], 0 }
   0x6   :  { %22 = vsyncpa [#allocation3 + $0x1], 0  ;;  %s7435_s18 = smov 0   ;;  %s7437_s19 = smov 0  }
   0x7   :  { %s7439_s20 = smov 0   ;;  %s7441_s21 = smov 0  }
   0x8 LB: > { %s7456_s22 = sadd.s32 4294967295, %s7347_s21   ;;  %s6420_s23 = sadd.s32 4294967294, %s7347_s21   ;;  %s7347_s21 = sphi %s7441_s21, %s9270_s21   ;;  %s7343_s20 = sphi %s7439_s20, %s9269_s20   ;;  %s7339_s19 = sphi %s7437_s19, %s9268_s19   ;;  %s7335_s18 = sphi %s7435_s18, %s9267_s18  }
   0x9   : > { %s7460_s24 = sadd.s32 1, %s7347_s21   ;;  %s360_s25 = sadd.s32 1, %s7343_s20 }
   0xa   : > { %s357_s26 = ssub.s32 %s7347_s21, %s7460_s24  ;;  %p370_p0 = scmp.ne.s32.totalorder %s7343_s20, %s7339_s19 }
   0xb   : > { %p358_p1 = scmp.eq.s32.totalorder %s357_s26, 0  ;;  %p371_p2 = scmp.eq.s32.totalorder %s7456_s22, 2 }
   0xc   : > { %p376_p3 = scmp.ne.s32.totalorder %s7339_s19, %s7335_s18  ;;  %p377_p4 = scmp.eq.s32.totalorder %s6420_s23, 2 }
   0xd   : > { %s7471_s27 = scalar_select %p358_p1, %s7343_s20, %s360_s25  }
   0xe   : > { %p7473_p5 = por %p371_p2, %p370_p0  ;;  %p7477_p6 = por %p377_p4, %p376_p3 }
   0xf   : > { %9259 = sst [smem:[#allocation5_spill]] %s7471_s27  ;;  %p6423_p7 = scmp.ge.s32.totalorder %s7347_s21, 1 }
  0x10   : > { %p450_p8 = scmp.lt.s32.totalorder %s7347_s21, 4 }
  0x12   : > { %p451_p9 = pnand %p6423_p7, %p450_p8 }
  0x13   : > { %s9262_s2 = sld [smem:[#allocation8_spill]] (!%p451_p9)  ;;  %v7349_v2 = vmov (!%p451_p9), 0.0|0.0   ;;  %s502_s25 = smul.u32 (!%p451_p9), 37, %s7456_s22  ;;  %vm7350_vm0 = vmmov (!%p451_p9), 0   ;;  %v7351_v4 = vmov (!%p451_p9), 0.0   ;;  %vm931_vm1 = vcmask (!%p451_p9), 1040384  }
  0x14   : > { %454 = sbr.rel (%p451_p9) target bundleno = 1650 (0x672), region = 80  ;;  %7186 = vmatprep.subr.bf16.mxu0 (!%p451_p9), %v7349_v2  ;;  %7235 = vmatprep.subr.bf16.mxu1 (!%p451_p9), %v7349_v2  ;;  %vm587_vm2 = vcmask (!%p451_p9), 138240   ;;  %s9263_s0 = sld [smem:[#allocation6_spill]] (!%p451_p9)  ;;  %v1222_v8 = vld [vmem:[%s9243_s4] sm:$0xff] (!%p451_p9)  ;;  %v1223_v9 = vld [vmem:[%s9243_s4 + $0x8] sm:$0xff] (!%p451_p9)  ;;  %v1224_v13 = vld [vmem:[%s9243_s4 + $0x10] sm:$0xff] (!%p451_p9) }
  0x15   : > { %6781 = vmatprep.mubr.msk.f32.mxu0 (!%p451_p9), %vm7350_vm0, %v7351_v4  ;;  %6853 = vmatprep.mubr.msk.f32.mxu1 (!%p451_p9), %vm7350_vm0, %v7351_v4  ;;  %p503_p10 = scmp.lt.s32.totalorder (!%p451_p9), %s502_s25, 110  ;;  %v7190_v11 = vpack.c.bf16 (!%p451_p9), %v1223_v9, %v1222_v8  ;;  %v1225_v14 = vld [vmem:[%s9243_s4 + $0x18] sm:$0xff] (!%p451_p9)  ;;  %v1632_v49 = vld [vmem:[%s9245_s6] sm:$0xff] (!%p451_p9)  ;;  %v1633_v50 = vld [vmem:[%s9245_s6 + $0x8] sm:$0xff] (!%p451_p9)  ;;  %s9264_s3 = sld [smem:[#allocation9_spill]] (!%p451_p9)  ;;  %vm1233_vm3 = vcmask (!%p451_p9), 261120  }
  0x16   : > { %v7193_v17 = vpack.c.bf16 (!%p451_p9), %v1225_v14, %v1224_v13  ;;  %v7196_v52 = vpack.c.bf16 (!%p451_p9), %v1633_v50, %v1632_v49  ;;  %vm7352_vm4 = vmmov (!%p451_p9), 1   ;;  %p508_p11 = scmp.lt.s32.totalorder (!%p451_p9), %s7456_s22, 2  ;;  %s9265_s1 = sld [smem:[#allocation7_spill]] (!%p451_p9) }
  0x17   : > { %vm7203_vm5 = vmpackc.low (!%p451_p9), %vm931_vm1, %vm7352_vm4  ;;  %s6624_s30 = sshll.u32 (!%p451_p9), %s7456_s22, 7 }
  0x19   : > { %v810_v0 = vld [vmem:[%s9262_s2] sm:$0xff] (!%p451_p9)  ;;  %v811_v1 = vld [vmem:[%s9262_s2 + $0x8] sm:$0xff] (!%p451_p9)  ;;  %v812_v5 = vld [vmem:[%s9262_s2 + $0x10] sm:$0x1] (!%p451_p9)  ;;  %s9197_s2 = scalar_lea.hbm (!%p451_p9), %s9254_s15, %s6624_s30 }
  0x1a   : > { %v7187_v3 = vpack.c.bf16 (!%p451_p9), %v811_v1, %v810_v0 }
  0x1b   : > { %s9272_s25 = smov (!%p503_p10, %s502_s25), 110  ;;  %v7792_v51 = vld [vmem:[%s9264_s3] ss:$0 sm:$0xff] }
  0x1c   : > { %7188 = vmatpush3.bf16.msra.mxu0 %v7187_v3  ;;  %7237 = vmatpush3.bf16.msra.mxu1 %v7187_v3  ;;  %s6425_s16 = sshll.u32 %s9272_s25, 3  ;;  %s499_s25 = sand.u32 1, %s7339_s19  }
  0x1d   : > { %6779 = vmatprep.subr.mxu0 %v7351_v4  ;;  %7236 = vmatprep.subr.mxu1 %v7351_v4  ;;  %s7506_s27 = scalar_lea.vmem %s9263_s0, %s6425_s16  ;;  %s6336_s0 = scalar_lea.sflag [#allocation3], %s499_s25 }
  0x1e   : > { %v7511_v6 = vld [vmem:[%s7506_s27] sm:$0xff]  ;;  %v7518_v7 = vld [vmem:[%s7506_s27 + $0x8] sm:$0xff]  ;;  %v7531_v10 = vld [vmem:[%s7506_s27 + $0x10] sm:$0xff]  ;;  %s9041_s16 = scalar_select %p508_p11, %s7456_s22, 2 }
  0x1f   : > { %v7534_v12 = vld [vmem:[%s7506_s27 + $0xc0] sm:$0xff]  ;;  %v7549_v15 = vld [vmem:[%s7506_s27 + $0x18] sm:$0xff]  ;;  %v7554_v16 = vld [vmem:[%s7506_s27 + $0xc8] sm:$0xff]  ;;  %s7354_s22 = smov [#allocation2]  }
  0x20   : > { %6780 = vmatpush3.msk.msra.mxu0 %vm931_vm1, %v812_v5  ;;  %7238 = vmatpush3.msk.msra.mxu1 %vm931_vm1, %v812_v5  ;;  %v7564_v18 = vld [vmem:[%s7506_s27 + $0x20] sm:$0xff]  ;;  %v7569_v19 = vld [vmem:[%s7506_s27 + $0xd0] sm:$0xff]  ;;  %v7579_v20 = vld [vmem:[%s7506_s27 + $0x28] sm:$0xff]  ;;  %s6426_s17 = sshll.u32 %s9041_s16, 3 }
  0x21   : > { %7189 = vmatprep.subr.bf16.mxu1 %v7349_v2  ;;  %7195 = vmatprep.subr.bf16.mxu0 %v7349_v2  ;;  %v7584_v21 = vld [vmem:[%s7506_s27 + $0xd8] sm:$0xff]  ;;  %v7593_v22 = vld [vmem:[%s7506_s27 + $0x30] sm:$0xff]  ;;  %v7598_v23 = vld [vmem:[%s7506_s27 + $0xe0] sm:$0xff]  ;;  %s511_s26 = scalar_lea.vmem %s9265_s1, %s6426_s17 }
  0x22   : > { %6782 = vmatmul.mubr.msk.f32.vlgmr.msra.gmra.mrb[0].mxu0 %vm587_vm2, %v7511_v6  ;;  %6854 = vmatmul.mubr.msk.f32.vlgmr.msra.gmra.mrb[0].mxu1 %vm587_vm2, %v7534_v12  ;;  %v7607_v24 = vld [vmem:[%s7506_s27 + $0x38] sm:$0xff]  ;;  %v7612_v25 = vld [vmem:[%s7506_s27 + $0xe8] sm:$0xff]  ;;  %v7621_v26 = vld [vmem:[%s7506_s27 + $0x40] sm:$0xff] }
  0x23   : > { %6784 = vmatprep.mubr.msk.f32.mxu0 %vm7350_vm0, %v7351_v4  ;;  %6856 = vmatprep.mubr.msk.f32.mxu1 %vm7350_vm0, %v7351_v4  ;;  %v7626_v27 = vld [vmem:[%s7506_s27 + $0xf0] sm:$0xff]  ;;  %v7635_v28 = vld [vmem:[%s7506_s27 + $0x48] sm:$0xff]  ;;  %v7640_v29 = vld [vmem:[%s7506_s27 + $0xf8] sm:$0xff] }
  0x24   : > { %7191 = vmatpush3.bf16.msra.mxu1 %v7190_v11  ;;  %v7649_v30 = vld [vmem:[%s7506_s27 + $0x50] sm:$0xff]  ;;  %v7654_v31 = vld [vmem:[%s7506_s27 + $0x100] sm:$0xff]  ;;  %v7663_v32 = vld [vmem:[%s7506_s27 + $0x58] sm:$0xff]  ;;  %7197 = vmatpush3.bf16.msra.mxu0 %v7196_v52 }
  0x25   : > { %7192 = vmatprep.subr.bf16.mxu1 %v7349_v2  ;;  %v7668_v33 = vld [vmem:[%s7506_s27 + $0x108] sm:$0xff]  ;;  %v7677_v34 = vld [vmem:[%s7506_s27 + $0x60] sm:$0xff]  ;;  %v7682_v35 = vld [vmem:[%s7506_s27 + $0x110] sm:$0xff]  ;;  %7198 = vmatprep.subr.bf16.mxu0 %v7349_v2 }
  0x26   : > { %6785 = vmatmul.mubr.msk.f32.gmra.mrb[2].mxu0 %vm587_vm2, %v7518_v7  ;;  %6857 = vmatmul.mubr.msk.f32.gmra.mrb[2].mxu1 %vm587_vm2, %v7554_v16  ;;  %v7691_v36 = vld [vmem:[%s7506_s27 + $0x68] sm:$0xff]  ;;  %v7696_v37 = vld [vmem:[%s7506_s27 + $0x118] sm:$0xff]  ;;  %v7705_v38 = vld [vmem:[%s7506_s27 + $0x70] sm:$0xff] }
  0x27   : > { %6787 = vmatprep.mubr.msk.f32.mxu0 %vm7350_vm0, %v7351_v4  ;;  %6859 = vmatprep.mubr.msk.f32.mxu1 %vm7350_vm0, %v7351_v4  ;;  %v7710_v39 = vld [vmem:[%s7506_s27 + $0x120] sm:$0xff]  ;;  %v7719_v40 = vld [vmem:[%s7506_s27 + $0x78] sm:$0xff]  ;;  %v7735_v42 = vld [vmem:[%s7506_s27 + $0x88] sm:$0xff] }
  0x28   : > { %7194 = vmatpush3.bf16.msra.mxu1 %v7193_v17  ;;  %v7728_v41 = vld [vmem:[%s7506_s27 + $0x80] sm:$0xff]  ;;  %v7742_v43 = vld [vmem:[%s7506_s27 + $0x90] sm:$0xff]  ;;  %v7749_v44 = vld [vmem:[%s7506_s27 + $0x98] sm:$0xff] }
  0x29   : > { %7201 = vmatprep.subr.bf16.mxu1 %v7349_v2  ;;  %v7756_v45 = vld [vmem:[%s7506_s27 + $0xa0] sm:$0xff]  ;;  %v7763_v46 = vld [vmem:[%s7506_s27 + $0xa8] sm:$0xff]  ;;  %v7770_v47 = vld [vmem:[%s7506_s27 + $0xb0] sm:$0xff] }
  0x2a   : > { %6788 = vmatmul.mubr.msk.f32.gmra.mrb[4].mxu0 %vm587_vm2, %v7531_v10  ;;  %6860 = vmatmul.mubr.msk.f32.gmra.mrb[4].mxu1 %vm587_vm2, %v7569_v19  ;;  %v7777_v48 = vld [vmem:[%s7506_s27 + $0xb8] sm:$0xff] }
  0x2b   : > { %6790 = vmatprep.mubr.msk.f32.mxu0 %vm7350_vm0, %v7351_v4  ;;  %6862 = vmatprep.mubr.msk.f32.mxu1 %vm7350_vm0, %v7351_v4 }
  0x2e   : > { %6791 = vmatmul.mubr.msk.f32.gmra.mrb[6].mxu0 %vm587_vm2, %v7549_v15  ;;  %6863 = vmatmul.mubr.msk.f32.gmra.mrb[6].mxu1 %vm587_vm2, %v7584_v21 }
  0x2f   : > { %6793 = vmatprep.mubr.msk.f32.mxu0 %vm7350_vm0, %v7351_v4  ;;  %6865 = vmatprep.mubr.msk.f32.mxu1 %vm7350_vm0, %v7351_v4 }
  0x32   : > { %6794 = vmatmul.mubr.msk.f32.gmra.mrb[8].mxu0 %vm587_vm2, %v7564_v18  ;;  %6866 = vmatmul.mubr.msk.f32.gmra.mrb[8].mxu1 %vm587_vm2, %v7598_v23 }
  0x33   : > { %6796 = vmatprep.mubr.msk.f32.mxu0 %vm7350_vm0, %v7351_v4  ;;  %6868 = vmatprep.mubr.msk.f32.mxu1 %vm7350_vm0, %v7351_v4 }
  0x36   : > { %6797 = vmatmul.mubr.msk.f32.gmra.mrb[10].mxu0 %vm587_vm2, %v7579_v20  ;;  %6869 = vmatmul.mubr.msk.f32.gmra.mrb[10].mxu1 %vm587_vm2, %v7612_v25 }
  0x37   : > { %6799 = vmatprep.mubr.msk.f32.mxu0 %vm7350_vm0, %v7351_v4  ;;  %6871 = vmatprep.mubr.msk.f32.mxu1 %vm7350_vm0, %v7351_v4 }
  0x3a   : > { %6800 = vmatmul.mubr.msk.f32.gmra.mrb[12].mxu0 %vm587_vm2, %v7593_v22  ;;  %6872 = vmatmul.mubr.msk.f32.gmra.mrb[12].mxu1 %vm587_vm2, %v7626_v27 }
  0x3b   : > { %6802 = vmatprep.mubr.msk.f32.mxu0 %vm7350_vm0, %v7351_v4  ;;  %6874 = vmatprep.mubr.msk.f32.mxu1 %vm7350_vm0, %v7351_v4 }
  0x3e   : > { %6803 = vmatmul.mubr.msk.f32.gmra.mrb[14].mxu0 %vm587_vm2, %v7607_v24  ;;  %6875 = vmatmul.mubr.msk.f32.gmra.mrb[14].mxu1 %vm587_vm2, %v7640_v29 }
  0x3f   : > { %6805 = vmatprep.mubr.msk.f32.mxu0 %vm7350_vm0, %v7351_v4  ;;  %6877 = vmatprep.mubr.msk.f32.mxu1 %vm7350_vm0, %v7351_v4 }
  0x42   : > { %6806 = vmatmul.mubr.msk.f32.gmra.mrb[16].mxu0 %vm587_vm2, %v7621_v26  ;;  %6878 = vmatmul.mubr.msk.f32.gmra.mrb[16].mxu1 %vm587_vm2, %v7654_v31 }
  0x43   : > { %6808 = vmatprep.mubr.msk.f32.mxu0 %vm7350_vm0, %v7351_v4  ;;  %6880 = vmatprep.mubr.msk.f32.mxu1 %vm7350_vm0, %v7351_v4 }
  0x46   : > { %6809 = vmatmul.mubr.msk.f32.gmra.mrb[18].mxu0 %vm587_vm2, %v7635_v28  ;;  %6881 = vmatmul.mubr.msk.f32.gmra.mrb[18].mxu1 %vm587_vm2, %v7668_v33 }
  0x47   : > { %6811 = vmatprep.mubr.msk.f32.mxu0 %vm7350_vm0, %v7351_v4  ;;  %6883 = vmatprep.mubr.msk.f32.mxu1 %vm7350_vm0, %v7351_v4 }
  0x4a   : > { %6812 = vmatmul.mubr.msk.f32.gmra.mrb[20].mxu0 %vm587_vm2, %v7649_v30  ;;  %6884 = vmatmul.mubr.msk.f32.gmra.mrb[20].mxu1 %vm587_vm2, %v7682_v35 }
  0x4b   : > { %6814 = vmatprep.mubr.msk.f32.mxu0 %vm7350_vm0, %v7351_v4  ;;  %6886 = vmatprep.mubr.msk.f32.mxu1 %vm7350_vm0, %v7351_v4 }
  0x4e   : > { %6815 = vmatmul.mubr.msk.f32.gmra.mrb[22].mxu0 %vm587_vm2, %v7663_v32  ;;  %6887 = vmatmul.mubr.msk.f32.gmra.mrb[22].mxu1 %vm587_vm2, %v7696_v37 }
  0x4f   : > { %6817 = vmatprep.mubr.msk.f32.mxu0 %vm7350_vm0, %v7351_v4  ;;  %6889 = vmatprep.mubr.msk.f32.mxu1 %vm7350_vm0, %v7351_v4 }
  0x52   : > { %6818 = vmatmul.mubr.msk.f32.gmra.mrb[24].mxu0 %vm587_vm2, %v7677_v34  ;;  %6890 = vmatmul.mubr.msk.f32.gmra.mrb[24].mxu1 %vm587_vm2, %v7710_v39 }
  0x53   : > { %6820 = vmatprep.mubr.msk.f32.mxu0 %vm7350_vm0, %v7351_v4  ;;  %6900 = vmatprep.mubr.msk.f32.mxu1 %vm7350_vm0, %v7351_v4 }
  0x56   : > { %6821 = vmatmul.mubr.msk.f32.gmra.mrb[26].mxu0 %vm587_vm2, %v7691_v36 }
  0x57   : > { %6823 = vmatprep.mubr.msk.f32.mxu0 %vm7350_vm0, %v7351_v4 }
  0x5a   : > { %6824 = vmatmul.mubr.msk.f32.gmra.mrb[28].mxu0 %vm587_vm2, %v7705_v38 }
  0x5b   : > { %6826 = vmatprep.mubr.msk.f32.mxu0 %vm7350_vm0, %v7351_v4 }
  0x5e   : > { %6827 = vmatmul.mubr.msk.f32.gmra.mrb[30].mxu0 %vm587_vm2, %v7719_v40 }
  0x5f   : > { %6829 = vmatprep.mubr.msk.f32.mxu0 %vm7350_vm0, %v7351_v4 }
  0x62   : > { %6830 = vmatmul.mubr.msk.f32.gmra.mrb[32].mxu0 %vm587_vm2, %v7728_v41 }
  0x63   : > { %6832 = vmatprep.mubr.msk.f32.mxu0 %vm7350_vm0, %v7351_v4 }
  0x66   : > { %6833 = vmatmul.mubr.msk.f32.gmra.mrb[34].mxu0 %vm587_vm2, %v7735_v42 }
  0x67   : > { %6835 = vmatprep.mubr.msk.f32.mxu0 %vm7350_vm0, %v7351_v4 }
  0x6a   : > { %6836 = vmatmul.mubr.msk.f32.gmra.mrb[36].mxu0 %vm587_vm2, %v7742_v43 }
  0x6b   : > { %6838 = vmatprep.mubr.msk.f32.mxu0 %vm7350_vm0, %v7351_v4 }
  0x6e   : > { %6839 = vmatmul.mubr.msk.f32.gmra.mrb[38].mxu0 %vm587_vm2, %v7749_v44 }
  0x6f   : > { %6841 = vmatprep.mubr.msk.f32.mxu0 %vm7350_vm0, %v7351_v4 }
  0x72   : > { %6842 = vmatmul.mubr.msk.f32.gmra.mrb[40].mxu0 %vm587_vm2, %v7756_v45 }
  0x73   : > { %6844 = vmatprep.mubr.msk.f32.mxu0 %vm7350_vm0, %v7351_v4 }
  0x76   : > { %6845 = vmatmul.mubr.msk.f32.gmra.mrb[42].mxu0 %vm587_vm2, %v7763_v46 }
  0x77   : > { %6847 = vmatprep.mubr.msk.f32.mxu0 %vm7350_vm0, %v7351_v4 }
  0x7a   : > { %6848 = vmatmul.mubr.msk.f32.gmra.mrb[44].mxu0 %vm587_vm2, %v7770_v47 }
  0x7b   : > { %6850 = vmatprep.mubr.msk.f32.mxu0 %vm7350_vm0, %v7351_v4 }
  0x7e   : > { %6851 = vmatmul.mubr.msk.f32.gmra.mrb[46].mxu0 %vm587_vm2, %v7777_v48 }
  0x7f   : > { %7019 = vmatprep.mubr.msk.f32.mxu0 %vm7350_vm0, %v7351_v4 }
  0xf5   : > { %v1001_v53 = vpop.f32.mrb[0].mxu0  ;;  %v7800_v62 = vpop.f32.mrb[0].mxu1 }
  0xf6   : > { %v1002_v54 = vadd.f32 %v7792_v51, %v1001_v53  ;;  %v6783_v55 = vpop.f32.mrb[1].mxu0  ;;  %v6855_v1 = vpop.f32.mrb[1].mxu1 }
  0xf8   : > { %v1185_v56 = vmax.f32 %v1002_v54, 0.0 }
  0xf9   : > { %v1006_v57 = vpop.f32.mrb[2].mxu0  ;;  %v7806_v8 = vpop.f32.mrb[2].mxu1 }
  0xfa   : > { %v1007_v58 = vadd.f32 %v7792_v51, %v1006_v57  ;;  %v6786_v59 = vpop.f32.mrb[3].mxu0  ;;  %6901 = vmatmul.mubr.msk.f32.vlgmr.msra.gmra.mrb[26].mxu1 %vm1233_vm3, %v1185_v56  ;;  %v6858_v13 = vpop.f32.mrb[3].mxu1 }
  0xfb   : > { %6903 = vmatprep.mubr.msk.f32.mxu1 %vm7350_vm0, %v7351_v4 }
  0xfc   : > { %v1186_v60 = vmax.f32 %v1007_v58, 0.0 }
  0xfd   : > { %v1011_v61 = vpop.f32.mrb[4].mxu0  ;;  %v7812_v49 = vpop.f32.mrb[4].mxu1 }
  0xfe   : > { %v1012_v63 = vadd.f32 %v7792_v51, %v1011_v61  ;;  %v6789_v0 = vpop.f32.mrb[5].mxu0  ;;  %6904 = vmatmul.mubr.msk.f32.gmra.mrb[28].mxu1 %vm1233_vm3, %v1186_v60  ;;  %v6861_v53 = vpop.f32.mrb[5].mxu1  ;;  %v1634_v60 = vld [vmem:[%s9245_s6 + $0x10] sm:$0xff]  ;;  %v1635_v61 = vld [vmem:[%s9245_s6 + $0x18] sm:$0xff] }
  0xff   : > { %6906 = vmatprep.mubr.msk.f32.mxu1 %vm7350_vm0, %v7351_v4 }
 0x100   : > { %v1187_v3 = vmax.f32 %v1012_v63, 0.0  ;;  %v7199_v63 = vpack.c.bf16 %v1635_v61, %v1634_v60 }
 0x101   : > { %v1016_v5 = vpop.f32.mrb[6].mxu0  ;;  %v7818_v56 = vpop.f32.mrb[6].mxu1 }
 0x102   : > { %v1017_v9 = vadd.f32 %v7792_v51, %v1016_v5  ;;  %v6792_v11 = vpop.f32.mrb[7].mxu0  ;;  %6907 = vmatmul.mubr.msk.f32.gmra.mrb[30].mxu1 %vm1233_vm3, %v1187_v3  ;;  %v6864_v59 = vpop.f32.mrb[7].mxu1  ;;  %7200 = vmatpush3.bf16.msra.mxu0 %v7199_v63 }
 0x103   : > { %6909 = vmatprep.mubr.msk.f32.mxu1 %vm7350_vm0, %v7351_v4 }
 0x104   : > { %v1188_v14 = vmax.f32 %v1017_v9, 0.0 }
 0x105   : > { %v1021_v17 = vpop.f32.mrb[8].mxu0  ;;  %v7830_v3 = vpop.f32.mrb[8].mxu1 }
 0x106   : > { %v1022_v50 = vadd.f32 %v7792_v51, %v1021_v17  ;;  %v6795_v52 = vpop.f32.mrb[9].mxu0  ;;  %6910 = vmatmul.mubr.msk.f32.gmra.mrb[32].mxu1 %vm1233_vm3, %v1188_v14  ;;  %v6867_v11 = vpop.f32.mrb[9].mxu1 }
 0x107   : > { %6912 = vmatprep.mubr.msk.f32.mxu1 %vm7350_vm0, %v7351_v4 }
 0x108   : > { %v1189_v54 = vmax.f32 %v1022_v50, 0.0 }
 0x109   : > { %v1026_v55 = vpop.f32.mrb[10].mxu0  ;;  %v7836_v17 = vpop.f32.mrb[10].mxu1 }
 0x10a   : > { %v1027_v57 = vadd.f32 %v7792_v51, %v1026_v55  ;;  %v6798_v58 = vpop.f32.mrb[11].mxu0  ;;  %6913 = vmatmul.mubr.msk.f32.gmra.mrb[34].mxu1 %vm1233_vm3, %v1189_v54  ;;  %v6870_v53 = vpop.f32.mrb[11].mxu1 }
 0x10b   : > { %6915 = vmatprep.mubr.msk.f32.mxu1 %vm7350_vm0, %v7351_v4 }
 0x10c   : > { %v1190_v0 = vmax.f32 %v1027_v57, 0.0 }
 0x10d   : > { %v1031_v1 = vpop.f32.mrb[12].mxu0  ;;  %v7842_v57 = vpop.f32.mrb[12].mxu1 }
 0x10e   : > { %v1032_v5 = vadd.f32 %v7792_v51, %v1031_v1  ;;  %v6801_v9 = vpop.f32.mrb[13].mxu0  ;;  %6916 = vmatmul.mubr.msk.f32.gmra.mrb[36].mxu1 %vm1233_vm3, %v1190_v0  ;;  %v6873_v60 = vpop.f32.mrb[13].mxu1 }
 0x10f   : > { %6918 = vmatprep.mubr.msk.f32.mxu1 %vm7350_vm0, %v7351_v4 }
 0x110   : > { %v1191_v13 = vmax.f32 %v1032_v5, 0.0 }
 0x111   : > { %v1036_v14 = vpop.f32.mrb[14].mxu0  ;;  %v7848_v0 = vpop.f32.mrb[14].mxu1 }
 0x112   : > { %v1037_v50 = vadd.f32 %v7792_v51, %v1036_v14  ;;  %v6804_v52 = vpop.f32.mrb[15].mxu0  ;;  %6919 = vmatmul.mubr.msk.f32.gmra.mrb[38].mxu1 %vm1233_vm3, %v1191_v13  ;;  %v6876_v9 = vpop.f32.mrb[15].mxu1 }
 0x113   : > { %6921 = vmatprep.mubr.msk.f32.mxu1 %vm7350_vm0, %v7351_v4 }
 0x114   : > { %v1192_v54 = vmax.f32 %v1037_v50, 0.0 }
 0x115   : > { %v1041_v55 = vpop.f32.mrb[16].mxu0  ;;  %v7854_v14 = vpop.f32.mrb[16].mxu1 }
 0x116   : > { %v1042_v58 = vadd.f32 %v7792_v51, %v1041_v55  ;;  %v6807_v59 = vpop.f32.mrb[17].mxu0  ;;  %6922 = vmatmul.mubr.msk.f32.gmra.mrb[40].mxu1 %vm1233_vm3, %v1192_v54  ;;  %v6879_v53 = vpop.f32.mrb[17].mxu1 }
 0x117   : > { %6924 = vmatprep.mubr.msk.f32.mxu1 %vm7350_vm0, %v7351_v4 }
 0x118   : > { %v1193_v61 = vmax.f32 %v1042_v58, 0.0 }
 0x119   : > { %v1046_v63 = vpop.f32.mrb[18].mxu0  ;;  %v7860_v58 = vpop.f32.mrb[18].mxu1 }
 0x11a   : > { %v1047_v1 = vadd.f32 %v7792_v51, %v1046_v63  ;;  %v6810_v5 = vpop.f32.mrb[19].mxu0  ;;  %6925 = vmatmul.mubr.msk.f32.gmra.mrb[42].mxu1 %vm1233_vm3, %v1193_v61  ;;  %v6882_v61 = vpop.f32.mrb[19].mxu1 }
 0x11b   : > { %6927 = vmatprep.mubr.msk.f32.mxu1 %vm7350_vm0, %v7351_v4 }
 0x11c   : > { %v1194_v11 = vmax.f32 %v1047_v1, 0.0 }
 0x11d   : > { %v1051_v13 = vpop.f32.mrb[20].mxu0  ;;  %v7866_v5 = vpop.f32.mrb[20].mxu1 }
 0x11e   : > { %v1052_v50 = vadd.f32 %v7792_v51, %v1051_v13  ;;  %v6813_v52 = vpop.f32.mrb[21].mxu0  ;;  %6928 = vmatmul.mubr.msk.f32.gmra.mrb[44].mxu1 %vm1233_vm3, %v1194_v11  ;;  %v6885_v13 = vpop.f32.mrb[21].mxu1 }
 0x11f   : > { %6930 = vmatprep.mubr.msk.f32.mxu1 %vm7350_vm0, %v7351_v4 }
 0x120   : > { %v1195_v54 = vmax.f32 %v1052_v50, 0.0 }
 0x121   : > { %v1056_v55 = vpop.f32.mrb[22].mxu0  ;;  %v7872_v53 = vpop.f32.mrb[22].mxu1 }
 0x122   : > { %v1057_v59 = vadd.f32 %v7792_v51, %v1056_v55  ;;  %v6816_v60 = vpop.f32.mrb[23].mxu0  ;;  %6931 = vmatmul.mubr.msk.f32.gmra.mrb[46].mxu1 %vm1233_vm3, %v1195_v54 }
 0x123   : > { %6933 = vmatprep.mubr.msk.f32.mxu1 %vm7350_vm0, %v7351_v4 }
 0x124   : > { %v1196_v63 = vmax.f32 %v1057_v59, 0.0  ;;  %v6888_v59 = vpop.f32.mrb[23].mxu1 }
 0x125   : > { %v1061_v1 = vpop.f32.mrb[24].mxu0 }
 0x126   : > { %v1062_v9 = vadd.f32 %v7792_v51, %v1061_v1  ;;  %v6819_v11 = vpop.f32.mrb[25].mxu0  ;;  %6934 = vmatmul.mubr.msk.f32.gmra.mrb[48].mxu1 %vm1233_vm3, %v1196_v63  ;;  %v7878_v63 = vpop.f32.mrb[24].mxu1 }
 0x127   : > { %6936 = vmatprep.mubr.msk.f32.mxu1 %vm7350_vm0, %v7351_v4 }
 0x128   : > { %v1197_v50 = vmax.f32 %v1062_v9, 0.0  ;;  %v6891_v9 = vpop.f32.mrb[25].mxu1 }
 0x129   : > { %v1066_v52 = vpop.f32.mrb[26].mxu0 }
 0x12a   : > { %v1067_v54 = vadd.f32 %v7792_v51, %v1066_v52  ;;  %v6822_v55 = vpop.f32.mrb[27].mxu0  ;;  %6937 = vmatmul.mubr.msk.f32.gmra.mrb[50].mxu1 %vm1233_vm3, %v1197_v50 }
 0x12b   : > { %6939 = vmatprep.mubr.msk.f32.mxu1 %vm7350_vm0, %v7351_v4 }
 0x12c   : > { %v1198_v60 = vmax.f32 %v1067_v54, 0.0 }
 0x12d   : > { %v1071_v61 = vpop.f32.mrb[28].mxu0 }
 0x12e   : > { %v1072_v1 = vadd.f32 %v7792_v51, %v1071_v61  ;;  %v6825_v11 = vpop.f32.mrb[29].mxu0  ;;  %6940 = vmatmul.mubr.msk.f32.gmra.mrb[52].mxu1 %vm1233_vm3, %v1198_v60 }
 0x12f   : > { %6942 = vmatprep.mubr.msk.f32.mxu1 %vm7350_vm0, %v7351_v4 }
 0x130   : > { %v1199_v13 = vmax.f32 %v1072_v1, 0.0 }
 0x131   : > { %v1076_v52 = vpop.f32.mrb[30].mxu0 }
 0x132   : > { %v1077_v50 = vadd.f32 %v7792_v51, %v1076_v52  ;;  %v6828_v55 = vpop.f32.mrb[31].mxu0  ;;  %6943 = vmatmul.mubr.msk.f32.gmra.mrb[54].mxu1 %vm1233_vm3, %v1199_v13 }
 0x133   : > { %6945 = vmatprep.mubr.msk.f32.mxu1 %vm7350_vm0, %v7351_v4 }
 0x134   : > { %v1200_v54 = vmax.f32 %v1077_v50, 0.0 }
 0x135   : > { %v1081_v59 = vpop.f32.mrb[32].mxu0 }
 0x136   : > { %v1082_v61 = vadd.f32 %v7792_v51, %v1081_v59  ;;  %v6831_v11 = vpop.f32.mrb[33].mxu0  ;;  %6946 = vmatmul.mubr.msk.f32.gmra.mrb[56].mxu1 %vm1233_vm3, %v1200_v54 }
 0x137   : > { %6948 = vmatprep.mubr.msk.f32.mxu1 %vm7350_vm0, %v7351_v4 }
 0x138   : > { %v1201_v60 = vmax.f32 %v1082_v61, 0.0 }
 0x139   : > { %v1086_v1 = vpop.f32.mrb[34].mxu0 }
 0x13a   : > { %v1087_v9 = vadd.f32 %v7792_v51, %v1086_v1  ;;  %v6834_v52 = vpop.f32.mrb[35].mxu0  ;;  %6949 = vmatmul.mubr.msk.f32.gmra.mrb[58].mxu1 %vm1233_vm3, %v1201_v60 }
 0x13b   : > { %6951 = vmatprep.mubr.msk.f32.mxu1 %vm7350_vm0, %v7351_v4 }
 0x13c   : > { %v1202_v13 = vmax.f32 %v1087_v9, 0.0 }
 0x13d   : > { %v1091_v50 = vpop.f32.mrb[36].mxu0 }
 0x13e   : > { %v1092_v55 = vadd.f32 %v7792_v51, %v1091_v50  ;;  %v6837_v59 = vpop.f32.mrb[37].mxu0  ;;  %6952 = vmatmul.mubr.msk.f32.gmra.mrb[60].mxu1 %vm1233_vm3, %v1202_v13 }
 0x13f   : > { %6954 = vmatprep.mubr.msk.f32.mxu1 %vm7350_vm0, %v7351_v4 }
 0x140   : > { %v1203_v54 = vmax.f32 %v1092_v55, 0.0 }
 0x141   : > { %v1096_v61 = vpop.f32.mrb[38].mxu0 }
 0x142   : > { %v1097_v11 = vadd.f32 %v7792_v51, %v1096_v61  ;;  %v6840_v1 = vpop.f32.mrb[39].mxu0  ;;  %6955 = vmatmul.mubr.msk.f32.gmra.mrb[62].mxu1 %vm1233_vm3, %v1203_v54 }
 0x143   : > { %6957 = vmatprep.mubr.msk.f32.mxu1 %vm7350_vm0, %v7351_v4 }
 0x144   : > { %v1204_v60 = vmax.f32 %v1097_v11, 0.0 }
 0x145   : > { %v1101_v9 = vpop.f32.mrb[40].mxu0 }
 0x146   : > { %v1102_v52 = vadd.f32 %v7792_v51, %v1101_v9  ;;  %v6843_v50 = vpop.f32.mrb[41].mxu0  ;;  %6958 = vmatmul.mubr.msk.f32.gmra.mrb[64].mxu1 %vm1233_vm3, %v1204_v60 }
 0x147   : > { %6960 = vmatprep.mubr.msk.f32.mxu1 %vm7350_vm0, %v7351_v4 }
 0x148   : > { %v1205_v13 = vmax.f32 %v1102_v52, 0.0 }
 0x149   : > { %v1106_v55 = vpop.f32.mrb[42].mxu0 }
 0x14a   : > { %v1107_v59 = vadd.f32 %v7792_v51, %v1106_v55  ;;  %v6846_v61 = vpop.f32.mrb[43].mxu0  ;;  %6961 = vmatmul.mubr.msk.f32.gmra.mrb[66].mxu1 %vm1233_vm3, %v1205_v13  ;;  %v1122_v13 = vadd.f32 %v7792_v51, %v7800_v62 }
 0x14b   : > { %6963 = vmatprep.mubr.msk.f32.mxu1 %vm7350_vm0, %v7351_v4 }
 0x14c   : > { %v1206_v54 = vmax.f32 %v1107_v59, 0.0  ;;  %v1209_v61 = vmax.f32 %v1122_v13, 0.0  ;;  %v1162_v13 = vadd.f32 %v7792_v51, %v7854_v14 }
 0x14d   : > { %v1111_v11 = vpop.f32.mrb[44].mxu0 }
 0x14e   : > { %v1112_v1 = vadd.f32 %v7792_v51, %v1111_v11  ;;  %v6849_v9 = vpop.f32.mrb[45].mxu0  ;;  %6964 = vmatmul.mubr.msk.f32.gmra.mrb[68].mxu1 %vm1233_vm3, %v1206_v54  ;;  %v1127_v54 = vadd.f32 %v7792_v51, %v7806_v8 }
 0x14f   : > { %6966 = vmatprep.mubr.msk.f32.mxu1 %vm7350_vm0, %v7351_v4  ;;  %v1137_v9 = vadd.f32 %v7792_v51, %v7818_v56 }
 0x150   : > { %v1207_v60 = vmax.f32 %v1112_v1, 0.0  ;;  %v1210_v11 = vmax.f32 %v1127_v54, 0.0  ;;  %v1132_v1 = vadd.f32 %v7792_v51, %v7812_v49  ;;  %v1177_v54 = vadd.f32 %v7792_v51, %v7872_v53 }
 0x151   : > { %v1116_v52 = vpop.f32.mrb[46].mxu0  ;;  %v1212_v8 = vmax.f32 %v1137_v9, 0.0  ;;  %v551_v53 = vand.u32 2147483647, %v7518_v7  ;;  %v554_v7 = vand.u32 2147483647, %v7564_v18 }
 0x152   : > { %v1117_v50 = vadd.f32 %v7792_v51, %v1116_v52  ;;  %v6852_v55 = vpop.f32.mrb[47].mxu0  ;;  %6967 = vmatmul.mubr.msk.f32.gmra.mrb[70].mxu1 %vm1233_vm3, %v1207_v60  ;;  %v1211_v62 = vmax.f32 %v1132_v1, 0.0  ;;  %v1142_v60 = vadd.f32 %v7792_v51, %v7830_v3  ;;  %v1147_v52 = vadd.f32 %v7792_v51, %v7836_v17 }
 0x153   : > { %6969 = vmatprep.mubr.msk.f32.mxu1 %vm7350_vm0, %v7351_v4  ;;  %v1157_v55 = vadd.f32 %v7792_v51, %v7848_v0  ;;  %v591_v9 = vsel %vm587_vm2, %v551_v53, 0.0  ;;  %v556_v18 = vand.u32 2147483647, %v7593_v22  ;;  %v560_v22 = vand.u32 2147483647, %v7649_v30 }
 0x154   : > { %v1208_v59 = vmax.f32 %v1117_v50, 0.0  ;;  %v1213_v49 = vmax.f32 %v1142_v60, 0.0  ;;  %v1214_v56 = vmax.f32 %v1147_v52, 0.0  ;;  %v1152_v50 = vadd.f32 %v7792_v51, %v7842_v57 }
 0x155   : > { %v1216_v17 = vmax.f32 %v1157_v55, 0.0  ;;  %v1217_v57 = vmax.f32 %v1162_v13, 0.0  ;;  %v552_v60 = vand.u32 2147483647, %v7531_v10  ;;  %v574_v10 = vand.u32 2147483647, %v7534_v12 }
 0x156   : > { %6970 = vmatmul.mubr.msk.f32.gmra.mrb[72].mxu1 %vm1233_vm3, %v1208_v59  ;;  %v1215_v3 = vmax.f32 %v1152_v50, 0.0  ;;  %v1167_v59 = vadd.f32 %v7792_v51, %v7860_v58  ;;  %v1220_v58 = vmax.f32 %v1177_v54, 0.0  ;;  %v553_v12 = vand.u32 2147483647, %v7549_v15 }
 0x157   : > { %6972 = vmatprep.mubr.msk.f32.mxu1 %vm7350_vm0, %v7351_v4  ;;  %v594_v52 = vsel %vm587_vm2, %v552_v60, 0.0  ;;  %v660_v55 = vsel %vm587_vm2, %v574_v10, 0.0  ;;  %v561_v30 = vand.u32 2147483647, %v7663_v32  ;;  %v582_v32 = vand.u32 2147483647, %v7654_v31 }
 0x158   : > { %v1218_v0 = vmax.f32 %v1167_v59, 0.0  ;;  %v597_v59 = vsel %vm587_vm2, %v553_v12, 0.0 }
 0x159   : > { %v621_v15 = vsel %vm587_vm2, %v561_v30, 0.0 }
 0x15a   : > { %6973 = vmatmul.mubr.msk.f32.gmra.mrb[74].mxu1 %vm1233_vm3, %v1209_v61  ;;  %v1172_v61 = vadd.f32 %v7792_v51, %v7866_v5  ;;  %v550_v5 = vand.u32 2147483647, %v7511_v6 }
 0x15b   : > { %6975 = vmatprep.mubr.msk.f32.mxu1 %vm7350_vm0, %v7351_v4 }
 0x15c   : > { %v1219_v14 = vmax.f32 %v1172_v61, 0.0  ;;  %v588_v1 = vsel %vm587_vm2, %v550_v5, 0.0  ;;  %v684_v5 = vsel %vm587_vm2, %v582_v32, 0.0 }
 0x15d   : > { %589 = vadd.xlane.f32.xlu1 %v588_v1 }
 0x15e   : > { %6976 = vmatmul.mubr.msk.f32.gmra.mrb[76].mxu1 %vm1233_vm3, %v1210_v11  ;;  %v1182_v11 = vadd.f32 %v7792_v51, %v7878_v63  ;;  %v563_v51 = vand.u32 2147483647, %v7691_v36  ;;  %v559_v63 = vand.u32 2147483647, %v7635_v28  ;;  %v555_v36 = vand.u32 2147483647, %v7579_v20 }
 0x15f   : > { %6978 = vmatprep.mubr.msk.f32.mxu1 %vm7350_vm0, %v7351_v4  ;;  %v564_v20 = vand.u32 2147483647, %v7705_v38  ;;  %v557_v38 = vand.u32 2147483647, %v7607_v24  ;;  %v558_v24 = vand.u32 2147483647, %v7621_v26 }
 0x160   : > { %v627_v6 = vsel %vm587_vm2, %v563_v51, 0.0  ;;  %v603_v50 = vsel %vm587_vm2, %v555_v36, 0.0  ;;  %v8035_v26 = vld [vmem:[%s9244_s5] ss:$0 sm:$0xff]  ;;  %v583_v51 = vand.u32 2147483647, %v7668_v33 }
 0x161   : > { %592 = vadd.xlane.f32.xlu1 %v591_v9 }
 0x162   : > { %6979 = vmatmul.mubr.msk.f32.gmra.mrb[78].mxu1 %vm1233_vm3, %v1211_v62  ;;  %v1221_v62 = vmax.f32 %v1182_v11, 0.0 }
 0x163   : > { %6981 = vmatprep.mubr.msk.f32.mxu1 %vm7350_vm0, %v7351_v4 }
 0x165   : > { %628 = vadd.xlane.f32.xlu1 %v627_v6 }
 0x166   : > { %6982 = vmatmul.mubr.msk.f32.gmra.mrb[80].mxu1 %vm1233_vm3, %v1212_v8  ;;  %v615_v8 = vsel %vm587_vm2, %v559_v63, 0.0  ;;  %v687_v63 = vsel %vm587_vm2, %v583_v51, 0.0 }
 0x167   : > { %6984 = vmatprep.mubr.msk.f32.mxu1 %vm7350_vm0, %v7351_v4 }
 0x169   : > { %616 = vadd.xlane.f32.xlu1 %v615_v8 }
 0x16a   : > { %6985 = vmatmul.mubr.msk.f32.gmra.mrb[82].mxu1 %vm1233_vm3, %v1213_v49  ;;  %v600_v49 = vsel %vm587_vm2, %v554_v7, 0.0 }
 0x16b   : > { %6987 = vmatprep.mubr.msk.f32.mxu1 %vm7350_vm0, %v7351_v4  ;;  %601 = vadd.xlane.f32.xlu0 %v600_v49 }
 0x16d   : > { %595 = vadd.xlane.f32.xlu1 %v594_v52 }
 0x16e   : > { %6988 = vmatmul.mubr.msk.f32.gmra.mrb[84].mxu1 %vm1233_vm3, %v1214_v56  ;;  %v565_v56 = vand.u32 2147483647, %v7719_v40  ;;  %v568_v40 = vand.u32 2147483647, %v7742_v43  ;;  %v609_v43 = vsel %vm587_vm2, %v557_v38, 0.0 }
 0x16f   : > { %6990 = vmatprep.mubr.msk.f32.mxu1 %vm7350_vm0, %v7351_v4  ;;  %604 = vadd.xlane.f32.xlu0 %v603_v50  ;;  %v579_v38 = vand.u32 2147483647, %v7612_v25 }
 0x170   : > { %v633_v28 = vsel %vm587_vm2, %v565_v56, 0.0  ;;  %v642_v13 = vsel %vm587_vm2, %v568_v40, 0.0  ;;  %v578_v56 = vand.u32 2147483647, %v7598_v23 }
 0x171   : > { %634 = vadd.xlane.f32.xlu1 %v633_v28  ;;  %v675_v30 = vsel %vm587_vm2, %v579_v38, 0.0 }
 0x172   : > { %6991 = vmatmul.mubr.msk.f32.gmra.mrb[86].mxu1 %vm1233_vm3, %v1215_v3  ;;  %v606_v3 = vsel %vm587_vm2, %v556_v18, 0.0  ;;  %v672_v18 = vsel %vm587_vm2, %v578_v56, 0.0 }
 0x173   : > { %6993 = vmatprep.mubr.msk.f32.mxu1 %vm7350_vm0, %v7351_v4  ;;  %607 = vadd.xlane.f32.xlu0 %v606_v3  ;;  %v567_v3 = vand.u32 2147483647, %v7735_v42 }
 0x175   : > { %661 = vadd.xlane.f32.xlu1 %v660_v55  ;;  %v639_v40 = vsel %vm587_vm2, %v567_v3, 0.0 }
 0x176   : > { %6994 = vmatmul.mubr.msk.f32.gmra.mrb[88].mxu1 %vm1233_vm3, %v1216_v17  ;;  %v630_v17 = vsel %vm587_vm2, %v564_v20, 0.0 }
 0x177   : > { %6996 = vmatprep.mubr.msk.f32.mxu1 %vm7350_vm0, %v7351_v4  ;;  %631 = vadd.xlane.f32.xlu0 %v630_v17 }
 0x179   : > { %643 = vadd.xlane.f32.xlu1 %v642_v13  ;;  %v577_v13 = vand.u32 2147483647, %v7584_v21  ;;  %v580_v21 = vand.u32 2147483647, %v7626_v27  ;;  %v571_v27 = vand.u32 2147483647, %v7763_v46 }
 0x17a   : > { %6997 = vmatmul.mubr.msk.f32.gmra.mrb[90].mxu1 %vm1233_vm3, %v1217_v57  ;;  %v618_v57 = vsel %vm587_vm2, %v560_v22, 0.0 }
 0x17b   : > { %6999 = vmatprep.mubr.msk.f32.mxu1 %vm7350_vm0, %v7351_v4  ;;  %619 = vadd.xlane.f32.xlu0 %v618_v57  ;;  %v669_v57 = vsel %vm587_vm2, %v577_v13, 0.0  ;;  %v678_v25 = vsel %vm587_vm2, %v580_v21, 0.0 }
 0x17d   : > { %598 = vadd.xlane.f32.xlu1 %v597_v59 }
 0x17e   : > { %7000 = vmatmul.mubr.msk.f32.gmra.mrb[92].mxu1 %vm1233_vm3, %v1218_v0  ;;  %v573_v0 = vand.u32 2147483647, %v7777_v48  ;;  %v566_v48 = vand.u32 2147483647, %v7728_v41  ;;  %v575_v41 = vand.u32 2147483647, %v7554_v16 }
 0x17f   : > { %7002 = vmatprep.mubr.msk.f32.mxu1 %vm7350_vm0, %v7351_v4  ;;  %610 = vadd.xlane.f32.xlu0 %v609_v43  ;;  %v570_v16 = vand.u32 2147483647, %v7756_v45  ;;  %v584_v43 = vand.u32 2147483647, %v7682_v35  ;;  %v572_v35 = vand.u32 2147483647, %v7770_v47 }
 0x180   : > { %v657_v61 = vsel %vm587_vm2, %v573_v0, 0.0  ;;  %v636_v11 = vsel %vm587_vm2, %v566_v48, 0.0  ;;  %v663_v53 = vsel %vm587_vm2, %v575_v41, 0.0  ;;  %v576_v0 = vand.u32 2147483647, %v7569_v19 }
 0x181   : > { %637 = vadd.xlane.f32.xlu1 %v636_v11  ;;  %v648_v52 = vsel %vm587_vm2, %v570_v16, 0.0  ;;  %v651_v47 = vsel %vm587_vm2, %v571_v27, 0.0 }
 0x182   : > { %7003 = vmatmul.mubr.msk.f32.gmra.mrb[94].mxu1 %vm1233_vm3, %v1219_v14  ;;  %v569_v14 = vand.u32 2147483647, %v7749_v44  ;;  %v562_v44 = vand.u32 2147483647, %v7677_v34  ;;  %v666_v19 = vsel %vm587_vm2, %v576_v0, 0.0 }
 0x183   : > { %7005 = vmatprep.mubr.msk.f32.mxu1 %vm7350_vm0, %v7351_v4  ;;  %658 = vadd.xlane.f32.xlu0 %v657_v61 }
 0x184   : > { %v645_v54 = vsel %vm587_vm2, %v569_v14, 0.0  ;;  %v624_v1 = vsel %vm587_vm2, %v562_v44, 0.0  ;;  %v585_v44 = vand.u32 2147483647, %v7696_v37 }
 0x185   : > { %685 = vadd.xlane.f32.xlu1 %v684_v5  ;;  %v654_v5 = vsel %vm587_vm2, %v572_v35, 0.0 }
 0x186   : > { %7006 = vmatmul.mubr.msk.f32.gmra.mrb[96].mxu1 %vm1233_vm3, %v1220_v58  ;;  %v612_v58 = vsel %vm587_vm2, %v558_v24, 0.0 }
 0x187   : > { %7008 = vmatprep.mubr.msk.f32.mxu1 %vm7350_vm0, %v7351_v4  ;;  %622 = vadd.xlane.f32.xlu0 %v621_v15  ;;  %v690_v15 = vsel %vm587_vm2, %v584_v43, 0.0 }
 0x189   : > { %625 = vadd.xlane.f32.xlu1 %v624_v1 }
 0x18a   : > { %7009 = vmatmul.mubr.msk.f32.gmra.mrb[98].mxu1 %vm1233_vm3, %v1221_v62 }
 0x18b   : > { %7134 = vmatprep.mubr.msk.f32.mxu1 %vm7350_vm0, %v7351_v4  ;;  %646 = vadd.xlane.f32.xlu0 %v645_v54 }
 0x18d   : > { %670 = vadd.xlane.f32.xlu1 %v669_v57 }
 0x18f   : > { %613 = vadd.xlane.f32.xlu0 %v612_v58 }
 0x191   : > { %676 = vadd.xlane.f32.xlu1 %v675_v30 }
 0x193   : > { %664 = vadd.xlane.f32.xlu0 %v663_v53  ;;  %v693_v53 = vsel %vm587_vm2, %v585_v44, 0.0 }
 0x195   : > { %667 = vadd.xlane.f32.xlu1 %v666_v19 }
 0x197   : > { %688 = vadd.xlane.f32.xlu0 %v687_v63 }
 0x199   : > { %652 = vadd.xlane.f32.xlu1 %v651_v47 }
 0x19b   : > { %649 = vadd.xlane.f32.xlu0 %v648_v52 }
 0x19d   : > { %694 = vadd.xlane.f32.xlu1 %v693_v53  ;;  %v586_v53 = vand.u32 2147483647, %v7710_v39 }
 0x19f   : > { %673 = vadd.xlane.f32.xlu0 %v672_v18 }
 0x1a3   : > { %640 = vadd.xlane.f32.xlu0 %v639_v40 }
 0x1a7   : > { %691 = vadd.xlane.f32.xlu0 %v690_v15 }
 0x1ab   : > { %679 = vadd.xlane.f32.xlu0 %v678_v25 }
 0x1af   : > { %655 = vadd.xlane.f32.xlu0 %v654_v5 }
 0x1cd   : > { %v1411_v62 = vpop.f32.mrb[26].mxu1 }
 0x1ce   : > { %v1412_v31 = vadd.f32 %v8035_v26, %v1411_v62  ;;  %v6902_v9 = vpop.f32.mrb[27].mxu1 }
 0x1d0   : > { %v1595_v34 = vmax.f32 %v1412_v31, 0.0  ;;  %v581_v31 = vand.u32 2147483647, %v7640_v29 }
 0x1d1   : > { %v1416_v6 = vpop.f32.mrb[28].mxu1 }
 0x1d2   : > { %v1417_v8 = vadd.f32 %v8035_v26, %v1416_v6  ;;  %v6905_v7 = vpop.f32.mrb[29].mxu1  ;;  %7020 = vmatmul.mubr.msk.f32.vlgmr.msra.gmra.mrb[48].mxu0 %vm1233_vm3, %v1595_v34  ;;  %v681_v6 = vsel %vm587_vm2, %v581_v31, 0.0 }
 0x1d3   : > { %7022 = vmatprep.mubr.msk.f32.mxu0 %vm7350_vm0, %v7351_v4  ;;  %682 = vadd.xlane.f32.xlu1 %v681_v6 }
 0x1d4   : > { %v1596_v60 = vmax.f32 %v1417_v8, 0.0 }
 0x1d5   : > { %v1421_v49 = vpop.f32.mrb[30].mxu1 }
 0x1d6   : > { %v1422_v33 = vadd.f32 %v8035_v26, %v1421_v49  ;;  %v6908_v36 = vpop.f32.mrb[31].mxu1  ;;  %7023 = vmatmul.mubr.msk.f32.gmra.mrb[50].mxu0 %vm1233_vm3, %v1596_v60 }
 0x1d7   : > { %7025 = vmatprep.mubr.msk.f32.mxu0 %vm7350_vm0, %v7351_v4 }
 0x1d8   : > { %v1597_v50 = vmax.f32 %v1422_v33, 0.0 }
 0x1d9   : > { %v1426_v28 = vpop.f32.mrb[32].mxu1 }
 0x1da   : > { %v1427_v45 = vadd.f32 %v8035_v26, %v1426_v28  ;;  %v6911_v10 = vpop.f32.mrb[33].mxu1  ;;  %7026 = vmatmul.mubr.msk.f32.gmra.mrb[52].mxu0 %vm1233_vm3, %v1597_v50 }
 0x1db   : > { %7028 = vmatprep.mubr.msk.f32.mxu0 %vm7350_vm0, %v7351_v4 }
 0x1dc   : > { %v1598_v55 = vmax.f32 %v1427_v45, 0.0 }
 0x1dd   : > { %v1431_v20 = vpop.f32.mrb[34].mxu1 }
 0x1de   : > { %v1432_v23 = vadd.f32 %v8035_v26, %v1431_v20  ;;  %v6914_v17 = vpop.f32.mrb[35].mxu1  ;;  %7029 = vmatmul.mubr.msk.f32.gmra.mrb[54].mxu0 %vm1233_vm3, %v1598_v55 }
 0x1df   : > { %7031 = vmatprep.mubr.msk.f32.mxu0 %vm7350_vm0, %v7351_v4 }
 0x1e0   : > { %v1599_v22 = vmax.f32 %v1432_v23, 0.0 }
 0x1e1   : > { %v1436_v12 = vpop.f32.mrb[36].mxu1 }
 0x1e2   : > { %v1437_v42 = vadd.f32 %v8035_v26, %v1436_v12  ;;  %v6917_v59 = vpop.f32.mrb[37].mxu1  ;;  %7032 = vmatmul.mubr.msk.f32.gmra.mrb[56].mxu0 %vm1233_vm3, %v1599_v22 }
 0x1e3   : > { %7034 = vmatprep.mubr.msk.f32.mxu0 %vm7350_vm0, %v7351_v4 }
 0x1e4   : > { %v1600_v61 = vmax.f32 %v1437_v42, 0.0 }
 0x1e5   : > { %v1441_v14 = vpop.f32.mrb[38].mxu1 }
 0x1e6   : > { %v1442_v54 = vadd.f32 %v8035_v26, %v1441_v14  ;;  %v6920_v24 = vpop.f32.mrb[39].mxu1  ;;  %7035 = vmatmul.mubr.msk.f32.gmra.mrb[58].mxu0 %vm1233_vm3, %v1600_v61 }
 0x1e7   : > { %7037 = vmatprep.mubr.msk.f32.mxu0 %vm7350_vm0, %v7351_v4 }
 0x1e8   : > { %v1601_v58 = vmax.f32 %v1442_v54, 0.0 }
 0x1e9   : > { %v1446_v48 = vpop.f32.mrb[40].mxu1 }
 0x1ea   : > { %v1447_v11 = vadd.f32 %v8035_v26, %v1446_v48  ;;  %v6923_v32 = vpop.f32.mrb[41].mxu1  ;;  %7038 = vmatmul.mubr.msk.f32.gmra.mrb[60].mxu0 %vm1233_vm3, %v1601_v58 }
 0x1eb   : > { %7040 = vmatprep.mubr.msk.f32.mxu0 %vm7350_vm0, %v7351_v4 }
 0x1ec   : > { %v1602_v1 = vmax.f32 %v1447_v11, 0.0 }
 0x1ed   : > { %v1451_v46 = vpop.f32.mrb[42].mxu1 }
 0x1ee   : > { %v1452_v41 = vadd.f32 %v8035_v26, %v1451_v46  ;;  %v6926_v62 = vpop.f32.mrb[43].mxu1  ;;  %7041 = vmatmul.mubr.msk.f32.gmra.mrb[62].mxu0 %vm1233_vm3, %v1602_v1 }
 0x1ef   : > { %7043 = vmatprep.mubr.msk.f32.mxu0 %vm7350_vm0, %v7351_v4 }
 0x1f0   : > { %v1603_v9 = vmax.f32 %v1452_v41, 0.0 }
 0x1f1   : > { %v1456_v51 = vpop.f32.mrb[44].mxu1 }
 0x1f2   : > { %v1457_v37 = vadd.f32 %v8035_v26, %v1456_v51  ;;  %v6929_v34 = vpop.f32.mrb[45].mxu1  ;;  %7044 = vmatmul.mubr.msk.f32.gmra.mrb[64].mxu0 %vm1233_vm3, %v1603_v9 }
 0x1f3   : > { %7046 = vmatprep.mubr.msk.f32.mxu0 %vm7350_vm0, %v7351_v4 }
 0x1f4   : > { %v1604_v63 = vmax.f32 %v1457_v37, 0.0  ;;  %v696_v37 = vsel %vm587_vm2, %v586_v53, 0.0  ;;  %v590_v53 = vpop.xlane.xlu1 %589 }
 0x1f5   : > { %v1461_v8 = vpop.f32.mrb[46].mxu1  ;;  %697 = vadd.xlane.f32.xlu0 %v696_v37  ;;  %v5974_v37 = vld [vmem:[%s9248_s9 + $0x8] sm:$0x1]  ;;  %vm699_vm6 = vcmp.ne.f32.partialorder %v590_v53, 0.0 }
 0x1f6   : > { %v1462_v7 = vadd.f32 %v8035_v26, %v1461_v8  ;;  %v6932_v16 = vpop.f32.mrb[47].mxu1  ;;  %7047 = vmatmul.mubr.msk.f32.gmra.mrb[66].mxu0 %vm1233_vm3, %v1604_v63 }
 0x1f7   : > { %7049 = vmatprep.mubr.msk.f32.mxu0 %vm7350_vm0, %v7351_v4 }
 0x1f8   : > { %v1605_v29 = vmax.f32 %v1462_v7, 0.0 }
 0x1f9   : > { %v1466_v60 = vpop.f32.mrb[48].mxu1 }
 0x1fa   : > { %v1467_v49 = vadd.f32 %v8035_v26, %v1466_v60  ;;  %v6935_v52 = vpop.f32.mrb[49].mxu1  ;;  %7050 = vmatmul.mubr.msk.f32.gmra.mrb[68].mxu0 %vm1233_vm3, %v1605_v29 }
 0x1fb   : > { %7052 = vmatprep.mubr.msk.f32.mxu0 %vm7350_vm0, %v7351_v4 }
 0x1fc   : > { %v1606_v33 = vmax.f32 %v1467_v49, 0.0 }
 0x1fd   : > { %v1471_v36 = vpop.f32.mrb[50].mxu1 }
 0x1fe   : > { %v1472_v56 = vadd.f32 %v8035_v26, %v1471_v36  ;;  %v6938_v50 = vpop.f32.mrb[51].mxu1  ;;  %7053 = vmatmul.mubr.msk.f32.gmra.mrb[70].mxu0 %vm1233_vm3, %v1606_v33 }
 0x1ff   : > { %7055 = vmatprep.mubr.msk.f32.mxu0 %vm7350_vm0, %v7351_v4 }
 0x200   : > { %v1607_v28 = vmax.f32 %v1472_v56, 0.0 }
 0x201   : > { %v1476_v18 = vpop.f32.mrb[52].mxu1 }
 0x202   : > { %v1477_v45 = vadd.f32 %v8035_v26, %v1476_v18  ;;  %v6941_v10 = vpop.f32.mrb[53].mxu1  ;;  %7056 = vmatmul.mubr.msk.f32.gmra.mrb[72].mxu0 %vm1233_vm3, %v1607_v28 }
 0x203   : > { %7058 = vmatprep.mubr.msk.f32.mxu0 %vm7350_vm0, %v7351_v4 }
 0x204   : > { %v1608_v3 = vmax.f32 %v1477_v45, 0.0 }
 0x205   : > { %v1481_v55 = vpop.f32.mrb[54].mxu1 }
 0x206   : > { %v1482_v20 = vadd.f32 %v8035_v26, %v1481_v55  ;;  %v6944_v40 = vpop.f32.mrb[55].mxu1  ;;  %7059 = vmatmul.mubr.msk.f32.gmra.mrb[74].mxu0 %vm1233_vm3, %v1608_v3 }
 0x207   : > { %7061 = vmatprep.mubr.msk.f32.mxu0 %vm7350_vm0, %v7351_v4 }
 0x208   : > { %v1609_v23 = vmax.f32 %v1482_v20, 0.0 }
 0x209   : > { %v1486_v17 = vpop.f32.mrb[56].mxu1 }
 0x20a   : > { %v1487_v13 = vadd.f32 %v8035_v26, %v1486_v17  ;;  %v6947_v22 = vpop.f32.mrb[57].mxu1  ;;  %7062 = vmatmul.mubr.msk.f32.gmra.mrb[76].mxu0 %vm1233_vm3, %v1609_v23 }
 0x20b   : > { %7064 = vmatprep.mubr.msk.f32.mxu0 %vm7350_vm0, %v7351_v4 }
 0x20c   : > { %v1610_v12 = vmax.f32 %v1487_v13, 0.0 }
 0x20d   : > { %v1491_v57 = vpop.f32.mrb[58].mxu1 }
 0x20e   : > { %v1492_v42 = vadd.f32 %v8035_v26, %v1491_v57  ;;  %v6950_v59 = vpop.f32.mrb[59].mxu1  ;;  %7065 = vmatmul.mubr.msk.f32.gmra.mrb[78].mxu0 %vm1233_vm3, %v1610_v12 }
 0x20f   : > { %7067 = vmatprep.mubr.msk.f32.mxu0 %vm7350_vm0, %v7351_v4 }
 0x210   : > { %v1611_v38 = vmax.f32 %v1492_v42, 0.0 }
 0x211   : > { %v1496_v43 = vpop.f32.mrb[60].mxu1 }
 0x212   : > { %v1497_v0 = vadd.f32 %v8035_v26, %v1496_v43  ;;  %v6953_v21 = vpop.f32.mrb[61].mxu1  ;;  %7068 = vmatmul.mubr.msk.f32.gmra.mrb[80].mxu0 %vm1233_vm3, %v1611_v38 }
 0x213   : > { %7070 = vmatprep.mubr.msk.f32.mxu0 %vm7350_vm0, %v7351_v4 }
 0x214   : > { %v1612_v61 = vmax.f32 %v1497_v0, 0.0 }
 0x215   : > { %v1501_v30 = vpop.f32.mrb[62].mxu1 }
 0x216   : > { %v1502_v15 = vadd.f32 %v8035_v26, %v1501_v30  ;;  %v6956_v14 = vpop.f32.mrb[63].mxu1  ;;  %7071 = vmatmul.mubr.msk.f32.gmra.mrb[82].mxu0 %vm1233_vm3, %v1612_v61 }
 0x217   : > { %7073 = vmatprep.mubr.msk.f32.mxu0 %vm7350_vm0, %v7351_v4 }
 0x218   : > { %v1613_v54 = vmax.f32 %v1502_v15, 0.0 }
 0x219   : > { %v1506_v24 = vpop.f32.mrb[64].mxu1 }
 0x21a   : > { %v1507_v25 = vadd.f32 %v8035_v26, %v1506_v24  ;;  %v6959_v35 = vpop.f32.mrb[65].mxu1  ;;  %7074 = vmatmul.mubr.msk.f32.gmra.mrb[84].mxu0 %vm1233_vm3, %v1613_v54 }
 0x21b   : > { %7076 = vmatprep.mubr.msk.f32.mxu0 %vm7350_vm0, %v7351_v4 }
 0x21c   : > { %v1614_v19 = vmax.f32 %v1507_v25, 0.0 }
 0x21d   : > { %v1511_v27 = vpop.f32.mrb[66].mxu1 }
 0x21e   : > { %v1512_v58 = vadd.f32 %v8035_v26, %v1511_v27  ;;  %v6962_v48 = vpop.f32.mrb[67].mxu1  ;;  %7077 = vmatmul.mubr.msk.f32.gmra.mrb[86].mxu0 %vm1233_vm3, %v1614_v19  ;;  %v8204_v27 = vpop.xlane.xlu0 %601 }
 0x21f   : > { %7079 = vmatprep.mubr.msk.f32.mxu0 %vm7350_vm0, %v7351_v4  ;;  %vm703_vm10 = vcmp.ne.f32.partialorder %v8204_v27, 0.0 }
 0x220   : > { %v1615_v11 = vmax.f32 %v1512_v58, 0.0 }
 0x221   : > { %v1516_v32 = vpop.f32.mrb[68].mxu1 }
 0x222   : > { %v1517_v5 = vadd.f32 %v8035_v26, %v1516_v32  ;;  %v6965_v47 = vpop.f32.mrb[69].mxu1  ;;  %7080 = vmatmul.mubr.msk.f32.gmra.mrb[88].mxu0 %vm1233_vm3, %v1615_v11 }
 0x223   : > { %7082 = vmatprep.mubr.msk.f32.mxu0 %vm7350_vm0, %v7351_v4 }
 0x224   : > { %v1616_v44 = vmax.f32 %v1517_v5, 0.0 }
 0x225   : > { %v1521_v1 = vpop.f32.mrb[70].mxu1 }
 0x226   : > { %v1522_v46 = vadd.f32 %v8035_v26, %v1521_v1  ;;  %v6968_v41 = vpop.f32.mrb[71].mxu1  ;;  %7083 = vmatmul.mubr.msk.f32.gmra.mrb[90].mxu0 %vm1233_vm3, %v1616_v44  ;;  %v8210_v44 = vpop.xlane.xlu0 %604 }
 0x227   : > { %7085 = vmatprep.mubr.msk.f32.mxu0 %vm7350_vm0, %v7351_v4  ;;  %vm704_vm12 = vcmp.ne.f32.partialorder %v8210_v44, 0.0 }
 0x228   : > { %v1617_v62 = vmax.f32 %v1522_v46, 0.0 }
 0x229   : > { %v1526_v31 = vpop.f32.mrb[72].mxu1 }
 0x22a   : > { %v1527_v9 = vadd.f32 %v8035_v26, %v1526_v31  ;;  %v6971_v51 = vpop.f32.mrb[73].mxu1  ;;  %7086 = vmatmul.mubr.msk.f32.gmra.mrb[92].mxu0 %vm1233_vm3, %v1617_v62  ;;  %v8217_v62 = vpop.xlane.xlu0 %607 }
 0x22b   : > { %7088 = vmatprep.mubr.msk.f32.mxu0 %vm7350_vm0, %v7351_v4  ;;  %vm705_vm15 = vcmp.ne.f32.partialorder %v8217_v62, 0.0 }
 0x22c   : > { %v1618_v34 = vmax.f32 %v1527_v9, 0.0  ;;  %v593_v9 = vpop.xlane.xlu1 %592 }
 0x22d   : > { %v1531_v6 = vpop.f32.mrb[74].mxu1  ;;  %vm700_vm7 = vcmp.ne.f32.partialorder %v593_v9, 0.0 }
 0x22e   : > { %v1532_v63 = vadd.f32 %v8035_v26, %v1531_v6  ;;  %v6974_v8 = vpop.f32.mrb[75].mxu1  ;;  %7089 = vmatmul.mubr.msk.f32.gmra.mrb[94].mxu0 %vm1233_vm3, %v1618_v34  ;;  %v8219_v31 = vpop.xlane.xlu0 %631 }
 0x22f   : > { %7091 = vmatprep.mubr.msk.f32.mxu0 %vm7350_vm0, %v7351_v4  ;;  %vm713_vm2 = vcmp.ne.f32.partialorder %v8219_v31, 0.0 }
 0x230   : > { %v1619_v39 = vmax.f32 %v1532_v63, 0.0  ;;  %v629_v6 = vpop.xlane.xlu1 %628 }
 0x231   : > { %v1536_v7 = vpop.f32.mrb[76].mxu1  ;;  %vm712_vm8 = vcmp.ne.f32.partialorder %v629_v6, 0.0 }
 0x232   : > { %v1537_v16 = vadd.f32 %v8035_v26, %v1536_v7  ;;  %v6977_v29 = vpop.f32.mrb[77].mxu1  ;;  %7092 = vmatmul.mubr.msk.f32.gmra.mrb[96].mxu0 %vm1233_vm3, %v1619_v39  ;;  %v8221_v51 = vpop.xlane.xlu0 %619 }
 0x233   : > { %7094 = vmatprep.mubr.msk.f32.mxu0 %vm7350_vm0, %v7351_v4 }
 0x234   : > { %v1620_v60 = vmax.f32 %v1537_v16, 0.0  ;;  %v617_v8 = vpop.xlane.xlu1 %616 }
 0x235   : > { %v1541_v49 = vpop.f32.mrb[78].mxu1  ;;  %vm708_vm9 = vcmp.ne.f32.partialorder %v617_v8, 0.0 }
 0x236   : > { %v1542_v52 = vadd.f32 %v8035_v26, %v1541_v49  ;;  %v6980_v33 = vpop.f32.mrb[79].mxu1  ;;  %7095 = vmatmul.mubr.msk.f32.gmra.mrb[98].mxu0 %vm1233_vm3, %v1620_v60  ;;  %v8231_v63 = vpop.xlane.xlu0 %610 }
 0x237   : > { %7097 = vmatprep.mubr.msk.f32.mxu0 %vm7350_vm0, %v7351_v4 }
 0x238   : > { %v1621_v36 = vmax.f32 %v1542_v52, 0.0  ;;  %v596_v7 = vpop.xlane.xlu1 %595 }
 0x239   : > { %v1546_v56 = vpop.f32.mrb[80].mxu1  ;;  %vm701_vm11 = vcmp.ne.f32.partialorder %v596_v7, 0.0 }
 0x23a   : > { %v1547_v50 = vadd.f32 %v8035_v26, %v1546_v56  ;;  %v6983_v28 = vpop.f32.mrb[81].mxu1  ;;  %7098 = vmatmul.mubr.msk.f32.gmra.mrb[100].mxu0 %vm1233_vm3, %v1621_v36  ;;  %v8233_v39 = vpop.xlane.xlu0 %658 }
 0x23b   : > { %7100 = vmatprep.mubr.msk.f32.mxu0 %vm7350_vm0, %v7351_v4 }
 0x23c   : > { %v1622_v18 = vmax.f32 %v1547_v50, 0.0  ;;  %v635_v29 = vpop.xlane.xlu1 %634 }
 0x23d   : > { %v1551_v45 = vpop.f32.mrb[82].mxu1  ;;  %vm714_vm14 = vcmp.ne.f32.partialorder %v635_v29, 0.0 }
 0x23e   : > { %v1552_v10 = vadd.f32 %v8035_v26, %v1551_v45  ;;  %v6986_v3 = vpop.f32.mrb[83].mxu1  ;;  %7101 = vmatmul.mubr.msk.f32.gmra.mrb[102].mxu0 %vm1233_vm3, %v1622_v18  ;;  %v8235_v16 = vpop.xlane.xlu0 %622  ;;  %v7353_v18 = vmov 1966171168  }
 0x23f   : > { %7103 = vmatprep.mubr.msk.f32.mxu0 %vm7350_vm0, %v7351_v4  ;;  %v2117_v45 = vunpack.c.l.s4 %v7353_v18 }
 0x240   : > { %v1623_v55 = vmax.f32 %v1552_v10, 0.0  ;;  %v662_v49 = vpop.xlane.xlu1 %661  ;;  %v2119_v10 = vlaneseq }
 0x241   : > { %v1556_v20 = vpop.f32.mrb[84].mxu1  ;;  %vm723_vm1 = vcmp.ne.f32.partialorder %v662_v49, 0.0 }
 0x242   : > { %v1557_v40 = vadd.f32 %v8035_v26, %v1556_v20  ;;  %v6989_v23 = vpop.f32.mrb[85].mxu1  ;;  %7104 = vmatmul.mubr.msk.f32.gmra.mrb[104].mxu0 %vm1233_vm3, %v1623_v55  ;;  %v8237_v60 = vpop.xlane.xlu0 %646  ;;  %v6427_v20 = vsel %vm699_vm6, 1.0, %v7351_v4  ;;  %vm706_vm6 = vcmp.ne.f32.partialorder %v8231_v63, 0.0 }
 0x243   : > { %7106 = vmatprep.mubr.msk.f32.mxu0 %vm7350_vm0, %v7351_v4  ;;  %v2120_v23 = vshrl.u32 %v2119_v10, 7 }
 0x244   : > { %v1624_v17 = vmax.f32 %v1557_v40, 0.0  ;;  %v644_v33 = vpop.xlane.xlu1 %643  ;;  %v2118_v40 = vunpack.c.0.s8 %v2117_v45 }
 0x245   : > { %v1561_v13 = vpop.f32.mrb[86].mxu1  ;;  %vm717_vm4 = vcmp.ne.f32.partialorder %v644_v33, 0.0 }
 0x246   : > { %v1562_v22 = vadd.f32 %v8035_v26, %v1561_v13  ;;  %v6992_v12 = vpop.f32.mrb[87].mxu1  ;;  %7107 = vmatmul.mubr.msk.f32.gmra.mrb[106].mxu0 %vm1233_vm3, %v1624_v17  ;;  %v614_v52 = vpop.xlane.xlu0 %613  ;;  %v6428_v17 = vsel %vm700_vm7, 1.0, %v7351_v4  ;;  %v8251_v13 = vsel %vm712_vm8, 1.0, %v7351_v4  ;;  %vm722_vm8 = vcmp.ne.f32.partialorder %v8233_v39, 0.0 }
 0x247   : > { %7109 = vmatprep.mubr.msk.f32.mxu0 %vm7350_vm0, %v7351_v4  ;;  %v8258_v12 = vsel %vm703_vm10, 1.0, %v7351_v4  ;;  %vm707_vm7 = vcmp.ne.f32.partialorder %v614_v52, 0.0  ;;  %vm718_vm10 = vcmp.ne.f32.partialorder %v8237_v60, 0.0 }
 0x248   : > { %v1625_v57 = vmax.f32 %v1562_v22, 0.0  ;;  %v599_v56 = vpop.xlane.xlu1 %598  ;;  %v8255_v22 = vsel %vm708_vm9, 1.0, %v7351_v4  ;;  %vm710_vm9 = vcmp.ne.f32.partialorder %v8235_v16, 0.0  ;;  %v8324_v9 = vsel %vm718_vm10, 1.0, %v7351_v4 }
 0x249   : > { %v1566_v42 = vpop.f32.mrb[88].mxu1  ;;  %vm702_vm13 = vcmp.ne.f32.partialorder %v599_v56, 0.0 }
 0x24a   : > { %v1567_v59 = vadd.f32 %v8035_v26, %v1566_v42  ;;  %v6995_v38 = vpop.f32.mrb[89].mxu1  ;;  %7110 = vmatmul.mubr.msk.f32.gmra.mrb[108].mxu0 %vm1233_vm3, %v1625_v57  ;;  %v8239_v36 = vpop.xlane.xlu0 %664  ;;  %v8261_v57 = vsel %vm701_vm11, 1.0, %v7351_v4  ;;  %v8266_v42 = vld [vmem:[%s9246_s7] ss:$0 sm:$0xff] }
 0x24b   : > { %7112 = vmatprep.mubr.msk.f32.mxu0 %vm7350_vm0, %v7351_v4 }
 0x24c   : > { %v1626_v43 = vmax.f32 %v1567_v59, 0.0  ;;  %v8243_v28 = vpop.xlane.xlu1 %637 }
 0x24d   : > { %v1571_v0 = vpop.f32.mrb[90].mxu1 }
 0x24e   : > { %v1572_v21 = vadd.f32 %v8035_v26, %v1571_v0  ;;  %v6998_v61 = vpop.f32.mrb[91].mxu1  ;;  %7113 = vmatmul.mubr.msk.f32.gmra.mrb[110].mxu0 %vm1233_vm3, %v1626_v43  ;;  %v8241_v50 = vpop.xlane.xlu0 %688  ;;  %v8272_v43 = vsub.s32 %v2118_v40, %v2120_v23  ;;  %v8275_v0 = vsel %vm704_vm12, 1.0, %v7351_v4  ;;  %vm715_vm12 = vcmp.ne.f32.partialorder %v8243_v28, 0.0 }
 0x24f   : > { %7115 = vmatprep.mubr.msk.f32.mxu0 %vm7350_vm0, %v7351_v4 }
 0x250   : > { %v1627_v30 = vmax.f32 %v1572_v21, 0.0  ;;  %v686_v55 = vpop.xlane.xlu1 %685  ;;  %v8279_v21 = vsel %vm702_vm13, 1.0, %v7351_v4 }
 0x251   : > { %v1576_v15 = vpop.f32.mrb[92].mxu1  ;;  %vm731_vm13 = vcmp.ne.f32.partialorder %v686_v55, 0.0 }
 0x252   : > { %v1577_v14 = vadd.f32 %v8035_v26, %v1576_v15  ;;  %v7001_v54 = vpop.f32.mrb[93].mxu1  ;;  %7116 = vmatmul.mubr.msk.f32.gmra.mrb[112].mxu0 %vm1233_vm3, %v1627_v30  ;;  %v8245_v3 = vpop.xlane.xlu0 %649  ;;  %v8283_v15 = vsel %vm714_vm14, 1.0, %v7351_v4  ;;  %vm724_vm14 = vcmp.ne.f32.partialorder %v8239_v36, 0.0 }
 0x253   : > { %7118 = vmatprep.mubr.msk.f32.mxu0 %vm7350_vm0, %v7351_v4  ;;  %v8287_v54 = vsel %vm705_vm15, 1.0, %v7351_v4  ;;  %vm732_vm15 = vcmp.ne.f32.partialorder %v8241_v50, 0.0  ;;  %v8342_v7 = vsel %vm724_vm14, 1.0, %v7351_v4 }
 0x254   : > { %v1628_v24 = vmax.f32 %v1577_v14, 0.0  ;;  %v626_v14 = vpop.xlane.xlu1 %625  ;;  %v8347_v16 = vsel %vm732_vm15, 1.0, %v7351_v4 }
 0x255   : > { %v1581_v25 = vpop.f32.mrb[94].mxu1  ;;  %vm711_vm11 = vcmp.ne.f32.partialorder %v626_v14, 0.0 }
 0x256   : > { %v1582_v35 = vadd.f32 %v8035_v26, %v1581_v25  ;;  %v7004_v19 = vpop.f32.mrb[95].mxu1  ;;  %7119 = vmatmul.mubr.msk.f32.gmra.mrb[114].mxu0 %vm1233_vm3, %v1628_v24  ;;  %v8268_v59 = vpop.xlane.xlu0 %673  ;;  %v8290_v24 = vsel %vm723_vm1, 1.0, %v7351_v4  ;;  %v8293_v25 = vsel %vm713_vm2, 1.0, %v7351_v4  ;;  %vm719_vm2 = vcmp.ne.f32.partialorder %v8245_v3, 0.0 }
 0x257   : > { %7121 = vmatprep.mubr.msk.f32.mxu0 %vm7350_vm0, %v7351_v4  ;;  %v8357_v45 = vsel %vm719_vm2, 1.0, %v7351_v4  ;;  %vm6060_vm2 = vcmask 1041409  }
 0x258   : > { %v1629_v58 = vmax.f32 %v1582_v35, 0.0  ;;  %v8296_v35 = vsel %vm717_vm4, 1.0, %v7351_v4  ;;  %vm5855_vm4 = vcmask 258048  }
 0x259   : > { %v1586_v48 = vpop.f32.mrb[96].mxu1 }
 0x25a   : > { %v1587_v11 = vadd.f32 %v8035_v26, %v1586_v48  ;;  %v7007_v32 = vpop.f32.mrb[97].mxu1  ;;  %7122 = vmatmul.mubr.msk.f32.gmra.mrb[116].mxu0 %vm1233_vm3, %v1629_v58  ;;  %v8304_v48 = vsel %vm706_vm6, 1.0, %v7351_v4 }
 0x25b   : > { %7124 = vmatprep.mubr.msk.f32.mxu0 %vm7350_vm0, %v7351_v4  ;;  %v641_v32 = vpop.xlane.xlu0 %640 }
 0x25c   : > { %v1630_v5 = vmax.f32 %v1587_v11, 0.0  ;;  %v8308_v11 = vsel %vm707_vm7, 1.0, %v7351_v4  ;;  %vm716_vm1 = vcmp.ne.f32.partialorder %v641_v32, 0.0 }
 0x25d   : > { %v1591_v47 = vpop.f32.mrb[98].mxu1  ;;  %v8350_v29 = vsel %vm716_vm1, 1.0, %v7351_v4  ;;  %vm5975_vm1 = vcmask 72704  }
 0x25e   : > { %v1592_v1 = vadd.f32 %v8035_v26, %v1591_v47  ;;  %v7010_v46 = vpop.f32.mrb[99].mxu1  ;;  %7125 = vmatmul.mubr.msk.f32.gmra.mrb[118].mxu0 %vm1233_vm3, %v1630_v5  ;;  %v5973_v26 = vld [vmem:[%s9248_s9] sm:$0xff] }
 0x25f   : > { %7127 = vmatprep.mubr.msk.f32.mxu0 %vm7350_vm0, %v7351_v4  ;;  %v7202_v34 = vpack.c.bf16 %v5974_v37, %v5973_v26  ;;  %v8316_v46 = vsel %vm710_vm9, 1.0, %v7351_v4  ;;  %v8330_v26 = vsel %vm731_vm13, 1.0, %v7351_v4  ;;  %v8334_v37 = vsel %vm711_vm11, 1.0, %v7351_v4 }
 0x260   : > { %v1631_v41 = vmax.f32 %v1592_v1, 0.0  ;;  %v8313_v1 = vsel %vm722_vm8, 1.0, %v7351_v4 }
 0x261   : > { %7204 = vmatpush3.bf16.msk.msra.mxu1 %vm7203_vm5, %v7202_v34  ;;  %vm709_vm5 = vcmp.ne.f32.partialorder %v8221_v51, 0.0  ;;  %v8327_v51 = vsel %vm715_vm12, 1.0, %v7351_v4 }
 0x262   : > { %7128 = vmatmul.mubr.msk.f32.gmra.mrb[120].mxu0 %vm1233_vm3, %v1631_v41  ;;  %7205 = vmatprep.subr.bf16.mxu1 %v7349_v2  ;;  %v8299_v27 = vsel %vm709_vm5, 1.0, %v7351_v4  ;;  %vm727_vm5 = vcmp.ne.f32.partialorder %v8268_v59, 0.0 }
 0x2a5   : > { %v1820_v38 = vpop.f32.mrb[48].mxu0 }
 0x2a6   : > { %v1821_v61 = vadd.f32 %v8266_v42, %v1820_v38  ;;  %v7021_v30 = vpop.f32.mrb[49].mxu0 }
 0x2a8   : > { %v2004_v19 = vmax.f32 %v1821_v61, 0.0 }
 0x2a9   : > { %v1825_v58 = vpop.f32.mrb[50].mxu0 }
 0x2aa   : > { %v2041_v5 = vmul.f32 %v6427_v20, %v2004_v19  ;;  %v1826_v47 = vadd.f32 %v8266_v42, %v1825_v58  ;;  %v7024_v44 = vpop.f32.mrb[51].mxu0 }
 0x2ac   : > { %v2115_v41 = vcombine.high %v2041_v5, %v2041_v5  ;;  %v2122_v62 = vrot.slane %v2041_v5, %v8272_v43  ;;  %v2005_v53 = vmax.f32 %v1826_v47, 0.0 }
 0x2ad   : > { %v1830_v31 = vpop.f32.mrb[52].mxu0 }
 0x2ae   : > { %v2129_v34 = vrot.slane %v2115_v41, %v8272_v43  ;;  %v2130_v6 = vcombine.high %v2122_v62, %v2122_v62  ;;  %v2042_v63 = vmul.f32 %v6428_v17, %v2005_v53  ;;  %v7027_v8 = vpop.f32.mrb[53].mxu0  ;;  %v1831_v39 = vadd.f32 %v8266_v42, %v1830_v31 }
 0x2af   : > { %v2138_v49 = vrot.slane %v2122_v62, %v8272_v43 }
 0x2b0   : > { %v2131_v60 = vcombine.high %v2129_v34, %v2129_v34  ;;  %v2152_v52 = vrot.slane %v2130_v6, %v8272_v43  ;;  %v2164_v33 = vcombine.high %v2042_v63, %v2042_v63  ;;  %v2145_v56 = vrot.slane %v2129_v34, %v8272_v43 }
 0x2b1   : > { %v2171_v36 = vrot.slane %v2042_v63, %v8272_v43  ;;  %v2006_v28 = vmax.f32 %v1831_v39, 0.0  ;;  %v1835_v18 = vpop.f32.mrb[54].mxu0 }
 0x2b2   : > { %v2159_v50 = vrot.slane %v2131_v60, %v8272_v43  ;;  %v3928_v10 = vcombine.low %v2138_v49, %v2152_v52  ;;  %v6579_v3 = vcombine.high %v2138_v49, %v2152_v52  ;;  %v2178_v55 = vrot.slane %v2164_v33, %v8272_v43  ;;  %v7030_v20 = vpop.f32.mrb[55].mxu0 }
 0x2b3   : > { %v2179_v40 = vcombine.high %v2171_v36, %v2171_v36  ;;  %v2187_v23 = vrot.slane %v2171_v36, %v8272_v43  ;;  %v2043_v17 = vmul.f32 %v8261_v57, %v2006_v28  ;;  %v1836_v38 = vadd.f32 %v8266_v42, %v1835_v18 }
 0x2b4   : > { %v3930_v61 = vcombine.low %v2145_v56, %v2159_v50  ;;  %v6580_v30 = vcombine.high %v2145_v56, %v2159_v50  ;;  %v3938_v14 = vrot.slane %v3928_v10, %v8272_v43  ;;  %v3945_v19 = vrot.slane %v6579_v3, %v8272_v43 }
 0x2b5   : > { %v2180_v58 = vcombine.high %v2178_v55, %v2178_v55  ;;  %v2194_v32 = vrot.slane %v2178_v55, %v8272_v43  ;;  %v2201_v5 = vrot.slane %v2179_v40, %v8272_v43  ;;  %v2213_v47 = vcombine.high %v2043_v17, %v2043_v17  ;;  %v1840_v44 = vpop.f32.mrb[56].mxu0 }
 0x2b6   : > { %v3952_v41 = vrot.slane %v3930_v61, %v8272_v43  ;;  %v3959_v62 = vrot.slane %v6580_v30, %v8272_v43  ;;  %v3960_v57 = vcombine.low %v3938_v14, %v3945_v19  ;;  %v2220_v53 = vrot.slane %v2043_v17, %v8272_v43  ;;  %v7033_v31 = vpop.f32.mrb[57].mxu0 }
 0x2b7   : > { %v2208_v34 = vrot.slane %v2180_v58, %v8272_v43  ;;  %v3977_v6 = vcombine.low %v2187_v23, %v2201_v5  ;;  %v6581_v63 = vcombine.high %v2187_v23, %v2201_v5  ;;  %v2227_v8 = vrot.slane %v2213_v47, %v8272_v43 }
 0x2b8   : > { %v3961_v39 = vcombine.low %v3952_v41, %v3959_v62  ;;  %v3968_v60 = vrot.slane %v3960_v57, %v8272_v43  ;;  %v2228_v49 = vcombine.high %v2220_v53, %v2220_v53  ;;  %v2236_v52 = vrot.slane %v2220_v53, %v8272_v43 }
 0x2b9   : > { %v3979_v33 = vcombine.low %v2194_v32, %v2208_v34  ;;  %v6582_v56 = vcombine.high %v2194_v32, %v2208_v34  ;;  %v3987_v36 = vrot.slane %v3977_v6, %v8272_v43  ;;  %v3994_v28 = vrot.slane %v6581_v63, %v8272_v43  ;;  %v1845_v18 = vpop.f32.mrb[58].mxu0 }
 0x2ba   : > { %v3975_v50 = vrot.slane %v3961_v39, %v8272_v43  ;;  %v2229_v10 = vcombine.high %v2227_v8, %v2227_v8  ;;  %v2243_v3 = vrot.slane %v2227_v8, %v8272_v43  ;;  %v2250_v55 = vrot.slane %v2228_v49, %v8272_v43  ;;  %v7036_v20 = vpop.f32.mrb[59].mxu0 }
 0x2bb   : > { %v4001_v40 = vrot.slane %v3979_v33, %v8272_v43  ;;  %v4008_v23 = vrot.slane %v6582_v56, %v8272_v43  ;;  %v4009_v17 = vcombine.low %v3987_v36, %v3994_v28  ;;  %v2007_v61 = vmax.f32 %v1836_v38, 0.0 }
 0x2bc   : > { %v3976_v30 = vcombine.low %v3968_v60, %v3975_v50  ;;  %v2257_v14 = vrot.slane %v2229_v10, %v8272_v43  ;;  %v4026_v19 = vcombine.low %v2236_v52, %v2250_v55  ;;  %v6583_v58 = vcombine.high %v2236_v52, %v2250_v55 }
 0x2bd   : > { %v4010_v32 = vcombine.low %v4001_v40, %v4008_v23  ;;  %v4017_v5 = vrot.slane %v4009_v17, %v8272_v43  ;;  %v2044_v47 = vmul.f32 %v8279_v21, %v2007_v61  ;;  %v1841_v41 = vadd.f32 %v8266_v42, %v1840_v44  ;;  %v1850_v62 = vpop.f32.mrb[60].mxu0 }
 0x2be   : > { %v5848_v57 = vsel %vm1233_vm3, %v3976_v30, 0.0  ;;  %v4028_v53 = vcombine.low %v2243_v3, %v2257_v14  ;;  %v6584_v31 = vcombine.high %v2243_v3, %v2257_v14  ;;  %v4036_v34 = vrot.slane %v4026_v19, %v8272_v43  ;;  %v7039_v38 = vpop.f32.mrb[61].mxu0 }
 0x2bf   : > { %v4024_v6 = vrot.slane %v4010_v32, %v8272_v43  ;;  %v4043_v63 = vrot.slane %v6583_v58, %v8272_v43  ;;  %v2262_v8 = vcombine.high %v2044_v47, %v2044_v47  ;;  %v2269_v39 = vrot.slane %v2044_v47, %v8272_v43 }
 0x2c0   : > { %v4050_v60 = vrot.slane %v4028_v53, %v8272_v43  ;;  %v4057_v21 = vrot.slane %v6584_v31, %v8272_v43  ;;  %v2008_v44 = vmax.f32 %v1841_v41, 0.0  ;;  %v1846_v49 = vadd.f32 %v8266_v42, %v1845_v18 }
 0x2c1   : > { %v4025_v52 = vcombine.low %v4017_v5, %v4024_v6  ;;  %v4058_v33 = vcombine.low %v4036_v34, %v4043_v63  ;;  %v2276_v56 = vrot.slane %v2262_v8, %v8272_v43  ;;  %v2277_v36 = vcombine.high %v2269_v39, %v2269_v39  ;;  %v8395_v28 = vpop.f32.mrb[62].mxu0 }
 0x2c2   : > { %v4059_v50 = vcombine.low %v4050_v60, %v4057_v21  ;;  %v2285_v10 = vrot.slane %v2269_v39, %v8272_v43  ;;  %v2045_v3 = vmul.f32 %v8258_v12, %v2008_v44  ;;  %v2009_v55 = vmax.f32 %v1846_v49, 0.0  ;;  %v7042_v20 = vpop.f32.mrb[63].mxu0 }
 0x2c3   : > { %v5849_v40 = vsel %vm1233_vm3, %v4025_v52, 0.0  ;;  %v4066_v23 = vrot.slane %v4058_v33, %v8272_v43  ;;  %v2278_v17 = vcombine.high %v2276_v56, %v2276_v56  ;;  %v2292_v18 = vrot.slane %v2276_v56, %v8272_v43 }
 0x2c4   : > { %v5850_v61 = vadd.f32 %v5849_v40, %v5848_v57  ;;  %v4073_v30 = vrot.slane %v4059_v50, %v8272_v43  ;;  %v2299_v14 = vrot.slane %v2277_v36, %v8272_v43  ;;  %v2311_v19 = vcombine.high %v2045_v3, %v2045_v3 }
 0x2c5   : > { %v2306_v58 = vrot.slane %v2278_v17, %v8272_v43  ;;  %v2318_v32 = vrot.slane %v2045_v3, %v8272_v43  ;;  %v2046_v12 = vmul.f32 %v8275_v0, %v2009_v55  ;;  %v8408_v5 = vadd.f32 %v8266_v42, %v1850_v62  ;;  %v8410_v47 = vpop.f32.mrb[64].mxu0 }
 0x2c6   : > { %v4074_v41 = vcombine.low %v4066_v23, %v4073_v30  ;;  %v4075_v53 = vcombine.low %v2285_v10, %v2299_v14  ;;  %v6585_v31 = vcombine.high %v2285_v10, %v2299_v14  ;;  %v2325_v57 = vrot.slane %v2311_v19, %v8272_v43  ;;  %v7045_v34 = vpop.f32.mrb[65].mxu0 }
 0x2c7   : > { %v4077_v38 = vcombine.low %v2292_v18, %v2306_v58  ;;  %v6586_v6 = vcombine.high %v2292_v18, %v2306_v58  ;;  %v2326_v63 = vcombine.high %v2318_v32, %v2318_v32  ;;  %v2334_v8 = vrot.slane %v2318_v32, %v8272_v43 }
 0x2c8   : > { %v5851_v39 = vsel %vm1233_vm3, %v4074_v41, 0.0  ;;  %v4085_v0 = vrot.slane %v4075_v53, %v8272_v43  ;;  %v4092_v62 = vrot.slane %v6585_v31, %v8272_v43  ;;  %v2327_v60 = vcombine.high %v2325_v57, %v2325_v57 }
 0x2c9   : > { %v5852_v21 = vadd.f32 %v5851_v39, %v5850_v61  ;;  %v4099_v44 = vrot.slane %v4077_v38, %v8272_v43  ;;  %v4106_v49 = vrot.slane %v6586_v6, %v8272_v43  ;;  %v2341_v52 = vrot.slane %v2325_v57, %v8272_v43  ;;  %v8420_v33 = vpop.f32.mrb[66].mxu0 }
 0x2ca   : > { %v4107_v56 = vcombine.low %v4085_v0, %v4092_v62  ;;  %v2348_v36 = vrot.slane %v2326_v63, %v8272_v43  ;;  %v2355_v50 = vrot.slane %v2327_v60, %v8272_v43  ;;  %v2360_v10 = vcombine.high %v2046_v12, %v2046_v12  ;;  %v7048_v3 = vpop.f32.mrb[67].mxu0 }
 0x2cb   : > { %v4108_v55 = vcombine.low %v4099_v44, %v4106_v49  ;;  %v2357_v20 = vcombine.high %v2341_v52, %v2341_v52  ;;  %v4146_v40 = vrot.slane %v2341_v52, %v8272_v43  ;;  %v2367_v23 = vrot.slane %v2046_v12, %v8272_v43 }
 0x2cc   : > { %v4115_v17 = vrot.slane %v4107_v56, %v8272_v43  ;;  %v4124_v18 = vcombine.low %v2334_v8, %v2348_v36  ;;  %v6587_v61 = vcombine.high %v2334_v8, %v2348_v36  ;;  %v2359_v30 = vcombine.high %v2355_v50, %v2355_v50 }
 0x2cd   : > { %v4122_v14 = vrot.slane %v4108_v55, %v8272_v43  ;;  %v4161_v19 = vrot.slane %v4146_v40, %v8272_v43  ;;  %v4163_v58 = vcombine.low %v2355_v50, %v2357_v20  ;;  %v2374_v32 = vrot.slane %v2360_v10, %v8272_v43  ;;  %v8430_v41 = vpop.f32.mrb[68].mxu0 }
 0x2ce   : > { %v4132_v53 = vrot.slane %v4124_v18, %v8272_v43  ;;  %v4139_v31 = vrot.slane %v6587_v61, %v8272_v43  ;;  %v2375_v57 = vcombine.high %v2367_v23, %v2367_v23  ;;  %v2383_v12 = vrot.slane %v2367_v23, %v8272_v43  ;;  %v7051_v34 = vpop.f32.mrb[69].mxu0 }
 0x2cf   : > { %v4123_v38 = vcombine.low %v4115_v17, %v4122_v14  ;;  %v2376_v6 = vcombine.high %v2374_v32, %v2374_v32  ;;  %v2390_v63 = vrot.slane %v2374_v32, %v8272_v43  ;;  %v4173_v8 = vrot.slane %v4163_v58, %v8272_v43 }
 0x2d0   : > { %v4147_v39 = vcombine.low %v4132_v53, %v4139_v31  ;;  %v2397_v0 = vrot.slane %v2375_v57, %v8272_v43  ;;  %v2405_v62 = vcombine.high %v2383_v12, %v2383_v12  ;;  %v4164_v60 = vcombine.low %v2359_v30, %v2383_v12 }
 0x2d1   : > { %v5853_v44 = vsel %vm1233_vm3, %v4123_v38, 0.0  ;;  %v2404_v49 = vrot.slane %v2376_v6, %v8272_v43  ;;  %v2406_v52 = vcombine.high %v2390_v63, %v2390_v63  ;;  %v2010_v56 = vmax.f32 %v8408_v5, 0.0  ;;  %v8441_v36 = vpop.f32.mrb[70].mxu0 }
 0x2d2   : > { %v5854_v50 = vadd.f32 %v5853_v44, %v5852_v21  ;;  %v4154_v10 = vrot.slane %v4147_v39, %v8272_v43  ;;  %v2407_v3 = vcombine.high %v2397_v0, %v2397_v0  ;;  %v4165_v55 = vcombine.low %v2397_v0, %v2405_v62  ;;  %v7054_v20 = vpop.f32.mrb[71].mxu0 }
 0x2d3   : > { %v4180_v40 = vrot.slane %v4164_v60, %v8272_v43  ;;  %v4212_v23 = vcombine.low %v2404_v49, %v2406_v52  ;;  %v2047_v17 = vmul.f32 %v8287_v54, %v2010_v56  ;;  %v2408_v18 = vcombine.high %v2404_v49, %v2404_v49 }
 0x2d4   : > { %v4162_v61 = vcombine.low %v4154_v10, %v4161_v19  ;;  %v4166_v30 = vcombine.low %v2407_v3, %v2390_v63  ;;  %v4187_v14 = vrot.slane %v4165_v55, %v8272_v43  ;;  %v1856_v5 = vadd.f32 %v8266_v42, %v8395_v28 }
 0x2d5   : > { %v4195_v58 = vcombine.low %v4173_v8, %v4180_v40  ;;  %v2409_v21 = vcombine.high %v2047_v17, %v2047_v17  ;;  %v2416_v32 = vrot.slane %v2047_v17, %v8272_v43  ;;  %v4222_v53 = vrot.slane %v4212_v23, %v8272_v43  ;;  %v8451_v31 = vpop.f32.mrb[72].mxu0 }
 0x2d6   : > { %v5856_v57 = vsel %vm5855_vm4, %v4162_v61, 0.0  ;;  %v4194_v54 = vrot.slane %v4166_v30, %v8272_v43  ;;  %v2011_v12 = vmax.f32 %v1856_v5, 0.0  ;;  %v1861_v19 = vadd.f32 %v8266_v42, %v8410_v47  ;;  %v7057_v34 = vpop.f32.mrb[73].mxu0 }
 0x2d7   : > { %v5857_v38 = vadd.f32 %v5856_v57, %v5854_v50  ;;  %v4203_v28 = vrot.slane %v4195_v58, %v8272_v43  ;;  %v2423_v6 = vrot.slane %v2409_v21, %v8272_v43  ;;  %v2424_v63 = vcombine.high %v2416_v32, %v2416_v32 }
 0x2d8   : > { %v4196_v8 = vcombine.low %v4187_v14, %v4194_v54  ;;  %v2432_v39 = vrot.slane %v2416_v32, %v8272_v43  ;;  %v2048_v0 = vmul.f32 %v8304_v48, %v2011_v12  ;;  %v2012_v62 = vmax.f32 %v1861_v19, 0.0 }
 0x2d9   : > { %v5858_v60 = vrot.slane %v5857_v38, 4  ;;  %v2425_v44 = vcombine.high %v2423_v6, %v2423_v6  ;;  %v2439_v49 = vrot.slane %v2423_v6, %v8272_v43  ;;  %v2446_v52 = vrot.slane %v2424_v63, %v8272_v43  ;;  %v8463_v47 = vpop.f32.mrb[74].mxu0 }
 0x2da   : > { %v4210_v56 = vrot.slane %v4196_v8, %v8272_v43  ;;  %v2454_v50 = vcombine.high %v2432_v39, %v2432_v39  ;;  %v4213_v10 = vcombine.low %v2408_v18, %v2432_v39  ;;  %v2458_v3 = vcombine.high %v2048_v0, %v2048_v0  ;;  %v7060_v55 = vpop.f32.mrb[75].mxu0 }
 0x2db   : > { %v5859_v20 = vadd.f32 %v5858_v60, %v5857_v38  ;;  %v2453_v40 = vrot.slane %v2425_v44, %v8272_v43  ;;  %v2455_v23 = vcombine.high %v2439_v49, %v2439_v49  ;;  %v2456_v48 = vcombine.high %v2446_v52, %v2446_v52 }
 0x2dc   : > { %v4211_v17 = vcombine.low %v4203_v28, %v4210_v56  ;;  %v4214_v61 = vcombine.low %v2446_v52, %v2454_v50  ;;  %v4229_v30 = vrot.slane %v4213_v10, %v8272_v43  ;;  %v2465_v14 = vrot.slane %v2048_v0, %v8272_v43 }
 0x2dd   : > { %v5860_v5 = vrot.slane %v5859_v20, 2  ;;  %v4215_v58 = vcombine.low %v2456_v48, %v2439_v49  ;;  %v4261_v21 = vcombine.low %v2453_v40, %v2455_v23  ;;  %v2457_v32 = vcombine.high %v2453_v40, %v2453_v40  ;;  %v8469_v57 = vpop.f32.mrb[76].mxu0 }
 0x2de   : > { %v5864_v18 = vsel %vm1233_vm3, %v4211_v17, 0.0  ;;  %v4236_v54 = vrot.slane %v4214_v61, %v8272_v43  ;;  %v4244_v12 = vcombine.low %v4222_v53, %v4229_v30  ;;  %v2472_v19 = vrot.slane %v2458_v3, %v8272_v43  ;;  %v7063_v34 = vpop.f32.mrb[77].mxu0 }
 0x2df   : > { %v8474_v38 = vadd.f32 %v5860_v5, %v5859_v20  ;;  %v4243_v28 = vrot.slane %v4215_v58, %v8272_v43  ;;  %v2473_v6 = vcombine.high %v2465_v14, %v2465_v14  ;;  %v2481_v63 = vrot.slane %v2465_v14, %v8272_v43 }
 0x2e0   : > { %v4252_v8 = vrot.slane %v4244_v12, %v8272_v43  ;;  %v2474_v39 = vcombine.high %v2472_v19, %v2472_v19  ;;  %v2488_v0 = vrot.slane %v2472_v19, %v8272_v43  ;;  %v4271_v60 = vrot.slane %v4261_v21, %v8272_v43 }
 0x2e1   : > { %v5862_v44 = vrot.slane %v8474_v38, 1  ;;  %v4245_v53 = vcombine.low %v4236_v54, %v4243_v28  ;;  %v2495_v49 = vrot.slane %v2473_v6, %v8272_v43  ;;  %v2503_v52 = vcombine.high %v2481_v63, %v2481_v63  ;;  %v8483_v56 = vpop.f32.mrb[78].mxu0 }
 0x2e2   : > { %v2502_v50 = vrot.slane %v2474_v39, %v8272_v43  ;;  %v2504_v10 = vcombine.high %v2488_v0, %v2488_v0  ;;  %v4262_v3 = vcombine.low %v2457_v32, %v2481_v63  ;;  %v2049_v55 = vmul.f32 %v8308_v11, %v2012_v62  ;;  %v7066_v20 = vpop.f32.mrb[79].mxu0 }
 0x2e3   : > { %v4259_v40 = vrot.slane %v4245_v53, %v8272_v43  ;;  %v2505_v23 = vcombine.high %v2495_v49, %v2495_v49  ;;  %v4263_v48 = vcombine.low %v2495_v49, %v2503_v52  ;;  %v1866_v17 = vadd.f32 %v8266_v42, %v8420_v33 }
 0x2e4   : > { %v4278_v61 = vrot.slane %v4262_v3, %v8272_v43  ;;  %v4310_v30 = vcombine.low %v2502_v50, %v2504_v10  ;;  %v2506_v14 = vcombine.high %v2502_v50, %v2502_v50  ;;  %v2507_v5 = vcombine.high %v2049_v55, %v2049_v55 }
 0x2e5   : > { %v4260_v58 = vcombine.low %v4252_v8, %v4259_v40  ;;  %v4264_v21 = vcombine.low %v2505_v23, %v2488_v0  ;;  %v4285_v54 = vrot.slane %v4263_v48, %v8272_v43  ;;  %v2514_v32 = vrot.slane %v2049_v55, %v8272_v43  ;;  %v8493_v11 = vpop.f32.mrb[80].mxu0 }
 0x2e6   : > { %v4293_v62 = vcombine.low %v4271_v60, %v4278_v61  ;;  %v2521_v12 = vrot.slane %v2507_v5, %v8272_v43  ;;  %v4320_v19 = vrot.slane %v4310_v30, %v8272_v43  ;;  %v2013_v34 = vmax.f32 %v1866_v17, 0.0  ;;  %v7069_v33 = vpop.f32.mrb[81].mxu0 }
 0x2e7   : > { %v5865_v28 = vsel %vm1233_vm3, %v4260_v58, 0.0  ;;  %v4292_v6 = vrot.slane %v4264_v21, %v8272_v43  ;;  %v2522_v63 = vcombine.high %v2514_v32, %v2514_v32  ;;  %v2530_v8 = vrot.slane %v2514_v32, %v8272_v43 }
 0x2e8   : > { %v5866_v39 = vadd.f32 %v5865_v28, %v5864_v18  ;;  %v4301_v0 = vrot.slane %v4293_v62, %v8272_v43  ;;  %v2523_v53 = vcombine.high %v2521_v12, %v2521_v12  ;;  %v2537_v49 = vrot.slane %v2521_v12, %v8272_v43 }
 0x2e9   : > { %v4294_v60 = vcombine.low %v4285_v54, %v4292_v6  ;;  %v2544_v52 = vrot.slane %v2522_v63, %v8272_v43  ;;  %v2552_v50 = vcombine.high %v2530_v8, %v2530_v8  ;;  %v4311_v10 = vcombine.low %v2506_v14, %v2530_v8  ;;  %v8503_v3 = vpop.f32.mrb[82].mxu0 }
 0x2ea   : > { %v2551_v55 = vrot.slane %v2523_v53, %v8272_v43  ;;  %v2553_v20 = vcombine.high %v2537_v49, %v2537_v49  ;;  %v2050_v40 = vmul.f32 %v8255_v22, %v2013_v34  ;;  %v1871_v18 = vadd.f32 %v8266_v42, %v8430_v41  ;;  %v7072_v23 = vpop.f32.mrb[83].mxu0 }
 0x2eb   : > { %v4308_v48 = vrot.slane %v4294_v60, %v8272_v43  ;;  %v2554_v17 = vcombine.high %v2544_v52, %v2544_v52  ;;  %v4312_v61 = vcombine.low %v2544_v52, %v2552_v50  ;;  %v4327_v30 = vrot.slane %v4311_v10, %v8272_v43 }
 0x2ec   : > { %v4359_v5 = vcombine.low %v2551_v55, %v2553_v20  ;;  %v2555_v58 = vcombine.high %v2551_v55, %v2551_v55  ;;  %v2556_v14 = vcombine.high %v2050_v40, %v2050_v40  ;;  %v2563_v21 = vrot.slane %v2050_v40, %v8272_v43 }
 0x2ed   : > { %v4309_v54 = vcombine.low %v4301_v0, %v4308_v48  ;;  %v4313_v32 = vcombine.low %v2554_v17, %v2537_v49  ;;  %v4334_v62 = vrot.slane %v4312_v61, %v8272_v43  ;;  %v4342_v22 = vcombine.low %v4320_v19, %v4327_v30  ;;  %v8513_v12 = vpop.f32.mrb[84].mxu0 }
 0x2ee   : > { %v4367_v41 = vrot.slane %v4359_v5, %v8272_v43  ;;  %v2570_v34 = vrot.slane %v2556_v14, %v8272_v43  ;;  %v2571_v33 = vcombine.high %v2563_v21, %v2563_v21  ;;  %v2579_v28 = vrot.slane %v2563_v21, %v8272_v43  ;;  %v7075_v6 = vpop.f32.mrb[85].mxu0 }
 0x2ef   : > { %v5867_v63 = vsel %vm1233_vm3, %v4309_v54, 0.0  ;;  %v4341_v8 = vrot.slane %v4313_v32, %v8272_v43  ;;  %v4350_v0 = vrot.slane %v4342_v22, %v8272_v43  ;;  %v2014_v53 = vmax.f32 %v1871_v18, 0.0 }
 0x2f0   : > { %v5868_v49 = vadd.f32 %v5867_v63, %v5866_v39  ;;  %v2572_v60 = vcombine.high %v2570_v34, %v2570_v34  ;;  %v2586_v19 = vrot.slane %v2570_v34, %v8272_v43  ;;  %v2593_v52 = vrot.slane %v2571_v33, %v8272_v43 }
 0x2f1   : > { %v4343_v50 = vcombine.low %v4334_v62, %v4341_v8  ;;  %v4360_v10 = vcombine.low %v2555_v58, %v2579_v28  ;;  %v2051_v55 = vmul.f32 %v8299_v27, %v2014_v53  ;;  %v1876_v20 = vadd.f32 %v8266_v42, %v8441_v36  ;;  %v8526_v40 = vpop.f32.mrb[86].mxu0 }
 0x2f2   : > { %v2600_v23 = vrot.slane %v2572_v60, %v8272_v43  ;;  %v4381_v48 = vrot.slane %v2593_v52, %v8272_v43  ;;  %v6588_v18 = vcombine.high %v2579_v28, %v2593_v52  ;;  %v1881_v39 = vadd.f32 %v8266_v42, %v8451_v31  ;;  %v7078_v17 = vpop.f32.mrb[87].mxu0 }
 0x2f3   : > { %v4357_v61 = vrot.slane %v4343_v50, %v8272_v43  ;;  %v4374_v30 = vrot.slane %v4360_v10, %v8272_v43  ;;  %v2605_v5 = vcombine.high %v2051_v55, %v2051_v55  ;;  %v2612_v27 = vrot.slane %v2051_v55, %v8272_v43 }
 0x2f4   : > { %v4396_v36 = vrot.slane %v4381_v48, %v8272_v43  ;;  %v4399_v58 = vcombine.low %v2586_v19, %v2600_v23  ;;  %v6589_v14 = vcombine.high %v2586_v19, %v2600_v23  ;;  %v4408_v21 = vrot.slane %v6588_v18, %v8272_v43 }
 0x2f5   : > { %v4358_v54 = vcombine.low %v4350_v0, %v4357_v61  ;;  %v4382_v32 = vcombine.low %v4367_v41, %v4374_v30  ;;  %v2619_v62 = vrot.slane %v2605_v5, %v8272_v43  ;;  %v2620_v22 = vcombine.high %v2612_v27, %v2612_v27  ;;  %v8538_v31 = vpop.f32.mrb[88].mxu0 }
 0x2f6   : > { %v4415_v34 = vrot.slane %v4399_v58, %v8272_v43  ;;  %v4422_v33 = vrot.slane %v6589_v14, %v8272_v43  ;;  %v2628_v28 = vrot.slane %v2612_v27, %v8272_v43  ;;  %v2015_v6 = vmax.f32 %v1876_v20, 0.0  ;;  %v7081_v63 = vpop.f32.mrb[89].mxu0 }
 0x2f7   : > { %v5869_v8 = vsel %vm1233_vm3, %v4358_v54, 0.0  ;;  %v4389_v53 = vrot.slane %v4382_v32, %v8272_v43  ;;  %v2621_v60 = vcombine.high %v2619_v62, %v2619_v62  ;;  %v2635_v41 = vrot.slane %v2619_v62, %v8272_v43 }
 0x2f8   : > { %v5870_v0 = vadd.f32 %v5869_v8, %v5868_v49  ;;  %v4430_v19 = vcombine.low %v4408_v21, %v4415_v34  ;;  %v2642_v52 = vrot.slane %v2620_v22, %v8272_v43  ;;  %v2052_v50 = vmul.f32 %v8316_v46, %v2015_v6 }
 0x2f9   : > { %v4397_v10 = vcombine.low %v4389_v53, %v4396_v36  ;;  %v2649_v55 = vrot.slane %v2621_v60, %v8272_v43  ;;  %v2016_v23 = vmax.f32 %v1881_v39, 0.0  ;;  %v1886_v20 = vadd.f32 %v8266_v42, %v8463_v47  ;;  %v8551_v48 = vpop.f32.mrb[90].mxu0 }
 0x2fa   : > { %v4438_v18 = vrot.slane %v4430_v19, %v8272_v43  ;;  %v4401_v17 = vcombine.low %v2628_v28, %v2642_v52  ;;  %v6590_v61 = vcombine.high %v2628_v28, %v2642_v52  ;;  %v2654_v30 = vcombine.high %v2052_v50, %v2052_v50  ;;  %v7084_v49 = vpop.f32.mrb[91].mxu0 }
 0x2fb   : > { %v5871_v5 = vsel %vm5855_vm4, %v4397_v10, 0.0  ;;  %v4448_v27 = vcombine.low %v2635_v41, %v2649_v55  ;;  %v6591_v58 = vcombine.high %v2635_v41, %v2649_v55  ;;  %v2661_v46 = vrot.slane %v2052_v50, %v8272_v43 }
 0x2fc   : > { %v5872_v36 = vadd.f32 %v5871_v5, %v5870_v0  ;;  %v4429_v39 = vrot.slane %v4401_v17, %v8272_v43  ;;  %v4457_v14 = vrot.slane %v6590_v61, %v8272_v43  ;;  %v2668_v47 = vrot.slane %v2654_v30, %v8272_v43 }
 0x2fd   : > { %v4464_v21 = vrot.slane %v4448_v27, %v8272_v43  ;;  %v4471_v54 = vrot.slane %v6591_v58, %v8272_v43  ;;  %v2669_v32 = vcombine.high %v2661_v46, %v2661_v46  ;;  %v2677_v62 = vrot.slane %v2661_v46, %v8272_v43  ;;  %v8562_v22 = vpop.f32.mrb[92].mxu0 }
 0x2fe   : > { %v5873_v34 = vrot.slane %v5872_v36, 4  ;;  %v4431_v28 = vcombine.low %v4422_v33, %v4429_v39  ;;  %v2670_v6 = vcombine.high %v2668_v47, %v2668_v47  ;;  %v2684_v63 = vrot.slane %v2668_v47, %v8272_v43  ;;  %v7087_v8 = vpop.f32.mrb[93].mxu0 }
 0x2ff   : > { %v4479_v53 = vcombine.low %v4457_v14, %v4464_v21  ;;  %v2691_v60 = vrot.slane %v2669_v32, %v8272_v43  ;;  %v2053_v41 = vmul.f32 %v8334_v37, %v2016_v23  ;;  %v2017_v0 = vmax.f32 %v1886_v20, 0.0 }
 0x300   : > { %v5874_v19 = vadd.f32 %v5873_v34, %v5872_v36  ;;  %v4445_v52 = vrot.slane %v4431_v28, %v8272_v43  ;;  %v2698_v50 = vrot.slane %v2670_v6, %v8272_v43  ;;  %v1891_v10 = vadd.f32 %v8266_v42, %v8469_v57 }
 0x301   : > { %v4487_v33 = vrot.slane %v4479_v53, %v8272_v43  ;;  %v4450_v55 = vcombine.low %v2677_v62, %v2691_v60  ;;  %v6592_v17 = vcombine.high %v2677_v62, %v2691_v60  ;;  %v2703_v61 = vcombine.high %v2053_v41, %v2053_v41  ;;  %v8572_v30 = vpop.f32.mrb[94].mxu0 }
 0x302   : > { %v5875_v49 = vrot.slane %v5874_v19, 2  ;;  %v4446_v5 = vcombine.low %v4438_v18, %v4445_v52  ;;  %v4497_v27 = vcombine.low %v2684_v63, %v2698_v50  ;;  %v6593_v37 = vcombine.high %v2684_v63, %v2698_v50  ;;  %v7090_v23 = vpop.f32.mrb[95].mxu0 }
 0x303   : > { %v4478_v20 = vrot.slane %v4450_v55, %v8272_v43  ;;  %v4506_v58 = vrot.slane %v6592_v17, %v8272_v43  ;;  %v2710_v46 = vrot.slane %v2053_v41, %v8272_v43  ;;  %v2717_v57 = vrot.slane %v2703_v61, %v8272_v43 }
 0x304   : > { %v8578_v36 = vadd.f32 %v5875_v49, %v5874_v19  ;;  %v5879_v39 = vsel %vm1233_vm3, %v4446_v5, 0.0  ;;  %v4513_v14 = vrot.slane %v4497_v27, %v8272_v43  ;;  %v4520_v47 = vrot.slane %v6593_v37, %v8272_v43 }
 0x305   : > { %v4480_v18 = vcombine.low %v4471_v54, %v4478_v20  ;;  %v2718_v21 = vcombine.high %v2710_v46, %v2710_v46  ;;  %v2719_v32 = vcombine.high %v2717_v57, %v2717_v57  ;;  %v2726_v62 = vrot.slane %v2710_v46, %v8272_v43  ;;  %v8584_v34 = vpop.f32.mrb[96].mxu0 }
 0x306   : > { %v5877_v28 = vrot.slane %v8578_v36, 1  ;;  %v4528_v6 = vcombine.low %v4506_v58, %v4513_v14  ;;  %v2733_v63 = vrot.slane %v2717_v57, %v8272_v43  ;;  %v2054_v8 = vmul.f32 %v8251_v13, %v2017_v0  ;;  %v7093_v53 = vpop.f32.mrb[97].mxu0 }
 0x307   : > { %v4494_v60 = vrot.slane %v4480_v18, %v8272_v43  ;;  %v2740_v41 = vrot.slane %v2718_v21, %v8272_v43  ;;  %v2747_v54 = vrot.slane %v2719_v32, %v8272_v43  ;;  %v2018_v19 = vmax.f32 %v1891_v10, 0.0 }
 0x308   : > { %v4536_v52 = vrot.slane %v4528_v6, %v8272_v43  ;;  %v2752_v50 = vcombine.high %v2054_v8, %v2054_v8  ;;  %v2759_v55 = vrot.slane %v2054_v8, %v8272_v43  ;;  %v1896_v17 = vadd.f32 %v8266_v42, %v8483_v56 }
 0x309   : > { %v4495_v61 = vcombine.low %v4487_v33, %v4494_v60  ;;  %v4499_v49 = vcombine.low %v2726_v62, %v2740_v41  ;;  %v6594_v5 = vcombine.high %v2726_v62, %v2740_v41  ;;  %v4546_v13 = vcombine.low %v2733_v63, %v2747_v54  ;;  %v8596_v0 = vpop.f32.mrb[98].mxu0 }
 0x30a   : > { %v6595_v27 = vcombine.high %v2733_v63, %v2747_v54  ;;  %v2766_v37 = vrot.slane %v2752_v50, %v8272_v43  ;;  %v2767_v23 = vcombine.high %v2759_v55, %v2759_v55  ;;  %v2775_v10 = vrot.slane %v2759_v55, %v8272_v43  ;;  %v7096_v20 = vpop.f32.mrb[99].mxu0 }
 0x30b   : > { %v5880_v58 = vsel %vm1233_vm3, %v4495_v61, 0.0  ;;  %v4527_v46 = vrot.slane %v4499_v49, %v8272_v43  ;;  %v4555_v57 = vrot.slane %v6594_v5, %v8272_v43  ;;  %v4562_v56 = vrot.slane %v4546_v13, %v8272_v43 }
 0x30c   : > { %v5881_v33 = vadd.f32 %v5880_v58, %v5879_v39  ;;  %v4569_v14 = vrot.slane %v6595_v27, %v8272_v43  ;;  %v2768_v18 = vcombine.high %v2766_v37, %v2766_v37  ;;  %v2782_v21 = vrot.slane %v2766_v37, %v8272_v43 }
 0x30d   : > { %v4529_v32 = vcombine.low %v4520_v47, %v4527_v46  ;;  %v4577_v62 = vcombine.low %v4555_v57, %v4562_v56  ;;  %v2789_v6 = vrot.slane %v2767_v23, %v8272_v43  ;;  %v2055_v63 = vmul.f32 %v8293_v25, %v2018_v19  ;;  %v8608_v8 = vpop.f32.mrb[100].mxu0 }
 0x30e   : > { %v2796_v53 = vrot.slane %v2768_v18, %v8272_v43  ;;  %v2798_v60 = vcombine.high %v2782_v21, %v2782_v21  ;;  %v2019_v41 = vmax.f32 %v1896_v17, 0.0  ;;  %v8613_v39 = vadd.f32 %v8266_v42, %v8493_v11  ;;  %v7099_v54 = vpop.f32.mrb[101].mxu0 }
 0x30f   : > { %v4543_v50 = vrot.slane %v4529_v32, %v8272_v43  ;;  %v4585_v47 = vrot.slane %v4577_v62, %v8272_v43  ;;  %v4548_v55 = vcombine.low %v2775_v10, %v2789_v6  ;;  %v6596_v61 = vcombine.high %v2775_v10, %v2789_v6 }
 0x310   : > { %v4595_v49 = vcombine.low %v2782_v21, %v2796_v53  ;;  %v4616_v25 = vrot.slane %v2798_v60, %v8272_v43  ;;  %v2800_v19 = vcombine.high %v2796_v53, %v2796_v53  ;;  %v2801_v5 = vcombine.high %v2055_v63, %v2055_v63 }
 0x311   : > { %v4544_v13 = vcombine.low %v4536_v52, %v4543_v50  ;;  %v4576_v27 = vrot.slane %v4548_v55, %v8272_v43  ;;  %v4602_v17 = vrot.slane %v6596_v61, %v8272_v43  ;;  %v2808_v42 = vrot.slane %v2055_v63, %v8272_v43  ;;  %v8621_v11 = vpop.f32.mrb[102].mxu0 }
 0x312   : > { %v4609_v37 = vrot.slane %v4595_v49, %v8272_v43  ;;  %v4631_v23 = vrot.slane %v4616_v25, %v8272_v43  ;;  %v2815_v10 = vrot.slane %v2801_v5, %v8272_v43  ;;  %v2056_v20 = vmul.f32 %v8283_v15, %v2019_v41  ;;  %v7102_v58 = vpop.f32.mrb[103].mxu0 }
 0x313   : > { %v5882_v46 = vsel %vm1233_vm3, %v4544_v13, 0.0  ;;  %v4578_v52 = vcombine.low %v4569_v14, %v4576_v27  ;;  %v2816_v57 = vcombine.high %v2808_v42, %v2808_v42  ;;  %v2824_v56 = vrot.slane %v2808_v42, %v8272_v43 }
 0x314   : > { %v5883_v18 = vadd.f32 %v5882_v46, %v5881_v33  ;;  %v4617_v21 = vcombine.low %v4602_v17, %v4609_v37  ;;  %v2817_v32 = vcombine.high %v2815_v10, %v2815_v10  ;;  %v2831_v62 = vrot.slane %v2815_v10, %v8272_v43 }
 0x315   : > { %v4592_v6 = vrot.slane %v4578_v52, %v8272_v43  ;;  %v2838_v63 = vrot.slane %v2816_v57, %v8272_v43  ;;  %v2846_v53 = vcombine.high %v2824_v56, %v2824_v56  ;;  %v4633_v60 = vcombine.low %v2800_v19, %v2824_v56  ;;  %v8632_v54 = vpop.f32.mrb[104].mxu0 }
 0x316   : > { %v4624_v15 = vrot.slane %v4617_v21, %v8272_v43  ;;  %v2845_v14 = vrot.slane %v2817_v32, %v8272_v43  ;;  %v2847_v41 = vcombine.high %v2831_v62, %v2831_v62  ;;  %v2850_v50 = vcombine.high %v2056_v20, %v2056_v20  ;;  %v7105_v55 = vpop.f32.mrb[105].mxu0 }
 0x317   : > { %v4593_v33 = vcombine.low %v4585_v47, %v4592_v6  ;;  %v2848_v61 = vcombine.high %v2838_v63, %v2838_v63  ;;  %v4634_v49 = vcombine.low %v2838_v63, %v2846_v53  ;;  %v4643_v25 = vrot.slane %v4633_v60, %v8272_v43 }
 0x318   : > { %v4632_v5 = vcombine.low %v4624_v15, %v4631_v23  ;;  %v4636_v13 = vcombine.low %v2845_v14, %v2847_v41  ;;  %v2849_v27 = vcombine.high %v2845_v14, %v2845_v14  ;;  %v2857_v17 = vrot.slane %v2056_v20, %v8272_v43 }
 0x319   : > { %v5884_v19 = vsel %vm1233_vm3, %v4593_v33, 0.0  ;;  %v4635_v42 = vcombine.low %v2848_v61, %v2831_v62  ;;  %v4650_v37 = vrot.slane %v4634_v49, %v8272_v43  ;;  %v2864_v10 = vrot.slane %v2850_v50, %v8272_v43  ;;  %v8641_v58 = vpop.f32.mrb[106].mxu0 }
 0x31a   : > { %v5885_v46 = vadd.f32 %v5884_v19, %v5883_v18  ;;  %v5886_v47 = vsel %vm5855_vm4, %v4632_v5, 0.0  ;;  %v4664_v52 = vrot.slane %v4636_v13, %v8272_v43  ;;  %v2865_v57 = vcombine.high %v2857_v17, %v2857_v17  ;;  %v7108_v23 = vpop.f32.mrb[107].mxu0 }
 0x31b   : > { %v4657_v56 = vrot.slane %v4635_v42, %v8272_v43  ;;  %v4665_v21 = vcombine.low %v4643_v25, %v4650_v37  ;;  %v2866_v20 = vcombine.high %v2864_v10, %v2864_v10  ;;  %v2873_v32 = vrot.slane %v2857_v17, %v8272_v43 }
 0x31c   : > { %v5887_v62 = vadd.f32 %v5886_v47, %v5885_v46  ;;  %v2880_v6 = vrot.slane %v2864_v10, %v8272_v43  ;;  %v2887_v63 = vrot.slane %v2865_v57, %v8272_v43  ;;  %v2020_v53 = vmax.f32 %v8613_v39, 0.0 }
 0x31d   : > { %v4666_v18 = vcombine.low %v4657_v56, %v4664_v52  ;;  %v4673_v60 = vrot.slane %v4665_v21, %v8272_v43  ;;  %v2894_v15 = vrot.slane %v2866_v20, %v8272_v43  ;;  %v2895_v14 = vcombine.high %v2873_v32, %v2873_v32  ;;  %v8652_v41 = vpop.f32.mrb[108].mxu0 }
 0x31e   : > { %v5888_v50 = vrot.slane %v5887_v62, 4  ;;  %v2896_v55 = vcombine.high %v2880_v6, %v2880_v6  ;;  %v2897_v33 = vcombine.high %v2887_v63, %v2887_v63  ;;  %v4682_v61 = vcombine.low %v2849_v27, %v2873_v32  ;;  %v7111_v49 = vpop.f32.mrb[109].mxu0 }
 0x31f   : > { %v4680_v25 = vrot.slane %v4666_v18, %v8272_v43  ;;  %v4683_v5 = vcombine.low %v2887_v63, %v2895_v14  ;;  %v2057_v13 = vmul.f32 %v8327_v51, %v2020_v53  ;;  %v2898_v17 = vcombine.high %v2894_v15, %v2894_v15  ;;  %v8676_v18 = vld [vmem:[%s9246_s7] ss:$0 sm:$0xff] }
 0x320   : > { %v8656_v39 = vadd.f32 %v5888_v50, %v5887_v62  ;;  %v4684_v19 = vcombine.low %v2897_v33, %v2880_v6  ;;  %v4685_v42 = vcombine.low %v2894_v15, %v2896_v55  ;;  %v4692_v37 = vrot.slane %v4682_v61, %v8272_v43 }
 0x321   : > { %v4681_v10 = vcombine.low %v4673_v60, %v4680_v25  ;;  %v4699_v46 = vrot.slane %v4683_v5, %v8272_v43  ;;  %v2899_v47 = vcombine.high %v2057_v13, %v2057_v13  ;;  %v2906_v52 = vrot.slane %v2057_v13, %v8272_v43  ;;  %v8661_v27 = vpop.f32.mrb[110].mxu0 }
 0x322   : > { %v5890_v57 = vrot.slane %v8656_v39, 2  ;;  %v4706_v23 = vrot.slane %v4684_v19, %v8272_v43  ;;  %v4713_v51 = vrot.slane %v4685_v42, %v8272_v43  ;;  %v7114_v56 = vpop.f32.mrb[111].mxu0  ;;  %v8671_v53 = vsel %vm727_vm5, 1.0, %v7351_v4 }
 0x323   : > { %v5894_v21 = vsel %vm1233_vm3, %v4681_v10, 0.0  ;;  %v4714_v20 = vcombine.low %v4692_v37, %v4699_v46  ;;  %v2913_v32 = vrot.slane %v2899_v47, %v8272_v43  ;;  %v2914_v62 = vcombine.high %v2906_v52, %v2906_v52 }
 0x324   : > { %v4715_v6 = vcombine.low %v4706_v23, %v4713_v51  ;;  %v2922_v63 = vrot.slane %v2906_v52, %v8272_v43  ;;  %v1906_v59 = vadd.f32 %v8676_v18, %v8503_v3  ;;  %v1911_v3 = vadd.f32 %v8676_v18, %v8513_v12 }
 0x325   : > { %v4722_v60 = vrot.slane %v4714_v20, %v8272_v43  ;;  %v2915_v15 = vcombine.high %v2913_v32, %v2913_v32  ;;  %v2929_v14 = vrot.slane %v2913_v32, %v8272_v43  ;;  %v2936_v50 = vrot.slane %v2914_v62, %v8272_v43  ;;  %v8683_v55 = vpop.f32.mrb[112].mxu0 }
 0x326   : > { %v4729_v33 = vrot.slane %v4715_v6, %v8272_v43  ;;  %v2944_v61 = vcombine.high %v2922_v63, %v2922_v63  ;;  %v4731_v49 = vcombine.low %v2898_v17, %v2922_v63  ;;  %v2021_v25 = vmax.f32 %v1906_v59, 0.0  ;;  %v7117_v5 = vpop.f32.mrb[113].mxu0 }
 0x327   : > { %v2943_v13 = vrot.slane %v2915_v15, %v8272_v43  ;;  %v2945_v19 = vcombine.high %v2929_v14, %v2929_v14  ;;  %v2946_v42 = vcombine.high %v2936_v50, %v2936_v50  ;;  %v2022_v56 = vmax.f32 %v1911_v3, 0.0 }
 0x328   : > { %v4730_v37 = vcombine.low %v4722_v60, %v4729_v33  ;;  %v4732_v10 = vcombine.low %v2936_v50, %v2944_v61  ;;  %v4741_v46 = vrot.slane %v4731_v49, %v8272_v43  ;;  %v2058_v47 = vmul.f32 %v8350_v29, %v2021_v25  ;;  %v671_v61 = vpop.xlane.xlu1 %670 }
 0x329   : > { %v4733_v52 = vcombine.low %v2946_v42, %v2929_v14  ;;  %v4734_v23 = vcombine.low %v2943_v13, %v2945_v19  ;;  %v2947_v51 = vcombine.high %v2943_v13, %v2943_v13  ;;  %v8691_v17 = vpop.f32.mrb[114].mxu0  ;;  %v2059_v29 = vmul.f32 %v8296_v35, %v2022_v56 }
 0x32a   : > { %v5895_v20 = vsel %vm1233_vm3, %v4730_v37, 0.0  ;;  %v4748_v32 = vrot.slane %v4732_v10, %v8272_v43  ;;  %v2948_v62 = vcombine.high %v2058_v47, %v2058_v47  ;;  %v2955_v6 = vrot.slane %v2058_v47, %v8272_v43  ;;  %v7120_v12 = vpop.f32.mrb[115].mxu0 }
 0x32b   : > { %v5896_v63 = vadd.f32 %v5895_v20, %v5894_v21  ;;  %v4755_v59 = vrot.slane %v4733_v52, %v8272_v43  ;;  %v4762_v60 = vrot.slane %v4734_v23, %v8272_v43  ;;  %v2997_v25 = vcombine.high %v2059_v29, %v2059_v29 }
 0x32c   : > { %v4763_v15 = vcombine.low %v4741_v46, %v4748_v32  ;;  %v2962_v14 = vrot.slane %v2948_v62, %v8272_v43  ;;  %v2963_v50 = vcombine.high %v2955_v6, %v2955_v6  ;;  %v2971_v33 = vrot.slane %v2955_v6, %v8272_v43 }
 0x32d   : > { %v4764_v49 = vcombine.low %v4755_v59, %v4762_v60  ;;  %v3004_v5 = vrot.slane %v2059_v29, %v8272_v43  ;;  %vm726_vm6 = vcmp.ne.f32.partialorder %v671_v61, 0.0  ;;  %v8702_v13 = vpop.f32.mrb[116].mxu0  ;;  %v3011_v47 = vrot.slane %v2997_v25, %v8272_v43 }
 0x32e   : > { %v4771_v21 = vrot.slane %v4763_v15, %v8272_v43  ;;  %v2964_v19 = vcombine.high %v2962_v14, %v2962_v14  ;;  %v2978_v42 = vrot.slane %v2962_v14, %v8272_v43  ;;  %v2985_v35 = vrot.slane %v2963_v50, %v8272_v43  ;;  %v7123_v3 = vpop.f32.mrb[117].mxu0 }
 0x32f   : > { %v4778_v37 = vrot.slane %v4764_v49, %v8272_v43  ;;  %v2993_v10 = vcombine.high %v2971_v33, %v2971_v33  ;;  %v4780_v46 = vcombine.low %v2947_v51, %v2971_v33  ;;  %v3012_v20 = vcombine.high %v3004_v5, %v3004_v5  ;;  %v677_v3 = vpop.xlane.xlu1 %676 }
 0x330   : > { %v2992_v52 = vrot.slane %v2964_v19, %v8272_v43  ;;  %v2994_v23 = vcombine.high %v2978_v42, %v2978_v42  ;;  %v2995_v56 = vcombine.high %v2985_v35, %v2985_v35  ;;  %v3013_v12 = vcombine.high %v3011_v47, %v3011_v47 }
 0x331   : > { %v4779_v32 = vcombine.low %v4771_v21, %v4778_v37  ;;  %v4781_v62 = vcombine.low %v2985_v35, %v2993_v10  ;;  %v4790_v6 = vrot.slane %v4780_v46, %v8272_v43  ;;  %v8711_v59 = vpop.f32.mrb[118].mxu0  ;;  %v3020_v14 = vrot.slane %v3004_v5, %v8272_v43 }
 0x332   : > { %v4782_v60 = vcombine.low %v2995_v56, %v2978_v42  ;;  %v4783_v29 = vcombine.low %v2992_v52, %v2994_v23  ;;  %v2996_v15 = vcombine.high %v2992_v52, %v2992_v52  ;;  %v7126_v51 = vpop.f32.mrb[119].mxu0  ;;  %v3027_v49 = vrot.slane %v3011_v47, %v8272_v43 }
 0x333   : > { %v5897_v50 = vsel %vm1233_vm3, %v4779_v32, 0.0  ;;  %v4797_v33 = vrot.slane %v4781_v62, %v8272_v43  ;;  %v3034_v25 = vrot.slane %v3012_v20, %v8272_v43  ;;  %v3041_v42 = vrot.slane %v3013_v12, %v8272_v43 }
 0x334   : > { %v5898_v21 = vadd.f32 %v5897_v50, %v5896_v63  ;;  %v4804_v19 = vrot.slane %v4782_v60, %v8272_v43  ;;  %v4811_v35 = vrot.slane %v4783_v29, %v8272_v43  ;;  %v3042_v10 = vcombine.high %v3020_v14, %v3020_v14  ;;  %v692_v60 = vpop.xlane.xlu0 %691 }
 0x335   : > { %v4812_v37 = vcombine.low %v4790_v6, %v4797_v33  ;;  %v3044_v5 = vcombine.high %v3034_v25, %v3034_v25  ;;  %v4829_v46 = vcombine.low %v2996_v15, %v3020_v14  ;;  %v8721_v52 = vpop.f32.mrb[120].mxu0  ;;  %v4868_v56 = vcombine.low %v3027_v49, %v3041_v42 }
 0x336   : > { %v4813_v23 = vcombine.low %v4804_v19, %v4811_v35  ;;  %v6597_v32 = vcombine.high %v3027_v49, %v3041_v42  ;;  %v8725_v47 = vsel %vm726_vm6, 1.0, %v7351_v4  ;;  %v7129_v63 = vpop.f32.mrb[121].mxu0  ;;  %v4830_v62 = vcombine.low %v3034_v25, %v3042_v10  ;;  %v668_v42 = vpop.xlane.xlu1 %667 }
 0x337   : > { %v4820_v20 = vrot.slane %v4812_v37, %v8272_v43  ;;  %v4837_v12 = vrot.slane %v4829_v46, %v8272_v43  ;;  %v4851_v6 = vrot.slane %v3044_v5, %v8272_v43  ;;  %v4878_v15 = vrot.slane %v4868_v56, %v8272_v43 }
 0x338   : > { %v4827_v29 = vrot.slane %v4813_v23, %v8272_v43  ;;  %v4885_v14 = vrot.slane %v6597_v32, %v8272_v43  ;;  %v1916_v61 = vadd.f32 %v8676_v18, %v8526_v40  ;;  %v4844_v51 = vrot.slane %v4830_v62, %v8272_v43  ;;  %v680_v63 = vpop.xlane.xlu0 %679 }
 0x339   : > { %v4866_v50 = vrot.slane %v4851_v6, %v8272_v43  ;;  %vm728_vm7 = vcmp.ne.f32.partialorder %v677_v3, 0.0  ;;  %v1921_v33 = vadd.f32 %v8676_v18, %v8538_v31  ;;  %vm733_vm8 = vcmp.ne.f32.partialorder %v692_v60, 0.0 }
 0x33a   : > { %v4828_v49 = vcombine.low %v4820_v20, %v4827_v29  ;;  %v4900_v25 = vcombine.low %v4878_v15, %v4885_v14  ;;  %v2023_v19 = vmax.f32 %v1916_v61, 0.0  ;;  %v8740_v35 = vsel %vm728_vm7, 1.0, %v7351_v4  ;;  %v653_v61 = vpop.xlane.xlu1 %652 }
 0x33b   : > { %v4852_v37 = vcombine.low %v4837_v12, %v4844_v51  ;;  %v2024_v10 = vmax.f32 %v1921_v33, 0.0  ;;  %vm725_vm9 = vcmp.ne.f32.partialorder %v668_v42, 0.0  ;;  %v8748_v31 = vsel %vm733_vm8, 1.0, %v7351_v4 }
 0x33c   : > { %v5899_v40 = vsel %vm1233_vm3, %v4828_v49, 0.0  ;;  %v8744_v5 = vrot.slane %v4900_v25, %v8272_v43  ;;  %v2060_v3 = vmul.f32 %v8324_v9, %v2023_v19  ;;  %v8753_v32 = vsel %vm725_vm9, 1.0, %v7351_v4 }
 0x33d   : > { %v5900_v46 = vadd.f32 %v5899_v40, %v5898_v21  ;;  %v4859_v23 = vrot.slane %v4852_v37, %v8272_v43  ;;  %v2061_v56 = vmul.f32 %v8357_v45, %v2024_v10  ;;  %v1926_v12 = vadd.f32 %v8676_v18, %v8551_v48 }
 0x33e   : > { %v3046_v20 = vcombine.high %v2060_v3, %v2060_v3  ;;  %v3053_v62 = vrot.slane %v2060_v3, %v8272_v43  ;;  %vm729_vm10 = vcmp.ne.f32.partialorder %v680_v63, 0.0  ;;  %vm720_vm11 = vcmp.ne.f32.partialorder %v653_v61, 0.0 }
 0x33f   : > { %v4867_v9 = vcombine.low %v4859_v23, %v4866_v50  ;;  %v3095_v6 = vcombine.high %v2061_v56, %v2061_v56  ;;  %v3102_v60 = vrot.slane %v2061_v56, %v8272_v43  ;;  %v8760_v21 = vsel %vm729_vm10, 1.0, %v7351_v4 }
 0x340   : > { %v3060_v45 = vrot.slane %v3046_v20, %v8272_v43  ;;  %v3061_v29 = vcombine.high %v3053_v62, %v3053_v62  ;;  %v3069_v15 = vrot.slane %v3053_v62, %v8272_v43  ;;  %v2025_v14 = vmax.f32 %v1926_v12, 0.0 }
 0x341   : > { %v5901_v51 = vsel %vm5855_vm4, %v4867_v9, 0.0  ;;  %v3109_v33 = vrot.slane %v3095_v6, %v8272_v43  ;;  %v3110_v48 = vcombine.high %v3102_v60, %v3102_v60  ;;  %v3118_v50 = vrot.slane %v3102_v60, %v8272_v43 }
 0x342   : > { %v5902_v49 = vadd.f32 %v5901_v51, %v5900_v46  ;;  %v3062_v25 = vcombine.high %v3060_v45, %v3060_v45  ;;  %v3076_v19 = vrot.slane %v3060_v45, %v8272_v43  ;;  %v3083_v42 = vrot.slane %v3061_v29, %v8272_v43 }
 0x343   : > { %v3111_v37 = vcombine.high %v3109_v33, %v3109_v33  ;;  %v3125_v10 = vrot.slane %v3109_v33, %v8272_v43  ;;  %v3132_v40 = vrot.slane %v3110_v48, %v8272_v43  ;;  %v6448_v12 = vsel %vm720_vm11, 1.0, %v7351_v4 }
 0x344   : > { %v5903_v3 = vrot.slane %v5902_v49, 4  ;;  %v3090_v23 = vrot.slane %v3062_v25, %v8272_v43  ;;  %v4870_v56 = vcombine.low %v3069_v15, %v3083_v42  ;;  %v6598_v63 = vcombine.high %v3069_v15, %v3083_v42  ;;  %v656_v42 = vpop.xlane.xlu0 %655 }
 0x345   : > { %v3139_v20 = vrot.slane %v3111_v37, %v8272_v43  ;;  %v4919_v62 = vcombine.low %v3118_v50, %v3132_v40  ;;  %v6600_v46 = vcombine.high %v3118_v50, %v3132_v40  ;;  %v2062_v50 = vmul.f32 %v6448_v12, %v2025_v14 }
 0x346   : > { %v8774_v9 = vadd.f32 %v5903_v3, %v5902_v49  ;;  %v4892_v6 = vrot.slane %v4870_v56, %v8272_v43  ;;  %v4899_v60 = vrot.slane %v6598_v63, %v8272_v43  ;;  %v4917_v45 = vcombine.low %v3076_v19, %v3090_v23 }
 0x347   : > { %v6599_v29 = vcombine.high %v3076_v19, %v3090_v23  ;;  %v4941_v61 = vrot.slane %v4919_v62, %v8272_v43  ;;  %v4948_v51 = vrot.slane %v6600_v46, %v8272_v43  ;;  %v4966_v33 = vcombine.low %v3125_v10, %v3139_v20 }
 0x348   : > { %v4901_v15 = vcombine.low %v4892_v6, %v4899_v60  ;;  %v4927_v48 = vrot.slane %v4917_v45, %v8272_v43  ;;  %v6601_v25 = vcombine.high %v3125_v10, %v3139_v20  ;;  %v1931_v3 = vadd.f32 %v8676_v18, %v8562_v22 }
 0x349   : > { %v4934_v49 = vrot.slane %v6599_v29, %v8272_v43  ;;  %v4950_v37 = vcombine.low %v4941_v61, %v4948_v51  ;;  %v4976_v40 = vrot.slane %v4966_v33, %v8272_v43  ;;  %v3144_v56 = vcombine.high %v2062_v50, %v2062_v50 }
 0x34a   : > { %v4915_v19 = vrot.slane %v4901_v15, %v8272_v43  ;;  %v4983_v23 = vrot.slane %v6601_v25, %v8272_v43  ;;  %v3151_v63 = vrot.slane %v2062_v50, %v8272_v43  ;;  %v2026_v14 = vmax.f32 %v1931_v3, 0.0 }
 0x34b   : > { %v4949_v62 = vcombine.low %v4927_v48, %v4934_v49  ;;  %v4964_v10 = vrot.slane %v4950_v37, %v8272_v43  ;;  %vm721_vm12 = vcmp.ne.f32.partialorder %v656_v42, 0.0  ;;  %v3158_v12 = vrot.slane %v3144_v56, %v8272_v43 }
 0x34c   : > { %v4916_v20 = vcombine.low %v8744_v5, %v4915_v19  ;;  %v4998_v46 = vcombine.low %v4976_v40, %v4983_v23  ;;  %v3159_v6 = vcombine.high %v3151_v63, %v3151_v63  ;;  %v3167_v60 = vrot.slane %v3151_v63, %v8272_v43 }
 0x34d   : > { %v4957_v22 = vrot.slane %v4949_v62, %v8272_v43  ;;  %v6449_v45 = vsel %vm721_vm12, 1.0, %v7351_v4  ;;  %v1936_v29 = vadd.f32 %v8676_v18, %v8572_v30  ;;  %v3160_v33 = vcombine.high %v3158_v12, %v3158_v12 }
 0x34e   : > { %v5909_v61 = vsel %vm1233_vm3, %v4916_v20, 0.0  ;;  %v5006_v51 = vrot.slane %v4998_v46, %v8272_v43  ;;  %v3174_v5 = vrot.slane %v3158_v12, %v8272_v43  ;;  %v3181_v48 = vrot.slane %v3159_v6, %v8272_v43 }
 0x34f   : > { %v4965_v15 = vcombine.low %v4957_v22, %v4964_v10  ;;  %v2063_v25 = vmul.f32 %v6449_v45, %v2026_v14  ;;  %v2027_v50 = vmax.f32 %v1936_v29, 0.0  ;;  %v3188_v42 = vrot.slane %v3160_v33, %v8272_v43 }
 0x350   : > { %v1941_v49 = vadd.f32 %v8676_v18, %v8584_v34  ;;  %v8805_v30 = vadd.f32 %v8676_v18, %v8596_v0  ;;  %v8809_v37 = vadd.f32 %v8676_v18, %v8608_v8  ;;  %v4968_v3 = vcombine.low %v3167_v60, %v3181_v48 }
 0x351   : > { %v5910_v40 = vsel %vm1233_vm3, %v4965_v15, 0.0  ;;  %v6602_v19 = vcombine.high %v3167_v60, %v3181_v48  ;;  %v3193_v23 = vcombine.high %v2063_v25, %v2063_v25  ;;  %v5015_v63 = vcombine.low %v3174_v5, %v3188_v42 }
 0x352   : > { %v5911_v56 = vadd.f32 %v5910_v40, %v5909_v61  ;;  %v6603_v62 = vcombine.high %v3174_v5, %v3188_v42  ;;  %v3200_v10 = vrot.slane %v2063_v25, %v8272_v43  ;;  %v4990_v34 = vrot.slane %v4968_v3, %v8272_v43 }
 0x353   : > { %v4997_v14 = vrot.slane %v6602_v19, %v8272_v43  ;;  %v3207_v0 = vrot.slane %v3193_v23, %v8272_v43  ;;  %v2064_v20 = vmul.f32 %v8313_v1, %v2027_v50  ;;  %v5025_v8 = vrot.slane %v5015_v63, %v8272_v43 }
 0x354   : > { %v5032_v46 = vrot.slane %v6603_v62, %v8272_v43  ;;  %v3208_v12 = vcombine.high %v3200_v10, %v3200_v10  ;;  %v3216_v6 = vrot.slane %v3200_v10, %v8272_v43  ;;  %v2028_v15 = vmax.f32 %v1941_v49, 0.0 }
 0x355   : > { %v4999_v22 = vcombine.low %v4990_v34, %v4997_v14  ;;  %v3209_v60 = vcombine.high %v3207_v0, %v3207_v0  ;;  %v3223_v45 = vrot.slane %v3207_v0, %v8272_v43  ;;  %v3242_v29 = vcombine.high %v2064_v20, %v2064_v20 }
 0x356   : > { %v5047_v61 = vcombine.low %v5025_v8, %v5032_v46  ;;  %v3230_v33 = vrot.slane %v3208_v12, %v8272_v43  ;;  %v3249_v5 = vrot.slane %v2064_v20, %v8272_v43  ;;  %v2029_v50 = vmax.f32 %v8805_v30, 0.0 }
 0x357   : > { %v5013_v1 = vrot.slane %v4999_v22, %v8272_v43  ;;  %v3237_v48 = vrot.slane %v3209_v60, %v8272_v43  ;;  %v3256_v25 = vrot.slane %v3242_v29, %v8272_v43  ;;  %vm6062_vm5 = vcmask 1042434  }
 0x358   : > { %v5055_v42 = vrot.slane %v5047_v61, %v8272_v43  ;;  %v5017_v40 = vcombine.low %v3216_v6, %v3230_v33  ;;  %v6604_v3 = vcombine.high %v3216_v6, %v3230_v33  ;;  %v3257_v19 = vcombine.high %v3249_v5, %v3249_v5 }
 0x359   : > { %v5014_v23 = vcombine.low %v5006_v51, %v5013_v1  ;;  %v5064_v63 = vcombine.low %v3223_v45, %v3237_v48  ;;  %v6605_v62 = vcombine.high %v3223_v45, %v3237_v48  ;;  %v3258_v10 = vcombine.high %v3256_v25, %v3256_v25 }
 0x35a   : > { %v5039_v34 = vrot.slane %v5017_v40, %v8272_v43  ;;  %v5046_v49 = vrot.slane %v6604_v3, %v8272_v43  ;;  %v3265_v14 = vrot.slane %v3249_v5, %v8272_v43  ;;  %v3272_v0 = vrot.slane %v3256_v25, %v8272_v43 }
 0x35b   : > { %v5912_v20 = vsel %vm1233_vm3, %v5014_v23, 0.0  ;;  %v5072_v30 = vrot.slane %v5064_v63, %v8272_v43  ;;  %v5079_v8 = vrot.slane %v6605_v62, %v8272_v43  ;;  %v3279_v46 = vrot.slane %v3257_v19, %v8272_v43 }
 0x35c   : > { %v5913_v51 = vadd.f32 %v5912_v20, %v5911_v56  ;;  %v5048_v12 = vcombine.low %v5039_v34, %v5046_v49  ;;  %v3286_v6 = vrot.slane %v3258_v10, %v8272_v43  ;;  %v3287_v22 = vcombine.high %v3265_v14, %v3265_v14 }
 0x35d   : > { %v5087_v60 = vcombine.low %v5072_v30, %v5079_v8  ;;  %v3288_v45 = vcombine.high %v3272_v0, %v3272_v0  ;;  %v3289_v29 = vcombine.high %v3279_v46, %v3279_v46  ;;  %v5086_v61 = vrot.slane %v3265_v14, %v8272_v43 }
 0x35e   : > { %v5062_v33 = vrot.slane %v5048_v12, %v8272_v43  ;;  %v5103_v5 = vcombine.low %v3279_v46, %v3287_v22  ;;  %v2065_v1 = vmul.f32 %v8290_v24, %v2028_v15  ;;  %v3290_v48 = vcombine.high %v3286_v6, %v3286_v6 }
 0x35f   : > { %v5094_v25 = vrot.slane %v5087_v60, %v8272_v43  ;;  %v5101_v40 = vrot.slane %v5086_v61, %v8272_v43  ;;  %v5104_v56 = vcombine.low %v3289_v29, %v3272_v0  ;;  %v5105_v3 = vcombine.low %v3286_v6, %v3288_v45 }
 0x360   : > { %v5063_v19 = vcombine.low %v5055_v42, %v5062_v33  ;;  %v5113_v23 = vrot.slane %v5103_v5, %v8272_v43  ;;  %v3291_v63 = vcombine.high %v2065_v1, %v2065_v1  ;;  %v3298_v62 = vrot.slane %v2065_v1, %v8272_v43 }
 0x361   : > { %v5102_v10 = vcombine.low %v5094_v25, %v5101_v40  ;;  %v5120_v34 = vrot.slane %v5104_v56, %v8272_v43  ;;  %v5127_v49 = vrot.slane %v5105_v3, %v8272_v43  ;;  %v2066_v24 = vmul.f32 %v8342_v7, %v2029_v50 }
 0x362   : > { %v5914_v15 = vsel %vm1233_vm3, %v5063_v19, 0.0  ;;  %v3305_v14 = vrot.slane %v3291_v63, %v8272_v43  ;;  %v3306_v20 = vcombine.high %v3298_v62, %v3298_v62  ;;  %v3314_v0 = vrot.slane %v3298_v62, %v8272_v43 }
 0x363   : > { %v5135_v42 = vcombine.low %v5113_v23, %v5120_v34  ;;  %v5915_v30 = vadd.f32 %v5914_v15, %v5913_v51  ;;  %v5916_v8 = vsel %vm5855_vm4, %v5102_v10, 0.0  ;;  %v3340_v46 = vcombine.high %v2066_v24, %v2066_v24 }
 0x364   : > { %v3307_v12 = vcombine.high %v3305_v14, %v3305_v14  ;;  %v3321_v6 = vrot.slane %v3305_v14, %v8272_v43  ;;  %v3328_v22 = vrot.slane %v3306_v20, %v8272_v43  ;;  %v3336_v60 = vcombine.high %v3314_v0, %v3314_v0 }
 0x365   : > { %v5143_v7 = vrot.slane %v5135_v42, %v8272_v43  ;;  %v5917_v50 = vadd.f32 %v5916_v8, %v5915_v30  ;;  %v5106_v45 = vcombine.low %v3290_v48, %v3314_v0  ;;  %v3347_v29 = vrot.slane %v2066_v24, %v8272_v43 }
 0x366   : > { %v3335_v61 = vrot.slane %v3307_v12, %v8272_v43  ;;  %v3337_v33 = vcombine.high %v3321_v6, %v3321_v6  ;;  %v3338_v5 = vcombine.high %v3328_v22, %v3328_v22  ;;  %v5152_v51 = vcombine.low %v3328_v22, %v3336_v60 }
 0x367   : > { %v5918_v1 = vrot.slane %v5917_v50, 4  ;;  %v5134_v25 = vrot.slane %v5106_v45, %v8272_v43  ;;  %v3354_v40 = vrot.slane %v3340_v46, %v8272_v43  ;;  %v3355_v56 = vcombine.high %v3347_v29, %v3347_v29 }
 0x368   : > { %v5153_v3 = vcombine.low %v3338_v5, %v3321_v6  ;;  %v5154_v19 = vcombine.low %v3335_v61, %v3337_v33  ;;  %v5162_v23 = vrot.slane %v5152_v51, %v8272_v43  ;;  %v3339_v63 = vcombine.high %v3335_v61, %v3335_v61 }
 0x369   : > { %v8859_v62 = vadd.f32 %v5918_v1, %v5917_v50  ;;  %v5136_v48 = vcombine.low %v5127_v49, %v5134_v25  ;;  %v3356_v10 = vcombine.high %v3354_v40, %v3354_v40  ;;  %v3363_v34 = vrot.slane %v3347_v29, %v8272_v43 }
 0x36a   : > { %v5169_v24 = vrot.slane %v5153_v3, %v8272_v43  ;;  %v3370_v15 = vrot.slane %v3354_v40, %v8272_v43  ;;  %v3377_v14 = vrot.slane %v3355_v56, %v8272_v43  ;;  %v5176_v20 = vrot.slane %v5154_v19, %v8272_v43 }
 0x36b   : > { %v5920_v0 = vrot.slane %v8859_v62, 2  ;;  %v5150_v42 = vrot.slane %v5136_v48, %v8272_v43  ;;  %v3384_v30 = vrot.slane %v3356_v10, %v8272_v43  ;;  %v3385_v8 = vcombine.high %v3363_v34, %v3363_v34 }
 0x36c   : > { %v5184_v46 = vcombine.low %v5162_v23, %v5169_v24  ;;  %v3386_v49 = vcombine.high %v3370_v15, %v3370_v15  ;;  %v3387_v12 = vcombine.high %v3377_v14, %v3377_v14  ;;  %v5155_v6 = vcombine.low %v3339_v63, %v3363_v34 }
 0x36d   : > { %v5151_v22 = vcombine.low %v5143_v7, %v5150_v42  ;;  %v5201_v60 = vcombine.low %v3377_v14, %v3385_v8  ;;  %v2030_v50 = vmax.f32 %v8809_v37, 0.0  ;;  %v3388_v45 = vcombine.high %v3384_v30, %v3384_v30 }
 0x36e   : > { %v5192_v29 = vrot.slane %v5184_v46, %v8272_v43  ;;  %v5183_v61 = vrot.slane %v5155_v6, %v8272_v43  ;;  %v5202_v33 = vcombine.low %v3387_v12, %v3370_v15  ;;  %v5203_v5 = vcombine.low %v3384_v30, %v3386_v49 }
 0x36f   : > { %v5924_v51 = vsel %vm1233_vm3, %v5151_v22, 0.0  ;;  %v5211_v1 = vrot.slane %v5201_v60, %v8272_v43  ;;  %v2067_v25 = vmul.f32 %v8753_v32, %v2030_v50  ;;  %v1956_v40 = vadd.f32 %v8676_v18, %v8621_v11 }
 0x370   : > { %v5185_v7 = vcombine.low %v5176_v20, %v5183_v61  ;;  %v5218_v56 = vrot.slane %v5202_v33, %v8272_v43  ;;  %v5225_v37 = vrot.slane %v5203_v5, %v8272_v43  ;;  %v1961_v3 = vadd.f32 %v8676_v18, %v8632_v54 }
 0x371   : > { %v3389_v19 = vcombine.high %v2067_v25, %v2067_v25  ;;  %v3396_v23 = vrot.slane %v2067_v25, %v8272_v43  ;;  %v2031_v63 = vmax.f32 %v1956_v40, 0.0  ;;  %v8884_v48 = vadd.f32 %v8676_v18, %v8641_v58 }
 0x372   : > { %v5199_v32 = vrot.slane %v5185_v7, %v8272_v43  ;;  %v5233_v10 = vcombine.low %v5211_v1, %v5218_v56  ;;  %v2032_v11 = vmax.f32 %v1961_v3, 0.0  ;;  %v8889_v34 = vadd.f32 %v8676_v18, %v8652_v41 }
 0x373   : > { %v3403_v24 = vrot.slane %v3389_v19, %v8272_v43  ;;  %v3404_v15 = vcombine.high %v3396_v23, %v3396_v23  ;;  %v3412_v54 = vrot.slane %v3396_v23, %v8272_v43  ;;  %v2068_v14 = vmul.f32 %v8725_v47, %v2031_v63 }
 0x374   : > { %v5200_v20 = vcombine.low %v5192_v29, %v5199_v32  ;;  %v5241_v42 = vrot.slane %v5233_v10, %v8272_v43  ;;  %v2069_v58 = vmul.f32 %v8671_v53, %v2032_v11  ;;  %v2033_v30 = vmax.f32 %v8884_v48, 0.0 }
 0x375   : > { %v3405_v8 = vcombine.high %v3403_v24, %v3403_v24  ;;  %v3419_v46 = vrot.slane %v3403_v24, %v8272_v43  ;;  %v3426_v41 = vrot.slane %v3404_v15, %v8272_v43  ;;  %v3434_v49 = vcombine.high %v3412_v54, %v3412_v54 }
 0x376   : > { %v5925_v12 = vsel %vm1233_vm3, %v5200_v20, 0.0  ;;  %v5204_v6 = vcombine.low %v3388_v45, %v3412_v54  ;;  %v3438_v22 = vcombine.high %v2068_v14, %v2068_v14  ;;  %v3445_v60 = vrot.slane %v2068_v14, %v8272_v43 }
 0x377   : > { %v5926_v47 = vadd.f32 %v5925_v12, %v5924_v51  ;;  %v3433_v50 = vrot.slane %v3405_v8, %v8272_v43  ;;  %v3435_v29 = vcombine.high %v3419_v46, %v3419_v46  ;;  %v3436_v61 = vcombine.high %v3426_v41, %v3426_v41 }
 0x378   : > { %v5232_v53 = vrot.slane %v5204_v6, %v8272_v43  ;;  %v5250_v33 = vcombine.low %v3426_v41, %v3434_v49  ;;  %v3452_v5 = vrot.slane %v3438_v22, %v8272_v43  ;;  %v3453_v1 = vcombine.high %v3445_v60, %v3445_v60 }
 0x379   : > { %v5251_v25 = vcombine.low %v3436_v61, %v3419_v46  ;;  %v5252_v40 = vcombine.low %v3433_v50, %v3435_v29  ;;  %v3437_v7 = vcombine.high %v3433_v50, %v3433_v50  ;;  %v3461_v56 = vrot.slane %v3445_v60, %v8272_v43 }
 0x37a   : > { %v5234_v45 = vcombine.low %v5225_v37, %v5232_v53  ;;  %v5260_v3 = vrot.slane %v5250_v33, %v8272_v43  ;;  %v3454_v19 = vcombine.high %v3452_v5, %v3452_v5  ;;  %v3468_v51 = vrot.slane %v3452_v5, %v8272_v43 }
 0x37b   : > { %v5267_v23 = vrot.slane %v5251_v25, %v8272_v43  ;;  %v3475_v63 = vrot.slane %v3453_v1, %v8272_v43  ;;  %v3483_v48 = vcombine.high %v3461_v56, %v3461_v56  ;;  %v5253_v32 = vcombine.low %v3437_v7, %v3461_v56 }
 0x37c   : > { %v5248_v10 = vrot.slane %v5234_v45, %v8272_v43  ;;  %v3482_v11 = vrot.slane %v3454_v19, %v8272_v43  ;;  %v5274_v24 = vrot.slane %v5252_v40, %v8272_v43  ;;  %v3487_v15 = vcombine.high %v2069_v58, %v2069_v58 }
 0x37d   : > { %v5282_v54 = vcombine.low %v5260_v3, %v5267_v23  ;;  %v3485_v37 = vcombine.high %v3475_v63, %v3475_v63  ;;  %v5281_v14 = vrot.slane %v5253_v32, %v8272_v43  ;;  %v5299_v20 = vcombine.low %v3475_v63, %v3483_v48 }
 0x37e   : > { %v5249_v8 = vcombine.low %v5241_v42, %v5248_v10  ;;  %v5321_v46 = vrot.slane %v3482_v11, %v8272_v43  ;;  %v6606_v41 = vcombine.high %v3468_v51, %v3482_v11  ;;  %v3494_v49 = vrot.slane %v2069_v58, %v8272_v43 }
 0x37f   : > { %v5290_v12 = vrot.slane %v5282_v54, %v8272_v43  ;;  %v5283_v6 = vcombine.low %v5274_v24, %v5281_v14  ;;  %v5300_v22 = vcombine.low %v3485_v37, %v3468_v51  ;;  %v5307_v60 = vrot.slane %v5299_v20, %v8272_v43  ;;  %v695_v51 = vpop.xlane.xlu1 %694 }
 0x380   : > { %v5927_v50 = vsel %vm1233_vm3, %v5249_v8, 0.0  ;;  %v5336_v29 = vrot.slane %v5321_v46, %v8272_v43  ;;  %v5348_v61 = vrot.slane %v6606_v41, %v8272_v43  ;;  %v3501_v53 = vrot.slane %v3487_v15, %v8272_v43 }
 0x381   : > { %v5928_v42 = vadd.f32 %v5927_v50, %v5926_v47  ;;  %v5297_v33 = vrot.slane %v5283_v6, %v8272_v43  ;;  %v5314_v5 = vrot.slane %v5300_v22, %v8272_v43  ;;  %v3502_v58 = vcombine.high %v3494_v49, %v3494_v49 }
 0x382   : > { %v3503_v1 = vcombine.high %v3501_v53, %v3501_v53  ;;  %v3510_v25 = vrot.slane %v3494_v49, %v8272_v43  ;;  %v3517_v40 = vrot.slane %v3501_v53, %v8272_v43  ;;  %v2070_v7 = vmul.f32 %v8740_v35, %v2033_v30 }
 0x383   : > { %v5298_v56 = vcombine.low %v5290_v12, %v5297_v33  ;;  %v5322_v45 = vcombine.low %v5307_v60, %v5314_v5  ;;  %v3524_v3 = vrot.slane %v3502_v58, %v8272_v43  ;;  %v2034_v19 = vmax.f32 %v8889_v34, 0.0 }
 0x384   : > { %v3531_v47 = vrot.slane %v3503_v1, %v8272_v43  ;;  %v3536_v23 = vcombine.high %v2070_v7, %v2070_v7  ;;  %v3543_v63 = vrot.slane %v2070_v7, %v8272_v43  ;;  %vm734_vm13 = vcmp.ne.f32.partialorder %v695_v51, 0.0 }
 0x385   : > { %v5329_v48 = vrot.slane %v5322_v45, %v8272_v43  ;;  %v5929_v32 = vsel %vm1233_vm3, %v5298_v56, 0.0  ;;  %v5339_v10 = vcombine.low %v3510_v25, %v3524_v3  ;;  %v6607_v11 = vcombine.high %v3510_v25, %v3524_v3 }
 0x386   : > { %v5930_v35 = vadd.f32 %v5929_v32, %v5928_v42  ;;  %v5341_v30 = vcombine.low %v3517_v40, %v3531_v47  ;;  %v6608_v24 = vcombine.high %v3517_v40, %v3531_v47  ;;  %v3550_v15 = vrot.slane %v3536_v23, %v8272_v43  ;;  %v683_v23 = vpop.xlane.xlu1 %682 }
 0x387   : > { %v5337_v54 = vcombine.low %v5329_v48, %v5336_v29  ;;  %v5355_v34 = vrot.slane %v5339_v10, %v8272_v43  ;;  %v5362_v37 = vrot.slane %v6607_v11, %v8272_v43  ;;  %v3551_v14 = vcombine.high %v3543_v63, %v3543_v63 }
 0x388   : > { %v5369_v20 = vrot.slane %v5341_v30, %v8272_v43  ;;  %v5397_v8 = vrot.slane %v6608_v24, %v8272_v43  ;;  %v3552_v46 = vcombine.high %v3550_v15, %v3550_v15  ;;  %v3559_v41 = vrot.slane %v3543_v63, %v8272_v43 }
 0x389   : > { %v5931_v49 = vsel %vm5855_vm4, %v5337_v54, 0.0  ;;  %v5370_v12 = vcombine.low %v5348_v61, %v5355_v34  ;;  %v3566_v6 = vrot.slane %v3550_v15, %v8272_v43  ;;  %v3573_v22 = vrot.slane %v3551_v14, %v8272_v43 }
 0x38a   : > { %v8941_v60 = vadd.f32 %v5931_v49, %v5930_v35  ;;  %v5371_v50 = vcombine.low %v5362_v37, %v5369_v20  ;;  %v3580_v29 = vrot.slane %v3552_v46, %v8272_v43  ;;  %v2071_v53 = vmul.f32 %v8760_v21, %v2034_v19 }
 0x38b   : > { %v5378_v42 = vrot.slane %v5370_v12, %v8272_v43  ;;  %v5388_v33 = vcombine.low %v3559_v41, %v3573_v22  ;;  %v6609_v5 = vcombine.high %v3559_v41, %v3573_v22  ;;  %v8948_v58 = vsel %vm734_vm13, 1.0, %v7351_v4 }
 0x38c   : > { %v5385_v61 = vrot.slane %v5371_v50, %v8272_v43  ;;  %v5390_v1 = vcombine.low %v3566_v6, %v3580_v29  ;;  %v6610_v25 = vcombine.high %v3566_v6, %v3580_v29  ;;  %v3585_v40 = vcombine.high %v2071_v53, %v2071_v53 }
 0x38d   : > { %v5404_v7 = vrot.slane %v5388_v33, %v8272_v43  ;;  %v5411_v56 = vrot.slane %v6609_v5, %v8272_v43  ;;  %v3592_v45 = vrot.slane %v2071_v53, %v8272_v43  ;;  %v1976_v21 = vadd.f32 %v8676_v18, %v8661_v27 }
 0x38e   : > { %v5386_v3 = vcombine.low %v5378_v42, %v5385_v61  ;;  %v5418_v19 = vrot.slane %v5390_v1, %v8272_v43  ;;  %v5446_v51 = vrot.slane %v6610_v25, %v8272_v43  ;;  %v3599_v47 = vrot.slane %v3585_v40, %v8272_v43 }
 0x38f   : > { %v5419_v63 = vcombine.low %v5397_v8, %v5404_v7  ;;  %v3600_v48 = vcombine.high %v3592_v45, %v3592_v45  ;;  %v3608_v32 = vrot.slane %v3592_v45, %v8272_v43  ;;  %v2035_v10 = vmax.f32 %v1976_v21, 0.0 }
 0x390   : > { %v5939_v11 = vsel %vm1233_vm3, %v5386_v3, 0.0  ;;  %v5420_v35 = vcombine.low %v5411_v56, %v5418_v19  ;;  %v3601_v30 = vcombine.high %v3599_v47, %v3599_v47  ;;  %v3615_v24 = vrot.slane %v3599_v47, %v8272_v43 }
 0x391   : > { %v5427_v27 = vrot.slane %v5419_v63, %v8272_v43  ;;  %v3622_v15 = vrot.slane %v3600_v48, %v8272_v43  ;;  %vm730_vm14 = vcmp.ne.f32.partialorder %v683_v23, 0.0  ;;  %v1981_v54 = vadd.f32 %v8676_v18, %v8683_v55 }
 0x392   : > { %v5434_v34 = vrot.slane %v5420_v35, %v8272_v43  ;;  %v3629_v37 = vrot.slane %v3601_v30, %v8272_v43  ;;  %v6458_v14 = vsel %vm730_vm14, 1.0, %v7351_v4  ;;  %v1986_v20 = vadd.f32 %v8676_v18, %v8691_v17 }
 0x393   : > { %v5437_v8 = vcombine.low %v3608_v32, %v3622_v15  ;;  %v6611_v46 = vcombine.high %v3608_v32, %v3622_v15  ;;  %v2072_v41 = vmul.f32 %v6458_v14, %v2035_v10  ;;  %v2036_v49 = vmax.f32 %v1981_v54, 0.0 }
 0x394   : > { %v5435_v12 = vcombine.low %v5427_v27, %v5434_v34  ;;  %v5439_v6 = vcombine.low %v3615_v24, %v3629_v37  ;;  %v6612_v22 = vcombine.high %v3615_v24, %v3629_v37  ;;  %v2037_v50 = vmax.f32 %v1986_v20, 0.0 }
 0x395   : > { %v5453_v29 = vrot.slane %v5437_v8, %v8272_v43  ;;  %v5460_v55 = vrot.slane %v6611_v46, %v8272_v43  ;;  %v3634_v53 = vcombine.high %v2072_v41, %v2072_v41  ;;  %v3641_v42 = vrot.slane %v2072_v41, %v8272_v43 }
 0x396   : > { %v5940_v33 = vsel %vm1233_vm3, %v5435_v12, 0.0  ;;  %v5467_v5 = vrot.slane %v5439_v6, %v8272_v43  ;;  %v5495_v18 = vrot.slane %v6612_v22, %v8272_v43  ;;  %v2073_v17 = vmul.f32 %v8330_v26, %v2036_v49 }
 0x397   : > { %v5941_v61 = vadd.f32 %v5940_v33, %v5939_v11  ;;  %v5468_v1 = vcombine.low %v5446_v51, %v5453_v29  ;;  %v3648_v25 = vrot.slane %v3634_v53, %v8272_v43  ;;  %v3649_v40 = vcombine.high %v3641_v42, %v3641_v42 }
 0x398   : > { %v5469_v7 = vcombine.low %v5460_v55, %v5467_v5  ;;  %v3657_v56 = vrot.slane %v3641_v42, %v8272_v43  ;;  %v3683_v45 = vcombine.high %v2073_v17, %v2073_v17  ;;  %v3690_v21 = vrot.slane %v2073_v17, %v8272_v43 }
 0x399   : > { %v5476_v3 = vrot.slane %v5468_v1, %v8272_v43  ;;  %v3650_v19 = vcombine.high %v3648_v25, %v3648_v25  ;;  %v3664_v47 = vrot.slane %v3648_v25, %v8272_v43  ;;  %v3671_v23 = vrot.slane %v3649_v40, %v8272_v43 }
 0x39a   : > { %v5483_v26 = vrot.slane %v5469_v7, %v8272_v43  ;;  %v3697_v51 = vrot.slane %v3683_v45, %v8272_v43  ;;  %v3698_v63 = vcombine.high %v3690_v21, %v3690_v21  ;;  %v3706_v48 = vrot.slane %v3690_v21, %v8272_v43 }
 0x39b   : > { %v3678_v32 = vrot.slane %v3650_v19, %v8272_v43  ;;  %v5486_v10 = vcombine.low %v3657_v56, %v3671_v23  ;;  %v6613_v11 = vcombine.high %v3657_v56, %v3671_v23  ;;  %v2074_v35 = vmul.f32 %v8347_v16, %v2037_v50  ;;  %v7284_v56 = vld [vmem:[%s9246_s7] ss:$0 sm:$0xff] }
 0x39c   : > { %v5484_v30 = vcombine.low %v5476_v3, %v5483_v26  ;;  %v3699_v24 = vcombine.high %v3697_v51, %v3697_v51  ;;  %v3713_v27 = vrot.slane %v3697_v51, %v8272_v43  ;;  %v3720_v15 = vrot.slane %v3698_v63, %v8272_v43 }
 0x39d   : > { %v5488_v54 = vcombine.low %v3664_v47, %v3678_v32  ;;  %v5502_v34 = vrot.slane %v5486_v10, %v8272_v43  ;;  %v5509_v37 = vrot.slane %v6613_v11, %v8272_v43  ;;  %v6614_v14 = vcombine.high %v3664_v47, %v3678_v32 }
 0x39e   : > { %v5942_v20 = vsel %vm1233_vm3, %v5484_v30, 0.0  ;;  %v3727_v8 = vrot.slane %v3699_v24, %v8272_v43  ;;  %v3728_v46 = vcombine.high %v3706_v48, %v3706_v48  ;;  %v3729_v41 = vcombine.high %v3713_v27, %v3713_v27 }
 0x39f   : > { %v5943_v49 = vadd.f32 %v5942_v20, %v5941_v61  ;;  %v5516_v16 = vrot.slane %v5488_v54, %v8272_v43  ;;  %v5517_v12 = vcombine.low %v5495_v18, %v5502_v34  ;;  %v5542_v6 = vrot.slane %v6614_v14, %v8272_v43 }
 0x3a0   : > { %v3730_v22 = vcombine.high %v3720_v15, %v3720_v15  ;;  %v5535_v50 = vcombine.low %v3706_v48, %v3720_v15  ;;  %v5556_v29 = vrot.slane %v3728_v46, %v8272_v43  ;;  %v5574_v55 = vcombine.low %v3727_v8, %v3729_v41 }
 0x3a1   : > { %v5518_v53 = vcombine.low %v5509_v37, %v5516_v16  ;;  %v5525_v42 = vrot.slane %v5517_v12, %v8272_v43  ;;  %v3731_v33 = vcombine.high %v3727_v8, %v3727_v8  ;;  %v3732_v5 = vcombine.high %v2074_v35, %v2074_v35  ;;  %v698_v16 = vpop.xlane.xlu0 %697 }
 0x3a2   : > { %v5549_v17 = vrot.slane %v5535_v50, %v8272_v43  ;;  %v5571_v1 = vrot.slane %v5556_v29, %v8272_v43  ;;  %v5573_v61 = vcombine.low %v3730_v22, %v3713_v27  ;;  %v5590_v25 = vrot.slane %v5574_v55, %v8272_v43 }
 0x3a3   : > { %v5532_v18 = vrot.slane %v5518_v53, %v8272_v43  ;;  %v3739_v40 = vrot.slane %v2074_v35, %v8272_v43  ;;  %v3746_v7 = vrot.slane %v3732_v5, %v8272_v43  ;;  %v1991_v45 = vadd.f32 %v7284_v56, %v8702_v13 }
 0x3a4   : > { %v5557_v21 = vcombine.low %v5542_v6, %v5549_v17  ;;  %v5583_v3 = vrot.slane %v5573_v61, %v8272_v43  ;;  %v1996_v19 = vadd.f32 %v7284_v56, %v8711_v59  ;;  %v9012_v47 = vadd.f32 %v7284_v56, %v8721_v52 }
 0x3a5   : > { %v5533_v23 = vcombine.low %v5525_v42, %v5532_v18  ;;  %v3747_v26 = vcombine.high %v3739_v40, %v3739_v40  ;;  %v3748_v51 = vcombine.high %v3746_v7, %v3746_v7  ;;  %v3755_v63 = vrot.slane %v3739_v40, %v8272_v43 }
 0x3a6   : > { %v5564_v48 = vrot.slane %v5557_v21, %v8272_v43  ;;  %v5605_v32 = vcombine.low %v5583_v3, %v5590_v25  ;;  %v3762_v10 = vrot.slane %v3746_v7, %v8272_v43  ;;  %v2038_v11 = vmax.f32 %v1991_v45, 0.0 }
 0x3a7   : > { %v5944_v13 = vsel %vm1233_vm3, %v5533_v23, 0.0  ;;  %v3769_v35 = vrot.slane %v3747_v26, %v8272_v43  ;;  %v3776_v59 = vrot.slane %v3748_v51, %v8272_v43  ;;  %v3777_v30 = vcombine.high %v3755_v63, %v3755_v63 }
 0x3a8   : > { %v5945_v52 = vadd.f32 %v5944_v13, %v5943_v49  ;;  %v5572_v24 = vcombine.low %v5564_v48, %v5571_v1  ;;  %v5613_v27 = vrot.slane %v5605_v32, %v8272_v43  ;;  %v3778_v15 = vcombine.high %v3762_v10, %v3762_v10 }
 0x3a9   : > { %v3779_v54 = vcombine.high %v3769_v35, %v3769_v35  ;;  %v5575_v34 = vcombine.low %v3731_v33, %v3755_v63  ;;  %v5576_v37 = vcombine.low %v3769_v35, %v3777_v30  ;;  %v2075_v14 = vmul.f32 %v8748_v31, %v2038_v11 }
 0x3aa   : > { %v5946_v20 = vsel %vm5855_vm4, %v5572_v24, 0.0  ;;  %v5623_v8 = vcombine.low %v3776_v59, %v3778_v15  ;;  %v3780_v46 = vcombine.high %v3776_v59, %v3776_v59  ;;  %v2039_v41 = vmax.f32 %v1996_v19, 0.0 }
 0x3ab   : > { %v9023_v12 = vadd.f32 %v5946_v20, %v5945_v52  ;;  %v5597_v49 = vrot.slane %v5575_v34, %v8272_v43  ;;  %v5604_v6 = vrot.slane %v5576_v37, %v8272_v43  ;;  %v5622_v22 = vcombine.low %v3779_v54, %v3762_v10 }
 0x3ac   : > { %v5639_v50 = vrot.slane %v5623_v8, %v8272_v43  ;;  %v3781_v29 = vcombine.high %v2075_v14, %v2075_v14  ;;  %v3788_v31 = vrot.slane %v2075_v14, %v8272_v43  ;;  %v2076_v55 = vmul.f32 %v8948_v58, %v2039_v41 }
 0x3ad   : > { %v5606_v53 = vcombine.low %v5597_v49, %v5604_v6  ;;  %v5632_v42 = vrot.slane %v5622_v22, %v8272_v43  ;;  %v2040_v33 = vmax.f32 %v9012_v47, 0.0  ;;  %vm735_vm15 = vcmp.ne.f32.partialorder %v698_v16, 0.0 }
 0x3ae   : > { %v3795_v5 = vrot.slane %v3781_v29, %v8272_v43  ;;  %v3796_v17 = vcombine.high %v3788_v31, %v3788_v31  ;;  %v3804_v1 = vrot.slane %v3788_v31, %v8272_v43  ;;  %v3830_v61 = vcombine.high %v2076_v55, %v2076_v55 }
 0x3af   : > { %v5620_v25 = vrot.slane %v5606_v53, %v8272_v43  ;;  %v5654_v18 = vcombine.low %v5632_v42, %v5639_v50  ;;  %v3837_v40 = vrot.slane %v2076_v55, %v8272_v43  ;;  %v6463_v7 = vsel %vm735_vm15, 1.0, %v7351_v4  ;;  %v549_v42 = vld [vmem:[%s511_s26] sm:$0xff]  ;;  %s6424_s26 = sshll.u32 %s499_s25, 3 }
 0x3b0   : > { %v3797_v58 = vcombine.high %v3795_v5, %v3795_v5  ;;  %v3811_v56 = vrot.slane %v3795_v5, %v8272_v43  ;;  %v3818_v45 = vrot.slane %v3796_v17, %v8272_v43  ;;  %v3826_v21 = vcombine.high %v3804_v1, %v3804_v1  ;;  %7135 = vmatmul.mubr.msk.f32.vlgmr.msra.gmra.mrb[100].mxu1 %vm5975_vm1, %v549_v42  ;;  %s501_s16 = scalar_lea.vmem [#allocation2], %s6424_s26  ;;  %s7289_s26 = sshll.u32 %s7354_s22, 4  ;;  %s7290_s26 = int_to_ptr.vmem [resolvable:$false] %s7289_s26 }
 0x3b1   : > { %v5621_v3 = vcombine.low %v5613_v27, %v5620_v25  ;;  %v5662_v19 = vrot.slane %v5654_v18, %v8272_v43  ;;  %v5624_v47 = vcombine.low %v3780_v46, %v3804_v1  ;;  %v3844_v23 = vrot.slane %v3830_v61, %v8272_v43  ;;  %7145 = vmatprep.mubr.msk.f32.mxu1 %vm7350_vm0, %v7351_v4  ;;  %s6349_s1 = sshll.u32 %s501_s16, 4  ;;  %s7291_s3 = scalar_lea.vmem %s7290_s26, 256  ;;  %s9199_s1 = int_to_ptr.vmem [resolvable:$true] %s6349_s1 }
 0x3b2   : > { %v3825_v26 = vrot.slane %v3797_v58, %v8272_v43  ;;  %v3827_v51 = vcombine.high %v3811_v56, %v3811_v56  ;;  %v3828_v63 = vcombine.high %v3818_v45, %v3818_v45  ;;  %v5625_v48 = vcombine.low %v3818_v45, %v3826_v21  ;;  %v5969_v45 = vld [vmem:[%s9247_s8] sm:$0xff]  ;;  %v5970_v21 = vld [vmem:[%s9247_s8 + $0x8] sm:$0xff]  ;;  %s7285_s27 = scalar_lea.vmem %s9199_s1, 128  ;;  %p7292_p1 = scmp.lt.s32.totalorder %s9199_s1, %s7290_s26 }
 0x3b3   : > { %v5954_v32 = vsel %vm1233_vm3, %v5621_v3, 0.0  ;;  %v5646_v10 = vrot.slane %v5624_v47, %v8272_v43  ;;  %v3845_v11 = vcombine.high %v3837_v40, %v3837_v40  ;;  %v3846_v13 = vcombine.high %v3844_v23, %v3844_v23  ;;  %p7286_p12 = scmp.ne.s32.totalorder %s9199_s1, %s7285_s27  ;;  %p7293_p2 = scmp.lt.s32.totalorder %s7291_s3, %s7285_s27 }
 0x3b4   : > { %v5653_v35 = vrot.slane %v5625_v48, %v8272_v43  ;;  %v5671_v59 = vcombine.low %v3828_v63, %v3811_v56  ;;  %v5672_v30 = vcombine.low %v3825_v26, %v3827_v51  ;;  %v3829_v52 = vcombine.high %v3825_v26, %v3825_v26 }
 0x3b5   : > { %v3853_v24 = vrot.slane %v3837_v40, %v8272_v43  ;;  %v3860_v27 = vrot.slane %v3844_v23, %v8272_v43  ;;  %v3867_v15 = vrot.slane %v3845_v11, %v8272_v43  ;;  %v3874_v54 = vrot.slane %v3846_v13, %v8272_v43  ;;  %p7287_p13 = pnand %p7286_p12, %p7473_p5  ;;  %p7294_p3 = por %p7293_p2, %p7292_p1 }
 0x3b6   : > { %v5655_v34 = vcombine.low %v5646_v10, %v5653_v35  ;;  %v5681_v37 = vrot.slane %v5671_v59, %v8272_v43  ;;  %v5688_v14 = vrot.slane %v5672_v30, %v8272_v43  ;;  %v2077_v20 = vmul.f32 %v6463_v7, %v2040_v33  ;;  %v5971_v10 = vld [vmem:[%s9247_s8 + $0x10] sm:$0xff] }
 0x3b7   : > { %v3875_v8 = vcombine.high %v3853_v24, %v3853_v24  ;;  %v3876_v46 = vcombine.high %v3860_v27, %v3860_v27  ;;  %v3877_v41 = vcombine.high %v3867_v15, %v3867_v15  ;;  %v5673_v16 = vcombine.low %v3829_v52, %v3853_v24  ;;  %p7288_p0 = pneg %p7287_p13 }
 0x3b8   : > { %v5669_v49 = vrot.slane %v5655_v34, %v8272_v43  ;;  %v5703_v6 = vcombine.low %v5681_v37, %v5688_v14  ;;  %v3878_v22 = vcombine.high %v3874_v54, %v3874_v54  ;;  %v3879_v50 = vcombine.high %v2077_v20, %v2077_v20 }
 0x3b9   : > { %v5674_v29 = vcombine.low %v3867_v15, %v3875_v8  ;;  %v5695_v31 = vrot.slane %v5673_v16, %v8272_v43  ;;  %v5720_v55 = vcombine.low %v3877_v41, %v3860_v27  ;;  %v5721_v53 = vcombine.low %v3874_v54, %v3876_v46  ;;  %p7295_p4 = pnand %p7294_p3, %p7288_p0 }
 0x3ba   : > { %v5670_v33 = vcombine.low %v5662_v19, %v5669_v49  ;;  %v5711_v5 = vrot.slane %v5703_v6, %v8272_v43  ;;  %v3886_v17 = vrot.slane %v2077_v20, %v8272_v43  ;;  %v3893_v1 = vrot.slane %v3879_v50, %v8272_v43 }
 0x3bb   : > { %v5702_v61 = vrot.slane %v5674_v29, %v8272_v43  ;;  %v5730_v25 = vrot.slane %v5720_v55, %v8272_v43  ;;  %v5737_v18 = vrot.slane %v5721_v53, %v8272_v43  ;;  %v7206_v59 = vpack.c.bf16 %v5970_v21, %v5969_v45 }
 0x3bc   : > { %v5955_v40 = vsel %vm1233_vm3, %v5670_v33, 0.0  ;;  %v3894_v7 = vcombine.high %v3886_v17, %v3886_v17  ;;  %v3895_v58 = vcombine.high %v3893_v1, %v3893_v1  ;;  %v3902_v56 = vrot.slane %v3886_v17, %v8272_v43 }
 0x3bd   : > { %v5956_v3 = vadd.f32 %v5955_v40, %v5954_v32  ;;  %v5704_v19 = vcombine.low %v5695_v31, %v5702_v61  ;;  %v5752_v47 = vcombine.low %v5730_v25, %v5737_v18  ;;  %v3909_v23 = vrot.slane %v3893_v1, %v8272_v43  ;;  %v5972_v32 = vld [vmem:[%s9247_s8 + $0x18] sm:$0xff]  ;;  %7207 = vmatpush3.bf16.msra.mxu1 %v7206_v59 }
 0x3be   : > { %v3916_v26 = vrot.slane %v3894_v7, %v8272_v43  ;;  %v3923_v51 = vrot.slane %v3895_v58, %v8272_v43  ;;  %v3924_v63 = vcombine.high %v3902_v56, %v3902_v56  ;;  %v5722_v48 = vcombine.low %v3878_v22, %v3902_v56  ;;  %7208 = vmatprep.subr.bf16.mxu1 %v7349_v2 }
 0x3bf   : > { %v5718_v11 = vrot.slane %v5704_v19, %v8272_v43  ;;  %v5760_v13 = vrot.slane %v5752_v47, %v8272_v43  ;;  %v3925_v35 = vcombine.high %v3909_v23, %v3909_v23  ;;  %v7209_v34 = vpack.c.bf16 %v5972_v32, %v5971_v10 }
 0x3c0   : > { %v3926_v30 = vcombine.high %v3916_v26, %v3916_v26  ;;  %v3927_v52 = vcombine.high %v3923_v51, %v3923_v51  ;;  %v5723_v24 = vcombine.low %v3916_v26, %v3924_v63  ;;  %v5744_v27 = vrot.slane %v5722_v48, %v8272_v43 }
 0x3c1   : > { %v5719_v15 = vcombine.low %v5711_v5, %v5718_v11  ;;  %v5770_v54 = vcombine.low %v3923_v51, %v3925_v35  ;;  %v5863_v37 = vadd.f32 %v5862_v44, %v8474_v38  ;;  %v5878_v46 = vadd.f32 %v5877_v28, %v8578_v36  ;;  %7210 = vmatpush3.bf16.msra.mxu1 %v7209_v34  ;;  %v6159_v34 = vld [vmem:[%s9250_s11 + $0x20] sm:$0xff] }
 0x3c2   : > { %v5751_v14 = vrot.slane %v5723_v24, %v8272_v43  ;;  %v5769_v20 = vcombine.low %v3926_v30, %v3909_v23  ;;  %v5791_v8 = vrot.slane %v3927_v52, %v8272_v43  ;;  %v5891_v49 = vadd.f32 %v5890_v57, %v8656_v39  ;;  %7211 = vmatprep.subr.bf16.mxu1 %v7349_v2  ;;  %v6155_v30 = vld [vmem:[%s9250_s11] sm:$0xff]  ;;  %v6156_v52 = vld [vmem:[%s9250_s11 + $0x8] sm:$0xff] }
 0x3c3   : > { %v5957_v41 = vsel %vm1233_vm3, %v5719_v15, 0.0  ;;  %v5784_v16 = vrot.slane %v5770_v54, %v8272_v43  ;;  %v5905_v38 = vrot.slane %v8774_v9, 2  ;;  %v5921_v28 = vadd.f32 %v5920_v0, %v8859_v62  ;;  %v6158_v15 = vld [vmem:[%s9250_s11 + $0x18] sm:$0xff] }
 0x3c4   : > { %v5958_v44 = vadd.f32 %v5957_v41, %v5956_v3  ;;  %v5753_v6 = vcombine.low %v5744_v27, %v5751_v14  ;;  %v5777_v22 = vrot.slane %v5769_v20, %v8272_v43  ;;  %v5806_v50 = vrot.slane %v5791_v8, %v8272_v43  ;;  %v6157_v27 = vld [vmem:[%s9250_s11 + $0x10] sm:$0xff]  ;;  %v6162_v8 = vld [vmem:[%s9250_s11 + $0x38] sm:$0xff] }
 0x3c5   : > { %v5892_v29 = vrot.slane %v5891_v49, 1  ;;  %v5906_v36 = vadd.f32 %v5905_v38, %v8774_v9  ;;  %v5933_v31 = vrot.slane %v8941_v60, 4  ;;  %v5948_v55 = vrot.slane %v9023_v12, 4  ;;  %v6161_v14 = vld [vmem:[%s9250_s11 + $0x30] sm:$0xff]  ;;  %v6618_v38 = vld [vmem:[%s9249_s10] ss:$0 sm:$0xff] }
 0x3c6   : > { %v5767_v39 = vrot.slane %v5753_v6, %v8272_v43  ;;  %v5792_v57 = vcombine.low %v5777_v22, %v5784_v16  ;;  %v5922_v33 = vrot.slane %v5921_v28, 1  ;;  %v6061_v0 = vsel %vm6060_vm2, %v5878_v46, %v5863_v37  ;;  %v6160_v37 = vld [vmem:[%s9250_s11 + $0x28] sm:$0xff]  ;;  %v6245_v22 = vld [vmem:[%s9252_s13] sm:$0xff] }
 0x3c7   : > { %v5893_v53 = vadd.f32 %v5892_v29, %v5891_v49  ;;  %v5907_v42 = vrot.slane %v5906_v36, 1  ;;  %v5934_v5 = vadd.f32 %v5933_v31, %v8941_v60  ;;  %v5949_v62 = vadd.f32 %v5948_v55, %v9023_v12  ;;  %v6247_v31 = vld [vmem:[%s9252_s13 + $0x10] sm:$0xff]  ;;  %v6249_v55 = vld [vmem:[%s9252_s13 + $0x20] sm:$0xff] }
 0x3c8   : > { %v5768_v9 = vcombine.low %v5760_v13, %v5767_v39  ;;  %v5799_v17 = vrot.slane %v5792_v57, %v8272_v43  ;;  %v5923_v61 = vadd.f32 %v5922_v33, %v5921_v28  ;;  %vm6064_vm6 = vcmask 1043459   ;;  %v6248_v39 = vld [vmem:[%s9252_s13 + $0x18] sm:$0xff] }
 0x3c9   : > { %v5908_v1 = vadd.f32 %v5907_v42, %v5906_v36  ;;  %v5935_v25 = vrot.slane %v5934_v5, 2  ;;  %v5950_v7 = vrot.slane %v5949_v62, 2  ;;  %v6063_v58 = vsel %vm6062_vm5, %v5893_v53, %v6061_v0  ;;  %v6250_v53 = vld [vmem:[%s9252_s13 + $0x28] sm:$0xff]  ;;  %v6252_v33 = vld [vmem:[%s9252_s13 + $0x38] sm:$0xff] }
 0x3ca   : > { %v5807_v18 = vcombine.low %v5799_v17, %v5806_v50  ;;  %v5959_v40 = vsel %vm1233_vm3, %v5768_v9, 0.0  ;;  %vm6066_vm7 = vcmask 1044484   ;;  %vm6068_vm8 = vcmask 1045509   ;;  %v6246_v50 = vld [vmem:[%s9252_s13 + $0x8] sm:$0xff]  ;;  %v6619_v9 = vld [vmem:[%s9251_s12] ss:$0 sm:$0xff] }
 0x3cb   : > { %v5936_v56 = vadd.f32 %v5935_v25, %v5934_v5  ;;  %v5960_v45 = vadd.f32 %v5959_v40, %v5958_v44  ;;  %v5951_v60 = vadd.f32 %v5950_v7, %v5949_v62  ;;  %v6065_v43 = vsel %vm6064_vm6, %v5908_v1, %v6063_v58 }
 0x3cc   : > { %v5961_v21 = vsel %vm5855_vm4, %v5807_v18, 0.0  ;;  %v6067_v19 = vsel %vm6066_vm7, %v5923_v61, %v6065_v43  ;;  %vm6070_vm9 = vcmask 1046534   ;;  %vm6072_vm10 = vcmask 1047559  }
 0x3cd   : > { %v5937_v3 = vrot.slane %v5936_v56, 1  ;;  %v5962_v12 = vadd.f32 %v5961_v21, %v5960_v45  ;;  %v5952_v47 = vrot.slane %v5951_v60, 1  ;;  %v7212_v24 = vpack.c.bf16 %v6156_v52, %v6155_v30 }
 0x3ce   : > { %v7215_v54 = vpack.c.bf16 %v6158_v15, %v6157_v27  ;;  %v7218_v20 = vpack.c.bf16 %v6160_v37, %v6159_v34  ;;  %v7221_v46 = vpack.c.bf16 %v6162_v8, %v6161_v14  ;;  %v7224_v36 = vpack.c.bf16 %v6246_v50, %v6245_v22 }
 0x3cf   : > { %v5938_v23 = vadd.f32 %v5937_v3, %v5936_v56  ;;  %v5963_v26 = vrot.slane %v5962_v12, 4  ;;  %v5953_v51 = vadd.f32 %v5952_v47, %v5951_v60  ;;  %v7227_v57 = vpack.c.bf16 %v6248_v39, %v6247_v31 }
 0x3d0   : > { %v7230_v42 = vpack.c.bf16 %v6250_v53, %v6249_v55 }
 0x3d1   : > { %v5964_v63 = vadd.f32 %v5963_v26, %v5962_v12  ;;  %v6069_v48 = vsel %vm6068_vm8, %v5938_v23, %v6067_v19 }
 0x3d2   : > { %v6071_v10 = vsel %vm6070_vm9, %v5953_v51, %v6069_v48 }
 0x3d3   : > { %v5965_v32 = vrot.slane %v5964_v63, 2 }
 0x3d5   : > { %v5966_v11 = vadd.f32 %v5965_v32, %v5964_v63 }
 0x3d7   : > { %v5967_v13 = vrot.slane %v5966_v11, 1 }
 0x3d9   : > { %v5968_v35 = vadd.f32 %v5967_v13, %v5966_v11 }
 0x3db   : > { %v6073_v59 = vsel %vm6072_vm10, %v5968_v35, %v6071_v10 }
 0x3dc   : > { %7146 = vmatmul.mubr.msk.f32.vlgmr.msra.gmra.mrb[102].mxu1 %vm1233_vm3, %v6073_v59  ;;  %vm6170_vm3 = vcmask 523264  }
 0x3dd   : > { %7164 = vmatprep.mubr.msk.f32.mxu1 %vm7350_vm0, %v7351_v4  ;;  %7213 = vmatpush3.bf16.msra.mxu1 %v7212_v24 }
 0x3de   : > { %7214 = vmatprep.subr.bf16.mxu1 %v7349_v2 }
 0x3e1   : > { %7216 = vmatpush3.bf16.msra.mxu1 %v7215_v54 }
 0x3e2   : > { %7217 = vmatprep.subr.bf16.mxu1 %v7349_v2 }
 0x3e5   : > { %7219 = vmatpush3.bf16.msra.mxu1 %v7218_v20 }
 0x3e6   : > { %7220 = vmatprep.subr.bf16.mxu1 %v7349_v2 }
 0x3e9   : > { %7222 = vmatpush3.bf16.msra.mxu1 %v7221_v46 }
 0x3ea   : > { %7223 = vmatprep.subr.bf16.mxu1 %v7349_v2 }
 0x483   : > { %v6048_v41 = vpop.f32.mrb[100].mxu1 }
 0x484   : > { %v7136_v16 = vpop.f32.mrb[101].mxu1 }
 0x4af   : > { %v6142_v49 = vpop.f32.mrb[102].mxu1 }
 0x4b0   : > { %v6143_v44 = vadd.f32 %v6142_v49, %v6048_v41  ;;  %v7147_v6 = vpop.f32.mrb[103].mxu1 }
 0x4b2   : > { %v6153_v29 = vadd.f32 %v6618_v38, %v6143_v44 }
 0x4b4   : > { %v6154_v28 = vmax.f32 %v6153_v29, 0.0 }
 0x4b6   : > { %7165 = vmatmul.mubr.msk.f32.vlgmr.msra.gmra.mrb[104].mxu1 %vm6170_vm3, %v6154_v28 }
 0x4b7   : > { %7225 = vmatpush3.bf16.msra.mxu1 %v7224_v36  ;;  %7183 = vmatprep.mubr.msk.f32.mxu1 %vm7350_vm0, %v7351_v4  ;;  %v6251_v4 = vld [vmem:[%s9252_s13 + $0x30] sm:$0xff]  ;;  %vm6333_vm0 = vcmask 195584  }
 0x4b8   : > { %7226 = vmatprep.subr.bf16.mxu1 %v7349_v2  ;;  %v7233_v5 = vpack.c.bf16 %v6252_v33, %v6251_v4 }
 0x4bb   : > { %7228 = vmatpush3.bf16.msra.mxu1 %v7227_v57 }
 0x4bc   : > { %7229 = vmatprep.subr.bf16.mxu1 %v7349_v2 }
 0x4bf   : > { %7231 = vmatpush3.bf16.msra.mxu1 %v7230_v42 }
 0x4c0   : > { %7232 = vmatprep.subr.bf16.mxu1 %v7349_v2  ;;  %v6621_v2 = vld [vmem:[%s9253_s14] ss:$0 sm:$0xff] }
 0x4c3   : > { %7234 = vmatpush3.bf16.msra.mxu1 %v7233_v5 }
 0x589   : > { %v6240_v17 = vpop.f32.mrb[104].mxu1 }
 0x58a   : > { %v6241_v62 = vadd.f32 %v6619_v9, %v6240_v17  ;;  %v7166_v0 = vpop.f32.mrb[105].mxu1 }
 0x58c   : > { %v6244_v1 = vmax.f32 %v6241_v62, 0.0 }
 0x58e   : > { %7184 = vmatmul.mubr.msk.f32.vlgmr.msra.gmra.mrb[106].mxu1 %vm6170_vm3, %v6244_v1 }
 0x661   : > { %v6329_v61 = vpop.f32.mrb[106].mxu1 }
 0x662   : > { %v6330_v25 = vadd.f32 %v6621_v2, %v6329_v61  ;;  %v7185_v18 = vpop.f32.mrb[107].mxu1 }
 0x664   : > { %6334 = vst.msk [vmem:[%s501_s16] sm:$0xff] %vm6333_vm0, %v6330_v25 }
 0x665   : > { %7298 = shalt.err (!%p7295_p4)
}
 0x666   : > { %s7299_s25 = scalar_lea.hbm %s9197_s2, 128  ;;  %s7303_s17 = scalar_lea.hbm %s9254_s15, 384 }
 0x667   : > { %p7300_p7 = scmp.ne.s32.totalorder %s9197_s2, %s7299_s25  ;;  %p7304_p10 = scmp.lt.u32.totalorder %s9197_s2, %s9254_s15 }
 0x668   : > { %p7305_p11 = scmp.lt.u32.totalorder %s7303_s17, %s7299_s25  ;;  %p7307_p13 = scmp.lt.u32.totalorder %s7299_s25, %s9197_s2 }
 0x669   : > { %p7301_p8 = pnand %p7300_p7, %p7473_p5 }
 0x66a   : > { %p7306_p12 = por %p7305_p11, %p7304_p10 }
 0x66b   : > { %p7302_p9 = pneg %p7301_p8 }
 0x66c   : > { %p7308_p0 = por %p7307_p13, %p7306_p12 }
 0x66e   : > { %p7309_p1 = pnand %p7308_p0, %p7302_p9 }
 0x670   : > { %7312 = shalt.err (!%p7309_p1)
}
 0x671   : > { %7239 = dma.vmem_to_hbm [thread:$0]  (%p7473_p5), %s9199_s1, 128, %s9197_s2, %s6336_s0  }
 0x672 PF: > { %p7245_p2 = scmp.ge.s32.totalorder %s7347_s21, 2  ;;  %s6361_s3 = sand.u32 1, %s7335_s18  }
 0x673   : > { %s6362_s27 = scalar_lea.sflag [#allocation3], %s6361_s3 }
 0x674   : > { %p7242_p3 = pnand %p7245_p2, %p7477_p6 }
 0x676   : > { %7330 = dma.done.wait (!%p7242_p3), %s6362_s27, 128  }
 0x677   : > { %7332 = vsyncadd (!%p7242_p3), %s6362_s27, 4294967168  ;;  %s9266_s26 = sld [smem:[#allocation5_spill]]  ;;  %p25_p4 = scmp.ge.s32.totalorder %s7460_s24, 5  }
 0x678   : > { %s9267_s18 = smov %s7339_s19  ;;  %s9268_s19 = smov %s7343_s20 }
 0x679   : > { %s9270_s21 = smov %s7460_s24  ;;  %27 = sbr.rel (!%p25_p4) target bundleno = 8 (0x8), region = 118 }
 0x67d   : > { %s9269_s20 = smov %s9266_s26 }
 0x680   :  { %6367 = vsyncpa [#allocation3], 1 }
 0x681   :  { %6369 = vsyncpa [#allocation3 + $0x1], 1 }

</bundles_post_ra>
